<compile_context>
chip_gen: v7x
topology: tpu7x:2x2x1
jax: 0.10.0
libtpu: 0.0.40
codegen_flags: <defaults>
</compile_context>

<pallas_src>
import functools

import jax
import jax.numpy as jnp
from jax.experimental import pallas as pl
from jax.experimental.pallas import tpu as pltpu

AFFINE_EPS = 1e-4
LOGSCALE_FACTOR = 3.0
HALO = 2  # two stacked 3x3 convs => 5x5 receptive field => 2-row/col halo


def _im2col_3x3(a, oh, ow):
    """a: (oh+2, ow+2, c) -> (oh, ow, 9*c), tap order (ky, kx, c) row-major
    (matches w.reshape(9*c, cout) of a (3, 3, c, cout) kernel)."""
    cols = jnp.concatenate([a[:, 0:ow], a[:, 1:ow + 1], a[:, 2:ow + 2]], axis=-1)
    return jnp.concatenate([cols[0:oh], cols[1:oh + 1], cols[2:oh + 2]], axis=-1)


# ---------------------------------------------------------------------------
# Pallas kernel: one (batch, row-tile) block of the CondAffineCoupling forward
# ---------------------------------------------------------------------------
def _coupling_kernel(fin_ref, x2_ref, mask_ref, w1_ref, b1_ref, w2_ref, b2_ref,
                     w3t_ref, b3t_ref, z2_ref, ld_ref, *, tile_h, width, c_co, eps):
    th2, th4, wd2 = tile_h + 2, tile_h + 4, width + 2
    rows = tile_h * width
    t = pl.program_id(1)

    # Row window (incl. 2-row halo) of this batch's zero-padded subnet input.  The fin
    # block is the whole padded image (index_map ignores t -> fetched once per batch),
    # so overlapping halos are never duplicated in HBM.
    row0 = pl.multiple_of(t * tile_h, tile_h)
    fin = fin_ref[pl.ds(row0, th4), :, :]                       # (th4, W+4, cf) bf16
    cf = fin.shape[-1]

    # ---- conv1: 3x3 "valid" over the halo window as ONE im2col matmul (bf16 operands).
    slab1 = _im2col_3x3(fin, th2, wd2).reshape(th2 * wd2, 9 * cf)
    h = jax.lax.dot_general(slab1, w1_ref[...], (((1,), (0,)), ((), ())),
                            preferred_element_type=jnp.float32)
    h = jnp.maximum(h + b1_ref[...], 0.0)                       # (th2*wd2, hid) f32

    # ---- conv2: 1x1 hidden -> hidden (kernel_hidden == 1) + ReLU.
    h = jax.lax.dot_general(h.astype(jnp.bfloat16), w2_ref[...],
                            (((1,), (0,)), ((), ())),
                            preferred_element_type=jnp.float32)
    h = jnp.maximum(h + b2_ref[...], 0.0)
    hid = h.shape[-1]

    # Zero the extended positions outside the image so conv3 sees the reference's zero
    # "same" padding of h.  Mask is a tiny precomputed per-tile constant (no iotas).
    h = h.reshape(th2, wd2, hid) * mask_ref[...][:, :, None]

    # ---- conv3 (Conv2dZeros): exp(3*logs) and the 'cross' permutation are folded into
    #      w3t/b3t in glue; computed transposed so the result is channel-major and the
    #      whole coupling tail is lane-dense (rows on lanes).  f32 operands: scale feeds
    #      logdet and the MXU has plenty of slack at these shapes.
    slab3 = _im2col_3x3(h, tile_h, width).reshape(rows, 9 * hid)
    h3 = jax.lax.dot_general(w3t_ref[...], slab3, (((1,), (1,)), ((), ())),
                             preferred_element_type=jnp.float32)
    h3 = h3 + b3t_ref[...]                                      # (2*c_co, rows)

    # ---- affine coupling on z2 (z1 is a passthrough handled in glue).
    shift = h3[:c_co, :]
    scale = jax.nn.sigmoid(h3[c_co:, :] + 2.0) + eps
    z2_ref[...] = (x2_ref[...] + shift) * scale                 # lane-dense store
    ld_ref[...] = jnp.sum(jnp.log(scale), axis=(0, 1), keepdims=True)


def _const_spec(a):
    return pl.BlockSpec(a.shape, lambda b, t, _nd=a.ndim: (0,) * _nd)


def _default_tile_h(h):
    for cand in range(min(h, 128), 0, -1):
        if h % cand == 0:
            return cand
    return h


def _cdiv(a, b):
    return -(-a // b)


# ---------------------------------------------------------------------------
# Wrapper: layout glue / masks / parameter folding + pallas_call
# ---------------------------------------------------------------------------
def cond_affine_coupling_forward(x, ft, logdet, kparams, *, tile_h=None, eps=AFFINE_EPS):
    """x: (N,H,W,Cin) f32, ft: (N,H,W,Ccond) f32, logdet: (N,1) f32."""
    n, hh, ww, cin = x.shape
    c_nn = cin // 2
    c_co = cin - c_nn
    if tile_h is None:
        tile_h = _default_tile_h(hh)
    assert hh % tile_h == 0, "H must be divisible by tile_h"
    n_t = hh // tile_h
    rows = tile_h * ww
    th2, wd2, wd4 = tile_h + 2, ww + 2, ww + 4

    w1f, b1, w2, b2, w3t, b3t = kparams
    cf = c_nn + ft.shape[-1]
    hid = w2.shape[0]

    # Subnet input (z1 ++ ft), zero-padded ONCE per batch; the kernel slices its own
    # overlapping row window, so the halo is not duplicated in HBM.
    fin = jnp.concatenate([x[..., :c_nn], ft], axis=-1).astype(jnp.bfloat16)
    fin_p = jnp.pad(fin, ((0, 0), (HALO, HALO), (HALO, HALO), (0, 0)))

    # Only the z2 half is streamed through the kernel, channel-major so loads/stores are
    # lane-dense (last dim = tile_h*W).
    x2_cm = x[..., c_nn:].reshape(n, n_t, rows, c_co).transpose(0, 1, 3, 2)

    # Per-row-tile validity mask for the extended conv1/conv2 output (conv3's zero pad).
    gr = jnp.arange(n_t)[:, None] * tile_h + jnp.arange(th2)[None, :] - 1
    gc = jnp.arange(wd2) - 1
    mask = (((gr >= 0) & (gr < hh))[:, :, None]
            & ((gc >= 0) & (gc < ww))[None, None, :]).astype(jnp.float32)

    kernel = functools.partial(_coupling_kernel, tile_h=tile_h, width=ww,
                               c_co=c_co, eps=eps)

    in_specs = [
        pl.BlockSpec((None, hh + 2 * HALO, wd4, cf), lambda b, t: (b, 0, 0, 0)),
        pl.BlockSpec((None, None, c_co, rows), lambda b, t: (b, t, 0, 0)),
        pl.BlockSpec((None, th2, wd2), lambda b, t: (t, 0, 0)),
        _const_spec(w1f), _const_spec(b1), _const_spec(w2), _const_spec(b2),
        _const_spec(w3t), _const_spec(b3t),
    ]
    out_specs = (
        pl.BlockSpec((None, None, c_co, rows), lambda b, t: (b, t, 0, 0)),
        pl.BlockSpec((None, None, 1, 1), lambda b, t: (b, t, 0, 0)),
    )
    out_shape = (jax.ShapeDtypeStruct((n, n_t, c_co, rows), jnp.float32),
                 jax.ShapeDtypeStruct((n, n_t, 1, 1), jnp.float32))

    # VMEM budget estimate (pipeline blocks double-buffered + slabs + hidden acts),
    # padded to (sublane, 128-lane) layout; clamped to a range safe on all generations
    # (v5e/v6e 128 MiB, v7x 64 MiB physical).
    def padded(shape, itemsize, sublane):
        lead = 1
        for d in shape[:-2]:
            lead *= d
        return (lead * _cdiv(shape[-2], sublane) * sublane
                * _cdiv(shape[-1], 128) * 128 * itemsize)

    est = (2 * padded((hh + 2 * HALO, wd4, cf), 2, 16)   # fin block (bf16), 2 buffers
           + 4 * 2 * padded((c_co, rows), 4, 8)          # x2 + z2 blocks, 2 buffers each
           + padded((th2 * wd2, 9 * cf), 2, 16)          # conv1 im2col slab (bf16)
           + 3 * padded((th2 * wd2, hid), 4, 8)          # hidden activations (f32)
           + padded((rows, 9 * hid), 4, 8)               # conv3 im2col slab (f32)
           + 2 * padded((2 * c_co, rows), 4, 8))         # h3 / scale
    vmem_limit = int(min(max(2 * est, 16 << 20), 48 << 20))

    z2_out, ld_part = pl.pallas_call(
        kernel,
        out_shape=out_shape,
        grid_spec=pltpu.PrefetchScalarGridSpec(
            num_scalar_prefetch=0,
            grid=(n, n_t),
            in_specs=in_specs,
            out_specs=out_specs,
        ),
        compiler_params=pltpu.CompilerParams(
            dimension_semantics=("parallel", "parallel"),
            vmem_limit_bytes=vmem_limit,
        ),
    )(fin_p, x2_cm, mask, w1f, b1, w2, b2, w3t, b3t)

    z2 = z2_out.transpose(0, 1, 3, 2).reshape(n, hh, ww, c_co)
    out = jnp.concatenate([x[..., :c_nn], z2], axis=-1)
    ld = logdet + jnp.sum(ld_part.reshape(n, n_t), axis=1, keepdims=True)
    return out, ld


# ---------------------------------------------------------------------------
# Parameter construction (deterministic, synthetic) + glue-side folding
# ---------------------------------------------------------------------------
def init_params(key, cin_f, cout, hid):
    ks = jax.random.split(key, 7)

    def nrm(k, shape, std=0.05):
        return (std * jax.random.normal(k, shape)).astype(jnp.float32)

    return {
        "w1": nrm(ks[0], (3, 3, cin_f, hid)),   # Conv2d 3x3 (ActNorm modeled as bias)
        "b1": nrm(ks[1], (hid,), 0.02),
        "w2": nrm(ks[2], (hid, hid)),           # Conv2d 1x1 (kernel_hidden = 1)
        "b2": nrm(ks[3], (hid,), 0.02),
        "w3": nrm(ks[4], (3, 3, hid, cout)),    # Conv2dZeros 3x3 (synthetic non-zero init)
        "b3": nrm(ks[5], (cout,), 0.02),
        "logs": nrm(ks[6], (cout,), 0.02),
    }


def to_kernel_params(p):
    """Flatten 3x3 weights to (9*Cin, Cout), fold exp(3*logs) into the last conv, permute
    its output channels so the 'cross' split becomes contiguous halves, and transpose it
    so the kernel can produce a channel-major (lane-dense) result."""
    hid = p["w2"].shape[0]
    cout = p["w3"].shape[-1]
    cin_f = p["w1"].shape[2]
    gain = jnp.exp(p["logs"] * LOGSCALE_FACTOR)                       # (cout,)
    perm = jnp.array(list(range(0, cout, 2)) + list(range(1, cout, 2)), jnp.int32)

    w1f = p["w1"].reshape(9 * cin_f, hid).astype(jnp.bfloat16)
    b1 = p["b1"].reshape(1, hid).astype(jnp.float32)
    w2 = p["w2"].astype(jnp.bfloat16)
    b2 = p["b2"].reshape(1, hid).astype(jnp.float32)
    w3t = jnp.transpose(
        (p["w3"].reshape(9 * hid, cout) * gain[None, :])[:, perm]).astype(jnp.float32)
    b3t = ((p["b3"] * gain)[perm]).reshape(cout, 1).astype(jnp.float32)
    return (w1f, b1, w2, b2, w3t, b3t)


# ---------------------------------------------------------------------------
# Pure-JAX reference (mirrors the PyTorch forward exactly, NHWC, f32 HIGHEST)
# ---------------------------------------------------------------------------
def _ref_conv1x1(x, w, b):
    return jnp.einsum("nhwc,co->nhwo", x, w,
                      precision=jax.lax.Precision.HIGHEST) + b.reshape(1, 1, 1, -1)


def _ref_conv3x3_same(x, w, b):
    n, hh, ww, _ = x.shape
    xp = jnp.pad(x, ((0, 0), (1, 1), (1, 1), (0, 0)))
    acc = jnp.zeros((n, hh, ww, w.shape[-1]), jnp.float32)
    for ky in range(3):
        for kx in range(3):
            acc = acc + jnp.einsum(
                "nhwc,co->nhwo", xp[:, ky:ky + hh, kx:kx + ww, :], w[ky, kx],
                precision=jax.lax.Precision.HIGHEST)
    return acc + b.reshape(1, 1, 1, -1)


def reference_forward(x, ft, logdet, p, eps=AFFINE_EPS):
    c_nn = x.shape[-1] // 2
    z1, z2 = x[..., :c_nn], x[..., c_nn:]
    h = jax.nn.relu(_ref_conv3x3_same(jnp.concatenate([z1, ft], -1), p["w1"], p["b1"]))
    h = jax.nn.relu(_ref_conv1x1(h, p["w2"], p["b2"]))
    h = _ref_conv3x3_same(h, p["w3"], p["b3"]) * jnp.exp(
        p["logs"].reshape(1, 1, 1, -1) * LOGSCALE_FACTOR)
    shift, scale = h[..., 0::2], h[..., 1::2]          # thops.split_feature(..., 'cross')
    scale = jax.nn.sigmoid(scale + 2.0) + eps
    z2 = (z2 + shift) * scale
    logdet = logdet + jnp.sum(jnp.log(scale), axis=(1, 2, 3))[:, None]
    return jnp.concatenate([z1, z2], -1), logdet


# ---------------------------------------------------------------------------
if __name__ == "__main__":
    N, H, W = 2, 16, 16
    IN_CH = 4            # in_channels
    COND_CH = 4          # in_channels_rrdb (channels of `ft`)
    HIDDEN = 32          # hidden_channels
    C_NN = IN_CH // 2
    C_CO = IN_CH - C_NN

    key = jax.random.PRNGKey(0)
    kx, kft, kp = jax.random.split(key, 3)

    x = jax.random.normal(kx, (N, H, W, IN_CH), jnp.float32)
    ft = jax.random.normal(kft, (N, H, W, COND_CH), jnp.float32)
    logdet = jnp.zeros((N, 1), jnp.float32)

    raw = init_params(kp, C_NN + COND_CH, 2 * C_CO, HIDDEN)
    kparams = to_kernel_params(raw)

    ref_out, ref_ld = reference_forward(x, ft, logdet, raw)

    # Default tiling: whole image height per grid step (grid = (N, 1)).
    fwd = jax.jit(cond_affine_coupling_forward)
    out, ld = fwd(x, ft, logdet, kparams)
    jax.block_until_ready((out, ld))
    assert out.shape == (N, H, W, IN_CH) and ld.shape == (N, 1)
    # conv1/conv2 use bf16 MXU operands vs f32 HIGHEST reference -> modest tolerances.
    assert jnp.allclose(out, ref_out, atol=1e-2, rtol=2e-2), "output mismatch"
    assert jnp.allclose(ld, ref_ld, atol=1e-1, rtol=2e-2), "logdet mismatch"

    # Also exercise the multi-row-tile path (halo slicing + boundary masking across tiles).
    fwd_t8 = jax.jit(functools.partial(cond_affine_coupling_forward, tile_h=8))
    out8, ld8 = fwd_t8(x, ft, logdet, kparams)
    jax.block_until_ready((out8, ld8))
    assert jnp.allclose(out8, ref_out, atol=1e-2, rtol=2e-2), "tiled output mismatch"
    assert jnp.allclose(ld8, ref_ld, atol=1e-1, rtol=2e-2), "tiled logdet mismatch"

    print("KERNEL_OK")
</pallas_src>

<mosaic_0001>
module attributes {stable_mosaic.version = 11 : i64} {
  func.func @_coupling_kernel(%arg0: i32, %arg1: i32, %arg2: memref<1x20x20x6xbf16, #tpu.memory_space<vmem>>, %arg3: memref<1x1x2x256xf32, #tpu.memory_space<vmem>>, %arg4: memref<1x18x18xf32, #tpu.memory_space<vmem>>, %arg5: memref<54x32xbf16, #tpu.memory_space<vmem>>, %arg6: memref<1x32xf32, #tpu.memory_space<vmem>>, %arg7: memref<32x32xbf16, #tpu.memory_space<vmem>>, %arg8: memref<1x32xf32, #tpu.memory_space<vmem>>, %arg9: memref<4x288xf32, #tpu.memory_space<vmem>>, %arg10: memref<4x1xf32, #tpu.memory_space<vmem>>, %arg11: memref<1x1x2x256xf32, #tpu.memory_space<vmem>>, %arg12: memref<1x1x1x1xf32, #tpu.memory_space<vmem>>) attributes {dimension_semantics = [#tpu.dimension_semantics<parallel>, #tpu.dimension_semantics<parallel>], iteration_bounds = array<i64: 2, 1>, scalar_prefetch = 0 : i64, scratch_operands = 0 : i64, tpu.core_type = #tpu.core_type<tc>, window_params = [{transform_indices = @transform_0, window_bounds = array<i64: 1, 20, 20, 6>}, {transform_indices = @transform_1, window_bounds = array<i64: 1, 1, 2, 256>}, {transform_indices = @transform_2, window_bounds = array<i64: 1, 18, 18>}, {pipeline_mode = #tpu.pipeline_mode<synchronous>, transform_indices = @transform_3, window_bounds = array<i64: 54, 32>}, {pipeline_mode = #tpu.pipeline_mode<synchronous>, transform_indices = @transform_4, window_bounds = array<i64: 1, 32>}, {pipeline_mode = #tpu.pipeline_mode<synchronous>, transform_indices = @transform_5, window_bounds = array<i64: 32, 32>}, {pipeline_mode = #tpu.pipeline_mode<synchronous>, transform_indices = @transform_6, window_bounds = array<i64: 1, 32>}, {pipeline_mode = #tpu.pipeline_mode<synchronous>, transform_indices = @transform_7, window_bounds = array<i64: 4, 288>}, {pipeline_mode = #tpu.pipeline_mode<synchronous>, transform_indices = @transform_8, window_bounds = array<i64: 4, 1>}, {transform_indices = @transform_9, window_bounds = array<i64: 1, 1, 2, 256>}, {transform_indices = @transform_10, window_bounds = array<i64: 1, 1, 1, 1>}]} {
    %c16_i32 = arith.constant 16 : i32
    %0 = arith.muli %arg1, %c16_i32 : i32
    %1 = tpu.assume_multiple %0, 16 : i32
    %c0 = arith.constant 0 : index
    %2 = arith.index_cast %1 : i32 to index
    %c0_0 = arith.constant 0 : index
    %c0_1 = arith.constant 0 : index
    %3 = vector.load %arg2[%c0, %2, %c0_0, %c0_1] : memref<1x20x20x6xbf16, #tpu.memory_space<vmem>>, vector<1x20x20x6xbf16>
    %4 = vector.shape_cast %3 : vector<1x20x20x6xbf16> to vector<20x20x6xbf16>
    %5 = vector.extract_strided_slice %4 {offsets = [0, 0, 0], sizes = [20, 18, 6], strides = [1, 1, 1]} : vector<20x20x6xbf16> to vector<20x18x6xbf16>
    %6 = vector.extract_strided_slice %4 {offsets = [0, 1, 0], sizes = [20, 18, 6], strides = [1, 1, 1]} : vector<20x20x6xbf16> to vector<20x18x6xbf16>
    %7 = vector.extract_strided_slice %4 {offsets = [0, 2, 0], sizes = [20, 18, 6], strides = [1, 1, 1]} : vector<20x20x6xbf16> to vector<20x18x6xbf16>
    %8 = tpu.concatenate %5, %6, %7 in 2 : vector<20x18x6xbf16>, vector<20x18x6xbf16>, vector<20x18x6xbf16> -> vector<20x18x18xbf16>
    %9 = vector.extract_strided_slice %8 {offsets = [0, 0, 0], sizes = [18, 18, 18], strides = [1, 1, 1]} : vector<20x18x18xbf16> to vector<18x18x18xbf16>
    %10 = vector.extract_strided_slice %8 {offsets = [1, 0, 0], sizes = [18, 18, 18], strides = [1, 1, 1]} : vector<20x18x18xbf16> to vector<18x18x18xbf16>
    %11 = vector.extract_strided_slice %8 {offsets = [2, 0, 0], sizes = [18, 18, 18], strides = [1, 1, 1]} : vector<20x18x18xbf16> to vector<18x18x18xbf16>
    %12 = tpu.concatenate %9, %10, %11 in 2 : vector<18x18x18xbf16>, vector<18x18x18xbf16>, vector<18x18x18xbf16> -> vector<18x18x54xbf16>
    %13 = vector.shape_cast %12 : vector<18x18x54xbf16> to vector<324x54xbf16>
    %c0_2 = arith.constant 0 : index
    %c0_3 = arith.constant 0 : index
    %14 = vector.load %arg5[%c0_2, %c0_3] : memref<54x32xbf16, #tpu.memory_space<vmem>>, vector<54x32xbf16>
    %cst = arith.constant dense<0.000000e+00> : vector<324x32xf32>
    %15 = tpu.matmul %13, %14, %cst {dimension_numbers = #tpu.dot_dimension_numbers<[1], [0], [0], [1], [0, 0, 1, 1], [], []>} : vector<324x54xbf16>, vector<54x32xbf16>, vector<324x32xf32> -> vector<324x32xf32>
    %c0_4 = arith.constant 0 : index
    %c0_5 = arith.constant 0 : index
    %16 = vector.load %arg6[%c0_4, %c0_5] : memref<1x32xf32, #tpu.memory_space<vmem>>, vector<1x32xf32>
    %17 = vector.broadcast %16 : vector<1x32xf32> to vector<324x32xf32>
    %18 = arith.addf %15, %17 : vector<324x32xf32>
    %cst_6 = arith.constant 0.000000e+00 : f32
    %19 = vector.broadcast %cst_6 : f32 to vector<324x32xf32>
    %20 = arith.maximumf %18, %19 : vector<324x32xf32>
    %21 = arith.truncf %20 : vector<324x32xf32> to vector<324x32xbf16>
    %c0_7 = arith.constant 0 : index
    %c0_8 = arith.constant 0 : index
    %22 = vector.load %arg7[%c0_7, %c0_8] : memref<32x32xbf16, #tpu.memory_space<vmem>>, vector<32x32xbf16>
    %cst_9 = arith.constant dense<0.000000e+00> : vector<324x32xf32>
    %23 = tpu.matmul %21, %22, %cst_9 {dimension_numbers = #tpu.dot_dimension_numbers<[1], [0], [0], [1], [0, 0, 1, 1], [], []>} : vector<324x32xbf16>, vector<32x32xbf16>, vector<324x32xf32> -> vector<324x32xf32>
    %c0_10 = arith.constant 0 : index
    %c0_11 = arith.constant 0 : index
    %24 = vector.load %arg8[%c0_10, %c0_11] : memref<1x32xf32, #tpu.memory_space<vmem>>, vector<1x32xf32>
    %25 = vector.broadcast %24 : vector<1x32xf32> to vector<324x32xf32>
    %26 = arith.addf %23, %25 : vector<324x32xf32>
    %cst_12 = arith.constant 0.000000e+00 : f32
    %27 = vector.broadcast %cst_12 : f32 to vector<324x32xf32>
    %28 = arith.maximumf %26, %27 : vector<324x32xf32>
    %29 = vector.shape_cast %28 : vector<324x32xf32> to vector<18x18x32xf32>
    %c0_13 = arith.constant 0 : index
    %c0_14 = arith.constant 0 : index
    %c0_15 = arith.constant 0 : index
    %30 = vector.load %arg4[%c0_13, %c0_14, %c0_15] : memref<1x18x18xf32, #tpu.memory_space<vmem>>, vector<1x18x18xf32>
    %31 = vector.shape_cast %30 : vector<1x18x18xf32> to vector<18x18xf32>
    %32 = vector.shape_cast %31 : vector<18x18xf32> to vector<18x18x1xf32>
    %33 = vector.broadcast %32 : vector<18x18x1xf32> to vector<18x18x32xf32>
    %34 = arith.mulf %29, %33 : vector<18x18x32xf32>
    %35 = vector.extract_strided_slice %34 {offsets = [0, 0, 0], sizes = [18, 16, 32], strides = [1, 1, 1]} : vector<18x18x32xf32> to vector<18x16x32xf32>
    %36 = vector.extract_strided_slice %34 {offsets = [0, 1, 0], sizes = [18, 16, 32], strides = [1, 1, 1]} : vector<18x18x32xf32> to vector<18x16x32xf32>
    %37 = vector.extract_strided_slice %34 {offsets = [0, 2, 0], sizes = [18, 16, 32], strides = [1, 1, 1]} : vector<18x18x32xf32> to vector<18x16x32xf32>
    %38 = tpu.concatenate %35, %36, %37 in 2 : vector<18x16x32xf32>, vector<18x16x32xf32>, vector<18x16x32xf32> -> vector<18x16x96xf32>
    %39 = vector.extract_strided_slice %38 {offsets = [0, 0, 0], sizes = [16, 16, 96], strides = [1, 1, 1]} : vector<18x16x96xf32> to vector<16x16x96xf32>
    %40 = vector.extract_strided_slice %38 {offsets = [1, 0, 0], sizes = [16, 16, 96], strides = [1, 1, 1]} : vector<18x16x96xf32> to vector<16x16x96xf32>
    %41 = vector.extract_strided_slice %38 {offsets = [2, 0, 0], sizes = [16, 16, 96], strides = [1, 1, 1]} : vector<18x16x96xf32> to vector<16x16x96xf32>
    %42 = tpu.concatenate %39, %40, %41 in 2 : vector<16x16x96xf32>, vector<16x16x96xf32>, vector<16x16x96xf32> -> vector<16x16x288xf32>
    %43 = vector.shape_cast %42 : vector<16x16x288xf32> to vector<256x288xf32>
    %c0_16 = arith.constant 0 : index
    %c0_17 = arith.constant 0 : index
    %44 = vector.load %arg9[%c0_16, %c0_17] : memref<4x288xf32, #tpu.memory_space<vmem>>, vector<4x288xf32>
    %cst_18 = arith.constant dense<0.000000e+00> : vector<4x256xf32>
    %45 = tpu.matmul %44, %43, %cst_18 {dimension_numbers = #tpu.dot_dimension_numbers<[1], [1], [0], [0], [0, 0, 1, 0], [], []>} : vector<4x288xf32>, vector<256x288xf32>, vector<4x256xf32> -> vector<4x256xf32>
    %c0_19 = arith.constant 0 : index
    %c0_20 = arith.constant 0 : index
    %46 = vector.load %arg10[%c0_19, %c0_20] : memref<4x1xf32, #tpu.memory_space<vmem>>, vector<4x1xf32>
    %47 = vector.broadcast %46 : vector<4x1xf32> to vector<4x256xf32>
    %48 = arith.addf %45, %47 : vector<4x256xf32>
    %49 = vector.extract_strided_slice %48 {offsets = [0, 0], sizes = [2, 256], strides = [1, 1]} : vector<4x256xf32> to vector<2x256xf32>
    %50 = vector.extract_strided_slice %48 {offsets = [2, 0], sizes = [2, 256], strides = [1, 1]} : vector<4x256xf32> to vector<2x256xf32>
    %cst_21 = arith.constant 2.000000e+00 : f32
    %51 = vector.broadcast %cst_21 : f32 to vector<2x256xf32>
    %52 = arith.addf %50, %51 : vector<2x256xf32>
    %53 = arith.negf %52 : vector<2x256xf32>
    %54 = math.exp %53 : vector<2x256xf32>
    %cst_22 = arith.constant 1.000000e+00 : f32
    %55 = vector.broadcast %cst_22 : f32 to vector<2x256xf32>
    %56 = arith.addf %55, %54 : vector<2x256xf32>
    %57 = arith.divf %55, %56 : vector<2x256xf32>
    %cst_23 = arith.constant 9.99999974E-5 : f32
    %58 = vector.broadcast %cst_23 : f32 to vector<2x256xf32>
    %59 = arith.addf %57, %58 : vector<2x256xf32>
    %c0_24 = arith.constant 0 : index
    %c0_25 = arith.constant 0 : index
    %c0_26 = arith.constant 0 : index
    %c0_27 = arith.constant 0 : index
    %60 = vector.load %arg3[%c0_24, %c0_25, %c0_26, %c0_27] : memref<1x1x2x256xf32, #tpu.memory_space<vmem>>, vector<1x1x2x256xf32>
    %61 = vector.shape_cast %60 : vector<1x1x2x256xf32> to vector<2x256xf32>
    %62 = arith.addf %61, %49 : vector<2x256xf32>
    %63 = arith.mulf %62, %59 : vector<2x256xf32>
    %c0_28 = arith.constant 0 : index
    %c0_29 = arith.constant 0 : index
    %c0_30 = arith.constant 0 : index
    %c0_31 = arith.constant 0 : index
    %64 = vector.load %arg11[%c0_28, %c0_29, %c0_30, %c0_31] : memref<1x1x2x256xf32, #tpu.memory_space<vmem>>, vector<1x1x2x256xf32>
    %65 = vector.shape_cast %64 : vector<1x1x2x256xf32> to vector<2x256xf32>
    %66 = vector.shape_cast %63 : vector<2x256xf32> to vector<1x1x2x256xf32>
    tpu.vector_store %arg11[%c0_28, %c0_29, %c0_30, %c0_31], %66 {strides = array<i32>} : memref<1x1x2x256xf32, #tpu.memory_space<vmem>>, vector<1x1x2x256xf32>,
    %67 = math.log %59 : vector<2x256xf32>
    %68 = vector.shape_cast %67 : vector<2x256xf32> to vector<1x2x256xf32>
    %cst_32 = arith.constant dense<0.000000e+00> : vector<1xf32>
    %69 = vector.multi_reduction <add>, %68, %cst_32 [1, 2] : vector<1x2x256xf32> to vector<1xf32>
    %70 = vector.shape_cast %69 : vector<1xf32> to vector<1x1x1xf32>
    %71 = vector.extract %70[0, 0, 0] : f32 from vector<1x1x1xf32>
    %72 = vector.broadcast %71 : f32 to vector<1x1xf32>
    %c0_33 = arith.constant 0 : index
    %c0_34 = arith.constant 0 : index
    %c0_35 = arith.constant 0 : index
    %c0_36 = arith.constant 0 : index
    %73 = vector.load %arg12[%c0_33, %c0_34, %c0_35, %c0_36] : memref<1x1x1x1xf32, #tpu.memory_space<vmem>>, vector<1x1x1x1xf32>
    %74 = vector.shape_cast %73 : vector<1x1x1x1xf32> to vector<1x1xf32>
    %75 = vector.shape_cast %72 : vector<1x1xf32> to vector<1x1x1x1xf32>
    tpu.vector_store %arg12[%c0_33, %c0_34, %c0_35, %c0_36], %75 {strides = array<i32>} : memref<1x1x1x1xf32, #tpu.memory_space<vmem>>, vector<1x1x1x1xf32>,
    return
  }
  func.func @transform_0(%arg0: i32, %arg1: i32) -> (i32, i32, i32, i32) {
    %c0_i32 = arith.constant 0 : i32
    %c0_i32_0 = arith.constant 0 : i32
    %c0_i32_1 = arith.constant 0 : i32
    %c0_i32_2 = arith.constant 0 : i32
    return %arg0, %c0_i32, %c0_i32_0, %c0_i32_1 : i32, i32, i32, i32
  }
  func.func @transform_1(%arg0: i32, %arg1: i32) -> (i32, i32, i32, i32) {
    %c0_i32 = arith.constant 0 : i32
    %c0_i32_0 = arith.constant 0 : i32
    %c0_i32_1 = arith.constant 0 : i32
    return %arg0, %arg1, %c0_i32, %c0_i32_0 : i32, i32, i32, i32
  }
  func.func @transform_2(%arg0: i32, %arg1: i32) -> (i32, i32, i32) {
    %c0_i32 = arith.constant 0 : i32
    %c0_i32_0 = arith.constant 0 : i32
    %c0_i32_1 = arith.constant 0 : i32
    return %arg1, %c0_i32, %c0_i32_0 : i32, i32, i32
  }
  func.func @transform_3(%arg0: i32, %arg1: i32) -> (i32, i32) {
    %c0_i32 = arith.constant 0 : i32
    %c0_i32_0 = arith.constant 0 : i32
    %c0_i32_1 = arith.constant 0 : i32
    return %c0_i32, %c0_i32_0 : i32, i32
  }
  func.func @transform_4(%arg0: i32, %arg1: i32) -> (i32, i32) {
    %c0_i32 = arith.constant 0 : i32
    %c0_i32_0 = arith.constant 0 : i32
    %c0_i32_1 = arith.constant 0 : i32
    return %c0_i32, %c0_i32_0 : i32, i32
  }
  func.func @transform_5(%arg0: i32, %arg1: i32) -> (i32, i32) {
    %c0_i32 = arith.constant 0 : i32
    %c0_i32_0 = arith.constant 0 : i32
    %c0_i32_1 = arith.constant 0 : i32
    return %c0_i32, %c0_i32_0 : i32, i32
  }
  func.func @transform_6(%arg0: i32, %arg1: i32) -> (i32, i32) {
    %c0_i32 = arith.constant 0 : i32
    %c0_i32_0 = arith.constant 0 : i32
    %c0_i32_1 = arith.constant 0 : i32
    return %c0_i32, %c0_i32_0 : i32, i32
  }
  func.func @transform_7(%arg0: i32, %arg1: i32) -> (i32, i32) {
    %c0_i32 = arith.constant 0 : i32
    %c0_i32_0 = arith.constant 0 : i32
    %c0_i32_1 = arith.constant 0 : i32
    return %c0_i32, %c0_i32_0 : i32, i32
  }
  func.func @transform_8(%arg0: i32, %arg1: i32) -> (i32, i32) {
    %c0_i32 = arith.constant 0 : i32
    %c0_i32_0 = arith.constant 0 : i32
    %c0_i32_1 = arith.constant 0 : i32
    return %c0_i32, %c0_i32_0 : i32, i32
  }
  func.func @transform_9(%arg0: i32, %arg1: i32) -> (i32, i32, i32, i32) {
    %c0_i32 = arith.constant 0 : i32
    %c0_i32_0 = arith.constant 0 : i32
    %c0_i32_1 = arith.constant 0 : i32
    return %arg0, %arg1, %c0_i32, %c0_i32_0 : i32, i32, i32, i32
  }
  func.func @transform_10(%arg0: i32, %arg1: i32) -> (i32, i32, i32, i32) {
    %c0_i32 = arith.constant 0 : i32
    %c0_i32_0 = arith.constant 0 : i32
    %c0_i32_1 = arith.constant 0 : i32
    return %arg0, %arg1, %c0_i32, %c0_i32_0 : i32, i32, i32, i32
  }
}

</mosaic_0001>

<bundles_post_ra>
// kernel: cond_affine_coupling_forward.1
= control target key start
LH: loop header
LB: loop body
LE: loop exit
PB: predicated region body
PF: predicated region fallthrough
CT: control target
= control target key end

     0   :  { %s10970_s13 = smov 0   ;;  %s10972_s14 = smov 0   ;;  %s14668_s0 = inlined_call_operand.vmem [shape: bf16[2,20,20,6], index: 0, kind: input, shape index: {}]   ;;  %s14669_s1 = inlined_call_operand.vmem [shape: f32[2,1,2,256], index: 1, kind: input, shape index: {}]   ;;  %s14670_s2 = inlined_call_operand.vmem [shape: f32[1,18,18], index: 2, kind: input, shape index: {}]   ;;  %s14671_s3 = inlined_call_operand.vmem [shape: bf16[54,32], index: 3, kind: input, shape index: {}]   ;;  %s14672_s4 = inlined_call_operand.vmem [shape: f32[1,32], index: 4, kind: input, shape index: {}]   ;;  %s14673_s5 = inlined_call_operand.vmem [shape: bf16[32,32], index: 5, kind: input, shape index: {}]   ;;  %s14674_s6 = inlined_call_operand.vmem [shape: f32[1,32], index: 6, kind: input, shape index: {}]   ;;  %s14675_s7 = inlined_call_operand.vmem [shape: f32[4,288], index: 7, kind: input, shape index: {}]   ;;  %s14676_s8 = inlined_call_operand.vmem [shape: f32[4,1], index: 8, kind: input, shape index: {}]   ;;  %s14677_s9 = inlined_call_operand.vmem [shape: f32[2,1,2,256], index: 9, kind: output, shape index: {0}]   ;;  %s14678_s10 = inlined_call_operand.vmem [shape: f32[2,1,1,1], index: 10, kind: output, shape index: {1}]  }
   0x1   :  { %s10974_s15 = smov 0  }
   0x2 LB: > { %s33_s16 = sadd.s32 1, %s10893_s14  ;;  %p9894_p0 = scmp.ge.s32.totalorder %s10897_s15, 1  ;;  %s10897_s15 = sphi %s10974_s15, %s21_s15   ;;  %s10893_s14 = sphi %s10972_s14, %s14941_s14   ;;  %s10889_s13 = sphi %s10970_s13, %s14940_s13  }
   0x3   : > { %p35_p1 = scmp.ge.s32.totalorder %s33_s16, 2  ;;  %p357_p2 = scmp.lt.s32.totalorder %s10897_s15, 3 }
   0x5   : > { %s14943_s16 = smov (%p35_p1, %s33_s16), 0  ;;  %p358_p3 = pnand %p9894_p0, %p357_p2 }
   0x7   : > { %361 = sbr.rel (%p358_p3) target bundleno = 1796 (0x704), region = 56 }
   0xe   : > { %p419_p4 = scmp.lt.s32.totalorder %s10889_s13, 1  ;;  %vm1059_vm0 = vcmask 1046528   ;;  %s10899_s21 = smov 12   ;;  %vm678_vm1 = vsmask.f32 7424  ;;  %vm1200_vm2 = vcmask 48128  }
   0xf   : > { %s10900_s22 = smov 6   ;;  %vm1281_vm3 = vcmask 97280   ;;  %s10901_s23 = smov 18   ;;  %vm3954_vm4 = vcmask 1042432   ;;  %vm10904_vm5 = vmmov 0   ;;  %vm1544_vm6 = vcmask 146432  }
  0x10   : > { %s14945_s13 = smov (!%p419_p4, %s10889_s13), 1  ;;  %s10902_s24 = smov 36   ;;  %vm1617_vm7 = vcmask 293888   ;;  %vm3890_vm8 = vcmask 441344   ;;  %vm4243_vm9 = vcmask 261120   ;;  %vm9115_vm10 = vcmask 523264  }
  0x11   : > { %s10425_s17 = smul.u32 240, %s14945_s13  ;;  %s10912_s18 = smov 32   ;;  %vm9378_vm11 = vcmask 785408   ;;  %vm14540_vm12 = vmpackc.low %vm4243_vm9, %vm4243_vm9  ;;  %vm9716_vm13 = vcmask 1041408   ;;  %vm9730_vm14 = vcmask 0  }
  0x12   : > { %s10045_s12 = sshll.u32 %s14945_s13, 2  ;;  %s452_s25 = scalar_lea.vmem %s14678_s10, %s14945_s13 }
  0x13   : > { %s10994_s20 = scalar_lea.vmem %s14668_s0, %s10425_s17  ;;  %s10911_s17 = smov 64  }
  0x14   : > { %v10997_v0 = vld [vmem:[%s10994_s20 + $0x20] ss:$0 sps:$4 sm:$0x33]   ;;  %v11000_v1 = vld [vmem:[%s10994_s20 + $0xc] sm:$0xff]   ;;  %v11006_v3 = vld [vmem:[%s10994_s20 + $0x18] sm:$0xff]   ;;  %s432_s19 = scalar_lea.vmem %s14669_s1, %s10045_s12 }
  0x15   : > { %v11003_v2 = vld [vmem:[%s10994_s20 + $0x14] ss:$0 sps:$4 sm:$0x33]   ;;  %v1067_v4 = vrot.slane %v10997_v0, 1  ;;  %v1063_v5 = vrot.slane %v11000_v1, 1  ;;  %v1066_v9 = vrot.slane %v11006_v3, 1 }
  0x16   : > { %v1064_v6 = vrot.slane %v11003_v2, 1  ;;  %v702_v7 = vshll.u32 %v11003_v2, 16  ;;  %v706_v8 = vshrl.u32 %v11003_v2, 16  ;;  %v695_v10 = vshrl.u32 %v11000_v1, 16  ;;  %v11020_v14 = vld [vmem:[%s10994_s20 + $0x24] sm:$0xff]   ;;  %v11030_v22 = vld [vmem:[%s10994_s20 + $0x30] sm:$0xff]  }
  0x17   : > { %1130 = vrot.lane.b32.xlu1 %v1067_v4, %s10899_s21  ;;  %v697_v11 = vshll.u32 %v11000_v1, 16  ;;  %v11023_v16 = vld [vmem:[%s10994_s20 + $0x2c] ss:$0 sps:$4 sm:$0x33]   ;;  %v710_v17 = vshrl.u32 %v11006_v3, 16  ;;  %v712_v18 = vshll.u32 %v11006_v3, 16  ;;  %v1068_v20 = vsel %vm1059_vm0, %v1066_v9, %v1067_v4 }
  0x18   : > { %1126 = vrot.lane.b32.xlu0 %v1064_v6, %s10899_s21  ;;  %v704_v12 = vrot.slane %v702_v7, 1  ;;  %v1065_v13 = vsel %vm1059_vm0, %v1063_v5, %v1064_v6  ;;  %v717_v21 = vshll.u32 %v10997_v0, 16  ;;  %v1069_v24 = vrot.slane %v11020_v14, 1  ;;  %v11041_v33 = vld [vmem:[%s10994_s20 + $0x38] ss:$0 sps:$4 sm:$0x33]  }
  0x19   : > { %v699_v15 = vrot.slane %v697_v11, 1  ;;  %v1070_v25 = vrot.slane %v11023_v16, 1  ;;  %v714_v26 = vrot.slane %v712_v18, 1  ;;  %v725_v28 = vshrl.u32 %v11020_v14, 16  ;;  %v11050_v40 = vld [vmem:[%s10994_s20 + $0x3c] sm:$0xff]   ;;  %v11071_v59 = vld [vmem:[%s10994_s20 + $0x48] sm:$0xff]  }
  0x1a   : > { %v708_v19 = vor.u32 %v706_v8, %v704_v12  ;;  %v719_v27 = vrot.slane %v717_v21, 1  ;;  %v727_v29 = vshll.u32 %v11020_v14, 16  ;;  %v732_v30 = vshll.u32 %v11023_v16, 16  ;;  %v11059_v48 = vld [vmem:[%s10994_s20 + $0x44] ss:$0 sps:$4 sm:$0x33]  }
  0x1b   : > { %1124 = vrot.lane.b32.xlu1 %v1065_v13, %s10899_s21  ;;  %v700_v23 = vor.u32 %v699_v15, %v695_v10  ;;  %v715_v32 = vor.u32 %v714_v26, %v710_v17  ;;  %v742_v34 = vshll.u32 %v11030_v22, 16  ;;  %v721_v36 = vshrl.u32 %v10997_v0, 16  ;;  %v11078_v63 = vld [vmem:[%s10994_s20 + $0x50] ss:$0 sps:$4 sm:$0x33]   ;;  %v11089_v13 = vld [vmem:[%s10994_s20 + $0x54] sm:$0xff]  }
  0x1c   : > { %985 = vrot.lane.b32.xlu0 %v708_v19, %s10900_s22  ;;  %v729_v35 = vrot.slane %v727_v29, 1  ;;  %v1071_v37 = vsel %vm1059_vm0, %v1069_v24, %v1070_v25  ;;  %v734_v38 = vrot.slane %v732_v30, 1  ;;  %v740_v39 = vshrl.u32 %v11030_v22, 16  ;;  %v11096_v19 = vld [vmem:[%s10994_s20 + $0x5c] ss:$0 sps:$4 sm:$0x33]  }
  0x1d   : > { %v705_v31 = vsel %vm678_vm1, %v700_v23, %v704_v12  ;;  %v720_v41 = vsel %vm678_vm1, %v715_v32, %v719_v27  ;;  %v744_v43 = vrot.slane %v742_v34, 1  ;;  %v747_v44 = vshll.u32 %v11041_v33, 16  ;;  %v11107_v30 = vld [vmem:[%s10994_s20 + $0x60] sm:$0xff]  }
  0x1e   : > { %v730_v42 = vor.u32 %v729_v35, %v725_v28  ;;  %v723_v45 = vor.u32 %v721_v36, %v719_v27  ;;  %v1072_v46 = vrot.slane %v11030_v22, 1  ;;  %v1073_v47 = vrot.slane %v11041_v33, 1 }
  0x1f   : > { %1128 = vrot.lane.b32.xlu1 %v1068_v20, %s10899_s21  ;;  %v745_v50 = vor.u32 %v744_v43, %v740_v39  ;;  %v749_v51 = vrot.slane %v747_v44, 1  ;;  %v757_v52 = vshll.u32 %v11050_v40, 16  ;;  %v736_v54 = vshrl.u32 %v11023_v16, 16  ;;  %v11116_v39 = vld [vmem:[%s10994_s20 + $0x68] ss:$0 sps:$4 sm:$0x33]  }
  0x20   : > { %983 = vrot.lane.b32.xlu0 %v705_v31, %s10900_s22  ;;  %v735_v49 = vsel %vm678_vm1, %v730_v42, %v734_v38  ;;  %v1074_v53 = vsel %vm1059_vm0, %v1072_v46, %v1073_v47  ;;  %v755_v56 = vshrl.u32 %v11050_v40, 16  ;;  %v762_v58 = vshll.u32 %v11059_v48, 16  ;;  %v11125_v46 = vld [vmem:[%s10994_s20] sm:$0xff]  }
  0x21   : > { %v750_v55 = vsel %vm678_vm1, %v745_v50, %v749_v51  ;;  %v759_v57 = vrot.slane %v757_v52, 1  ;;  %v1075_v60 = vrot.slane %v11050_v40, 1  ;;  %v738_v61 = vor.u32 %v736_v54, %v734_v38  ;;  %v11134_v54 = vld [vmem:[%s10994_s20 + $0x8] ss:$0 sps:$4 sm:$0x33]  }
  0x22   : > { %v1076_v62 = vrot.slane %v11059_v48, 1  ;;  %v764_v5 = vrot.slane %v762_v58, 1  ;;  %v772_v6 = vshll.u32 %v11071_v59, 16  ;;  %v751_v8 = vshrl.u32 %v11041_v33, 16 }
  0x23   : > { %1132 = vrot.lane.b32.xlu1 %v1071_v37, %s10899_s21  ;;  %v760_v4 = vor.u32 %v759_v57, %v755_v56  ;;  %v770_v10 = vshrl.u32 %v11071_v59, 16  ;;  %v777_v12 = vshll.u32 %v11078_v63, 16  ;;  %v1078_v17 = vrot.slane %v11071_v59, 1 }
  0x24   : > { %987 = vrot.lane.b32.xlu0 %v720_v41, %s10900_s22  ;;  %v1077_v7 = vsel %vm1059_vm0, %v1075_v60, %v1076_v62  ;;  %v774_v11 = vrot.slane %v772_v6, 1  ;;  %v753_v15 = vor.u32 %v751_v8, %v749_v51  ;;  %v1079_v18 = vrot.slane %v11078_v63, 1 }
  0x25   : > { %v765_v9 = vsel %vm678_vm1, %v760_v4, %v764_v5  ;;  %v779_v21 = vrot.slane %v777_v12, 1  ;;  %v787_v23 = vshll.u32 %v11089_v13, 16  ;;  %v785_v26 = vshrl.u32 %v11089_v13, 16 }
  0x26   : > { %v775_v20 = vor.u32 %v774_v11, %v770_v10  ;;  %v1080_v24 = vsel %vm1059_vm0, %v1078_v17, %v1079_v18  ;;  %v792_v29 = vshll.u32 %v11096_v19, 16  ;;  %v1081_v32 = vrot.slane %v11089_v13, 1 }
  0x27   : > { %989 = vrot.lane.b32.xlu1 %v723_v45, %s10900_s22  ;;  %v789_v28 = vrot.slane %v787_v23, 1  ;;  %v1082_v34 = vrot.slane %v11096_v19, 1  ;;  %v802_v35 = vshll.u32 %v11107_v30, 16  ;;  %v781_v38 = vshrl.u32 %v11078_v63, 16 }
  0x28   : > { %991 = vrot.lane.b32.xlu0 %v735_v49, %s10900_s22  ;;  %v780_v27 = vsel %vm678_vm1, %v775_v20, %v779_v21  ;;  %v794_v37 = vrot.slane %v792_v29, 1  ;;  %v800_v42 = vshrl.u32 %v11107_v30, 16  ;;  %v807_v44 = vshll.u32 %v11116_v39, 16 }
  0x29   : > { %v790_v36 = vor.u32 %v789_v28, %v785_v26  ;;  %v1083_v41 = vsel %vm1059_vm0, %v1081_v32, %v1082_v34  ;;  %v804_v43 = vrot.slane %v802_v35, 1  ;;  %v1084_v49 = vrot.slane %v11107_v30, 1  ;;  %v11166_v28 = vld [vmem:[%s10994_s20 + $0x8c] ss:$0 sps:$4 sm:$0x33]   ;;  %v11173_v32 = vld [vmem:[%s10994_s20 + $0x78] sm:$0xff]  }
  0x2a   : > { %v1085_v50 = vrot.slane %v11116_v39, 1  ;;  %v809_v52 = vrot.slane %v807_v44, 1  ;;  %v796_v57 = vshrl.u32 %v11096_v19, 16  ;;  %v680_v58 = vshrl.u32 %v11125_v46, 16 }
  0x2b   : > { %1136 = vrot.lane.b32.xlu1 %v1074_v53, %s10899_s21  ;;  %v795_v45 = vsel %vm678_vm1, %v790_v36, %v794_v37  ;;  %v805_v51 = vor.u32 %v804_v43, %v800_v42  ;;  %v682_v53 = vshll.u32 %v11125_v46, 16  ;;  %v1060_v6 = vrot.slane %v11125_v46, 1 }
  0x2c   : > { %995 = vrot.lane.b32.xlu0 %v750_v55, %s10900_s22  ;;  %v11137_v55 = vld [vmem:[%s10994_s20 + $0x6c] sm:$0xff]   ;;  %v1086_v56 = vsel %vm1059_vm0, %v1084_v49, %v1085_v50  ;;  %v798_v8 = vor.u32 %v796_v57, %v794_v37  ;;  %v691_v36 = vshrl.u32 %v11134_v54, 16  ;;  %v11179_v37 = vld [vmem:[%s10994_s20 + $0x80] ss:$0 sps:$4 sm:$0x33]   ;;  %v830_v44 = vshrl.u32 %v11173_v32, 16 }
  0x2d   : > { %v810_v60 = vsel %vm678_vm1, %v805_v51, %v809_v52  ;;  %v817_v4 = vshll.u32 %v11137_v55, 16  ;;  %v815_v11 = vshrl.u32 %v11137_v55, 16  ;;  %v11188_v49 = vld [vmem:[%s10994_s20 + $0x84] sm:$0xff]  }
  0x2f   : > { %1134 = vrot.lane.b32.xlu1 %v1070_v25, %s10899_s21  ;;  %v766_v25 = vshrl.u32 %v11059_v48, 16  ;;  %v819_v12 = vrot.slane %v817_v4, 1 }
  0x30   : > { %993 = vrot.lane.b32.xlu0 %v738_v61, %s10900_s22  ;;  %v684_v61 = vrot.slane %v682_v53, 1  ;;  %v847_v53 = vshll.u32 %v11188_v49, 16 }
  0x31   : > { %v768_v31 = vor.u32 %v766_v25, %v764_v5  ;;  %v11148_v5 = vld [vmem:[%s10994_s20 + $0x74] ss:$0 sps:$4 sm:$0x33]   ;;  %v1087_v25 = vrot.slane %v11137_v55, 1 }
  0x32   : > { %v822_v17 = vshll.u32 %v11148_v5, 16  ;;  %v1088_v26 = vrot.slane %v11148_v5, 1  ;;  %v826_v29 = vshrl.u32 %v11148_v5, 16 }
  0x33   : > { %1140 = vrot.lane.b32.xlu1 %v1077_v7, %s10899_s21  ;;  %v1061_v7 = vrot.slane %v11134_v54, 1 }
  0x34   : > { %999 = vrot.lane.b32.xlu0 %v765_v9, %s10900_s22  ;;  %v685_v9 = vor.u32 %v684_v61, %v680_v58  ;;  %v1091_v58 = vrot.slane %v11179_v37, 1  ;;  %v849_v61 = vrot.slane %v847_v53, 1 }
  0x37   : > { %1138 = vrot.lane.b32.xlu1 %v1073_v47, %s10899_s21  ;;  %v783_v47 = vor.u32 %v781_v38, %v779_v21  ;;  %v820_v21 = vor.u32 %v819_v12, %v815_v11  ;;  %v832_v38 = vshll.u32 %v11173_v32, 16  ;;  %v11212_v12 = vld [vmem:[%s10994_s20 + $0x98] ss:$0 sps:$4 sm:$0x33]  }
  0x38   : > { %997 = vrot.lane.b32.xlu0 %v753_v15, %s10900_s22  ;;  %v811_v15 = vshrl.u32 %v11116_v39, 16 }
  0x3a   : > { %v813_v23 = vor.u32 %v811_v15, %v809_v52 }
  0x3b   : > { %1144 = vrot.lane.b32.xlu1 %v1080_v24, %s10899_s21  ;;  %v824_v24 = vrot.slane %v822_v17, 1 }
  0x3c   : > { %1003 = vrot.lane.b32.xlu0 %v780_v27, %s10900_s22 }
  0x3d   : > { %v825_v27 = vsel %vm678_vm1, %v820_v21, %v824_v24  ;;  %v828_v35 = vor.u32 %v826_v29, %v824_v24  ;;  %v867_v21 = vshll.u32 %v11212_v12, 16  ;;  %v1097_v29 = vrot.slane %v11212_v12, 1 }
  0x3f   : > { %1142 = vrot.lane.b32.xlu1 %v1076_v62, %s10899_s21  ;;  %v687_v62 = vshll.u32 %v11134_v54, 16  ;;  %v11219_v24 = vrot.slane %v867_v21, 1 }
  0x40   : > { %1001 = vrot.lane.b32.xlu0 %v768_v31, %s10900_s22  ;;  %v1089_v31 = vsel %vm1059_vm0, %v1087_v25, %v1088_v26  ;;  %v11222_v25 = vld [vmem:[%s10994_s20 + $0x9c] sm:$0xff]  }
  0x41   : > { %v689_v10 = vrot.slane %v687_v62, 1 }
  0x43   : > { %1148 = vrot.lane.b32.xlu1 %v1083_v41, %s10899_s21  ;;  %v690_v20 = vsel %vm678_vm1, %v685_v9, %v689_v10  ;;  %v856_v41 = vshrl.u32 %v11166_v28, 16  ;;  %v693_v43 = vor.u32 %v691_v36, %v689_v10  ;;  %v11206_v9 = vld [vmem:[%s10994_s20 + $0x90] sm:$0xff]   ;;  %v841_v10 = vshrl.u32 %v11179_v37, 16 }
  0x44   : > { %1007 = vrot.lane.b32.xlu0 %v795_v45, %s10900_s22  ;;  %v834_v45 = vrot.slane %v832_v38, 1  ;;  %v862_v15 = vshll.u32 %v11206_v9, 16  ;;  %v875_v36 = vshrl.u32 %v11222_v25, 16 }
  0x46   : > { %v835_v52 = vor.u32 %v834_v45, %v830_v44 }
  0x47   : > { %1146 = vrot.lane.b32.xlu1 %v1079_v18, %s10899_s21  ;;  %v1062_v18 = vsel %vm1059_vm0, %v1060_v6, %v1061_v7 }
  0x48   : > { %1005 = vrot.lane.b32.xlu0 %v783_v47, %s10900_s22  ;;  %v837_v47 = vshll.u32 %v11179_v37, 16 }
  0x4b   : > { %1152 = vrot.lane.b32.xlu1 %v1086_v56, %s10899_s21  ;;  %v1090_v56 = vrot.slane %v11173_v32, 1 }
  0x4c   : > { %1011 = vrot.lane.b32.xlu0 %v810_v60, %s10900_s22  ;;  %v845_v60 = vshrl.u32 %v11188_v49, 16 }
  0x4d   : > { %v1092_v62 = vsel %vm1059_vm0, %v1090_v56, %v1091_v58 }
  0x4e   : > { %v850_v4 = vor.u32 %v849_v61, %v845_v60 }
  0x4f   : > { %1150 = vrot.lane.b32.xlu1 %v1082_v34, %s10899_s21  ;;  %v852_v34 = vshll.u32 %v11166_v28, 16 }
  0x50   : > { %1009 = vrot.lane.b32.xlu0 %v798_v8, %s10900_s22  ;;  %v1094_v8 = vrot.slane %v11166_v28, 1 }
  0x51   : > { %v854_v42 = vrot.slane %v852_v34, 1  ;;  %v877_v34 = vshll.u32 %v11222_v25, 16 }
  0x53   : > { %1120 = vrot.lane.b32.xlu1 %v1062_v18, %s10899_s21  ;;  %v858_v51 = vor.u32 %v856_v41, %v854_v42  ;;  %v855_v6 = vsel %vm678_vm1, %v850_v4, %v854_v42  ;;  %v860_v18 = vshrl.u32 %v11206_v9, 16  ;;  %v879_v38 = vrot.slane %v877_v34, 1 }
  0x54   : > { %979 = vrot.lane.b32.xlu0 %v690_v20, %s10900_s22  ;;  %v864_v20 = vrot.slane %v862_v15, 1  ;;  %v14679_v34 = vmov 0.0  }
  0x55   : > { %v880_v42 = vor.u32 %v879_v38, %v875_v36  ;;  %10129 = vmatprep.subr.bf16.mxu0 %v14679_v34  ;;  %10221 = vmatprep.subr.bf16.mxu1 %v14679_v34 }
  0x56   : > { %10137 = vmatprep.mubr.msk.bf16.mxu0 %vm10904_vm5, %v14679_v34  ;;  %10225 = vmatprep.mubr.msk.bf16.mxu1 %vm10904_vm5, %v14679_v34 }
  0x57   : > { %1013 = vrot.lane.b32.xlu1 %v813_v23, %s10900_s22  ;;  %v865_v23 = vor.u32 %v864_v20, %v860_v18 }
  0x58   : > { %1015 = vrot.lane.b32.xlu0 %v825_v27, %s10900_s22  ;;  %v1096_v27 = vrot.slane %v11206_v9, 1 }
  0x5b   : > { %1156 = vrot.lane.b32.xlu1 %v1089_v31, %s10899_s21  ;;  %v11230_v31 = vld [vmem:[%s10994_s20 + $0xa4] ss:$0 sps:$4 sm:$0x33]  }
  0x5c   : > { %1154 = vrot.lane.b32.xlu0 %v1085_v50, %s10899_s21  ;;  %v839_v50 = vrot.slane %v837_v47, 1  ;;  %v882_v41 = vshll.u32 %v11230_v31, 16  ;;  %v1100_v38 = vrot.slane %v11230_v31, 1 }
  0x5e   : > { %v840_v57 = vsel %vm678_vm1, %v835_v52, %v839_v50  ;;  %v843_v17 = vor.u32 %v841_v10, %v839_v50 }
  0x5f   : > { %1017 = vrot.lane.b32.xlu1 %v828_v35, %s10900_s22  ;;  %v1098_v35 = vsel %vm1059_vm0, %v1096_v27, %v1097_v29 }
  0x60   : > { %1158 = vrot.lane.b32.xlu0 %v1088_v26, %s10899_s21  ;;  %v870_v26 = vsel %vm678_vm1, %v865_v23, %v11219_v24 }
  0x63   : > { %981 = vrot.lane.b32.xlu1 %v693_v43, %s10900_s22  ;;  %v11240_v43 = vrot.slane %v882_v41, 1 }
  0x64   : > { %1025 = vrot.lane.b32.xlu0 %v858_v51, %s10900_s22 }
  0x65   : > { %v885_v47 = vsel %vm678_vm1, %v880_v42, %v11240_v43 }
  0x67   : > { %1122 = vrot.lane.b32.xlu1 %v1061_v7, %s10899_s21  ;;  %v1093_v7 = vrot.slane %v11188_v49, 1 }
  0x69   : > { %v1095_v11 = vsel %vm1059_vm0, %v1093_v7, %v1094_v8 }
  0x6b   : > { %1019 = vrot.lane.b32.xlu1 %v840_v57, %s10900_s22 }
  0x6f   : > { %1160 = vrot.lane.b32.xlu1 %v1092_v62, %s10899_s21 }
  0x73   : > { %1023 = vrot.lane.b32.xlu1 %v855_v6, %s10900_s22 }
  0x77   : > { %1164 = vrot.lane.b32.xlu1 %v1095_v11, %s10899_s21 }
  0x7b   : > { %1021 = vrot.lane.b32.xlu1 %v843_v17, %s10900_s22 }
  0x7f   : > { %1162 = vrot.lane.b32.xlu1 %v1091_v58, %s10899_s21 }
  0x83   : > { %1027 = vrot.lane.b32.xlu1 %v870_v26, %s10900_s22 }
  0x87   : > { %1168 = vrot.lane.b32.xlu1 %v1098_v35, %s10899_s21 }
  0x89   : > { %v1131_v44 = vpop.permute.xlu1 %1130 }
  0x8a   : > { %v1127_v45 = vpop.permute.xlu0 %1126 }
  0x8b   : > { %1166 = vrot.lane.b32.xlu1 %v1094_v8, %s10899_s21 }
  0x8d   : > { %v1125_v51 = vpop.permute.xlu1 %1124 }
  0x8e   : > { %v986_v52 = vpop.permute.xlu0 %985 }
  0x8f   : > { %v1208_v50 = vsel %vm1200_vm2, %v11003_v2, %v986_v52  ;;  %1031 = vrot.lane.b32.xlu1 %v885_v47, %s10900_s22 }
  0x90   : > { %v11249_v53 = vsel %vm1281_vm3, %v1208_v50, %v1127_v45 }
  0x91   : > { %1400 = vrot.lane.b32.xlu0 %v11249_v53, %s10901_s23  ;;  %v1129_v56 = vpop.permute.xlu1 %1128 }
  0x92   : > { %v984_v57 = vpop.permute.xlu0 %983 }
  0x93   : > { %v1206_v45 = vsel %vm1200_vm2, %v11000_v1, %v984_v57 }
  0x94   : > { %v11325_v50 = vsel %vm1281_vm3, %v1206_v45, %v1125_v51  ;;  %v10852_v51 = vld [vmem:[%s14671_s3 + $0x18] ss:$0 sps:$4 sm:$0x77]  }
  0x95   : > { %v11253_v58 = vpop.permute.xlu1 %1132 }
  0x96   : > { %v988_v60 = vpop.permute.xlu0 %987 }
  0x97   : > { %v1210_v61 = vsel %vm1200_vm2, %v11006_v3, %v988_v60 }
  0x98   : > { %v11258_v62 = vsel %vm1281_vm3, %v1210_v61, %v1129_v56  ;;  %v10851_v56 = vld [vmem:[%s14671_s3 + $0x10] sm:$0xff]  }
  0x99   : > { %1472 = vrot.lane.b32.xlu1 %v11258_v62, %s10902_s24  ;;  %v990_v2 = vpop.permute.xlu1 %989 }
  0x9a   : > { %v1212_v4 = vsel %vm1200_vm2, %v10997_v0, %v990_v2  ;;  %v992_v6 = vpop.permute.xlu0 %991 }
  0x9b   : > { %v11265_v7 = vsel %vm1281_vm3, %v1212_v4, %v1131_v44  ;;  %v10850_v44 = vld [vmem:[%s14671_s3 + $0x8] sm:$0xff]   ;;  %v1214_v61 = vsel %vm1200_vm2, %v11020_v14, %v992_v6 }
  0x9c   : > { %1474 = vrot.lane.b32.xlu0 %v11265_v7, %s10902_s24 }
  0x9d   : > { %v1137_v8 = vpop.permute.xlu1 %1136 }
  0x9e   : > { %v996_v3 = vpop.permute.xlu0 %995 }
  0x9f   : > { %v1218_v10 = vsel %vm1200_vm2, %v11030_v22, %v996_v3  ;;  %v11353_v3 = vld [vmem:[%s10994_s20 + $0xb0] ss:$0 sps:$4 sm:$0x33]  }
  0xa0   : > { %v11272_v11 = vsel %vm1281_vm3, %v1218_v10, %v1137_v8  ;;  %1404 = vrot.lane.b32.xlu0 %v11265_v7, %s10901_s23  ;;  %v11350_v8 = vld [vmem:[%s10994_s20 + $0xa8] sm:$0xff]   ;;  %v3956_v10 = vsel %vm3954_vm4, %v10852_v51, 0 }
  0xa1   : > { %1480 = vrot.lane.b32.xlu1 %v11272_v11, %s10902_s24  ;;  %v1135_v0 = vpop.permute.xlu1 %1134  ;;  %v890_v51 = vshrl.u32 %v11350_v8, 16 }
  0xa2   : > { %v994_v15 = vpop.permute.xlu0 %993 }
  0xa3   : > { %v1216_v17 = vsel %vm1200_vm2, %v11023_v16, %v994_v15  ;;  %v10849_v16 = vld [vmem:[%s14671_s3] sm:$0xff]   ;;  %v1102_v15 = vrot.slane %v11350_v8, 1 }
  0xa4   : > { %v11281_v18 = vsel %vm1281_vm3, %v1216_v17, %v1135_v0  ;;  %10130 = vmatpush3.bf16.msra.mxu0 %v10849_v16  ;;  %v1103_v17 = vrot.slane %v11353_v3, 1 }
  0xa5   : > { %1478 = vrot.lane.b32.xlu0 %v11281_v18, %s10902_s24  ;;  %v11285_v22 = vpop.permute.xlu1 %1140  ;;  %10131 = vmatprep.subr.bf16.mxu0 %v14679_v34 }
  0xa6   : > { %v11287_v20 = vpop.permute.xlu0 %999 }
  0xa8   : > { %10132 = vmatpush3.bf16.msra.mxu0 %v10850_v44  ;;  %v871_v44 = vshrl.u32 %v11212_v12, 16 }
  0xa9   : > { %1408 = vrot.lane.b32.xlu0 %v11281_v18, %s10901_s23  ;;  %v1139_v21 = vpop.permute.xlu1 %1138  ;;  %10133 = vmatprep.subr.bf16.mxu0 %v14679_v34 }
  0xaa   : > { %v998_v23 = vpop.permute.xlu0 %997 }
  0xab   : > { %v1220_v26 = vsel %vm1200_vm2, %v11041_v33, %v998_v23  ;;  %v1099_v33 = vrot.slane %v11222_v25, 1  ;;  %v1222_v23 = vsel %vm1200_vm2, %v11050_v40, %v11287_v20 }
  0xac   : > { %v11297_v27 = vsel %vm1281_vm3, %v1220_v26, %v1139_v21  ;;  %10134 = vmatpush3.bf16.msra.mxu0 %v10851_v56 }
  0xad   : > { %1482 = vrot.lane.b32.xlu0 %v11297_v27, %s10902_s24  ;;  %v1145_v35 = vpop.permute.xlu1 %1144  ;;  %10135 = vmatprep.subr.bf16.mxu0 %v14679_v34 }
  0xae   : > { %v1004_v36 = vpop.permute.xlu0 %1003 }
  0xaf   : > { %v1226_v41 = vsel %vm1200_vm2, %v11071_v59, %v1004_v36  ;;  %v1101_v59 = vsel %vm1059_vm0, %v1099_v33, %v1100_v38  ;;  %v11402_v33 = vld [vmem:[%s10994_s20 + $0xb4] sm:$0xff]  }
  0xb0   : > { %v11309_v42 = vsel %vm1281_vm3, %v1226_v41, %v1145_v35  ;;  %10136 = vmatpush3.bf16.msra.mxu0 %v3956_v10  ;;  %v11391_v35 = vsel %vm1281_vm3, %v1222_v23, %v11285_v22  ;;  %v11405_v41 = vld [vmem:[%s10994_s20 + $0xbc] ss:$0 sps:$4 sm:$0x33]  }
  0xb1   : > { %1488 = vrot.lane.b32.xlu1 %v11309_v42, %s10902_s24  ;;  %1412 = vrot.lane.b32.xlu0 %v11297_v27, %s10901_s23  ;;  %v11320_v47 = vpop.permute.xlu1 %1142 }
  0xb2   : > { %v1002_v52 = vpop.permute.xlu0 %1001 }
  0xb5   : > { %1172 = vrot.lane.b32.xlu1 %v1101_v59, %s10899_s21  ;;  %1398 = vrot.lane.b32.xlu0 %v11325_v50, %s10901_s23  ;;  %v1149_v1 = vpop.permute.xlu1 %1148 }
  0xb6   : > { %v1008_v57 = vpop.permute.xlu0 %1007 }
  0xb7   : > { %v1230_v60 = vsel %vm1200_vm2, %v11089_v13, %v1008_v57 }
  0xb8   : > { %v11347_v13 = vsel %vm1281_vm3, %v1230_v60, %v1149_v1 }
  0xb9   : > { %1170 = vrot.lane.b32.xlu1 %v1097_v29, %s10899_s21  ;;  %1402 = vrot.lane.b32.xlu0 %v11258_v62, %s10901_s23  ;;  %v1147_v2 = vpop.permute.xlu1 %1146  ;;  %v11359_v29 = vsel %vm1281_vm3, %v1214_v61, %v11253_v58  ;;  %v1104_v58 = vsel %vm1059_vm0, %v1102_v15, %v1103_v17  ;;  %v11449_v15 = vld [vmem:[%s10994_s20 + $0xc8] ss:$0 sps:$4 sm:$0x33]  }
  0xba   : > { %v1006_v4 = vpop.permute.xlu0 %1005 }
  0xbb   : > { %v1228_v14 = vsel %vm1200_vm2, %v11078_v63, %v1006_v4 }
  0xbc   : > { %v11366_v0 = vsel %vm1281_vm3, %v1228_v14, %v1147_v2 }
  0xbd   : > { %1492 = vrot.lane.b32.xlu1 %v11347_v13, %s10902_s24  ;;  %1476 = vrot.lane.b32.xlu0 %v11359_v29, %s10902_s24  ;;  %v1153_v6 = vpop.permute.xlu1 %1152 }
  0xbe   : > { %v1012_v21 = vpop.permute.xlu0 %1011 }
  0xbf   : > { %v1234_v16 = vsel %vm1200_vm2, %v11107_v30, %v1012_v21  ;;  %v1224_v30 = vsel %vm1200_vm2, %v11059_v48, %v1002_v52  ;;  %v1105_v48 = vrot.slane %v11402_v33, 1  ;;  %v873_v52 = vor.u32 %v871_v44, %v11219_v24 }
  0xc0   : > { %v11399_v20 = vsel %vm1281_vm3, %v1234_v16, %v1153_v6  ;;  %v11421_v59 = vsel %vm1281_vm3, %v1224_v30, %v11320_v47  ;;  %v892_v47 = vshll.u32 %v11350_v8, 16  ;;  %v897_v24 = vshll.u32 %v11353_v3, 16  ;;  %v11446_v6 = vld [vmem:[%s10994_s20 + $0xc0] sm:$0xff]  }
  0xc1   : > { %1490 = vrot.lane.b32.xlu1 %v11366_v0, %s10902_s24  ;;  %1406 = vrot.lane.b32.xlu0 %v11359_v29, %s10901_s23  ;;  %v1151_v63 = vpop.permute.xlu1 %1150  ;;  %v1108_v23 = vrot.slane %v11446_v6, 1  ;;  %v14681_v16 = vrot.slane %v11449_v15, 1  ;;  %v927_v44 = vshll.u32 %v11449_v15, 16 }
  0xc2   : > { %v1010_v36 = vpop.permute.xlu0 %1009  ;;  %v894_v61 = vrot.slane %v892_v47, 1  ;;  %v899_v14 = vrot.slane %v897_v24, 1 }
  0xc3   : > { %v1232_v22 = vsel %vm1200_vm2, %v11096_v19, %v1010_v36  ;;  %v1106_v19 = vrot.slane %v11405_v41, 1 }
  0xc4   : > { %v11417_v45 = vsel %vm1281_vm3, %v1232_v22, %v1151_v63  ;;  %v895_v10 = vor.u32 %v894_v61, %v890_v51  ;;  %v907_v22 = vshll.u32 %v11402_v33, 16  ;;  %v929_v51 = vrot.slane %v927_v44, 1 }
  0xc5   : > { %1176 = vrot.lane.b32.xlu1 %v1104_v58, %s10899_s21  ;;  %1410 = vrot.lane.b32.xlu0 %v11272_v11, %s10901_s23  ;;  %v11385_v26 = vpop.permute.xlu1 %1120  ;;  %v1107_v56 = vsel %vm1059_vm0, %v1105_v48, %v1106_v19  ;;  %v905_v48 = vshrl.u32 %v11402_v33, 16  ;;  %v931_v61 = vshrl.u32 %v11449_v15, 16 }
  0xc6   : > { %v11431_v57 = vpop.permute.xlu0 %979  ;;  %v900_v58 = vsel %vm678_vm1, %v895_v10, %v899_v14 }
  0xc9   : > { %1174 = vrot.lane.b32.xlu1 %v1100_v38, %s10899_s21  ;;  %1484 = vrot.lane.b32.xlu0 %v11391_v35, %s10902_s24  ;;  %v11396_v40 = vpop.permute.xlu1 %1013 }
  0xca   : > { %v1016_v2 = vpop.permute.xlu0 %1015 }
  0xcb   : > { %v1238_v63 = vsel %vm1200_vm2, %v11137_v55, %v1016_v2 }
  0xcd   : > { %1496 = vrot.lane.b32.xlu1 %v11399_v20, %s10902_s24  ;;  %1414 = vrot.lane.b32.xlu0 %v11391_v35, %s10901_s23  ;;  %v1157_v38 = vpop.permute.xlu1 %1156 }
  0xce   : > { %v11460_v21 = vsel %vm1281_vm3, %v1238_v63, %v1157_v38  ;;  %v1155_v30 = vpop.permute.xlu0 %1154 }
  0xd1   : > { %1494 = vrot.lane.b32.xlu1 %v11417_v45, %s10902_s24  ;;  %1486 = vrot.lane.b32.xlu0 %v11421_v59, %s10902_s24  ;;  %v1018_v1 = vpop.permute.xlu1 %1017 }
  0xd2   : > { %v1159_v47 = vpop.permute.xlu0 %1158 }
  0xd5   : > { %1180 = vrot.lane.b32.xlu1 %v1107_v56, %s10899_s21  ;;  %1029 = vrot.lane.b32.xlu0 %v873_v52, %s10900_s22  ;;  %v11436_v60 = vpop.permute.xlu1 %981  ;;  %v909_v52 = vrot.slane %v907_v22, 1  ;;  %v1240_v56 = vsel %vm1200_vm2, %v11148_v5, %v1018_v1  ;;  %v901_v5 = vshrl.u32 %v11353_v3, 16  ;;  %v11494_v1 = vld [vmem:[%s10994_s20 + $0xd4] ss:$0 sps:$4 sm:$0x33]   ;;  %v922_v22 = vshll.u32 %v11446_v6, 16 }
  0xd6   : > { %v11484_v10 = vsel %vm1281_vm3, %v1240_v56, %v1159_v47  ;;  %v942_v44 = vshll.u32 %v11494_v1, 16  ;;  %v946_v47 = vshrl.u32 %v11494_v1, 16 }
  0xd7   : > { %v910_v24 = vor.u32 %v909_v52, %v905_v48  ;;  %14727 = vst [vmem:[#allocation2_spill] sm:$0xff] %v11484_v10 }
  0xd8   : > { %v944_v56 = vrot.slane %v942_v44, 1 }
  0xd9   : > { %1178 = vrot.lane.b32.xlu1 %v1103_v17, %s10899_s21  ;;  %1418 = vrot.lane.b32.xlu0 %v11309_v42, %s10901_s23  ;;  %v11443_v4 = vpop.permute.xlu1 %1122  ;;  %v886_v17 = vshrl.u32 %v11230_v31, 16  ;;  %v1110_v31 = vsel %vm1059_vm0, %v1108_v23, %v14681_v16 }
  0xdb   : > { %v888_v55 = vor.u32 %v886_v17, %v11240_v43  ;;  %v912_v43 = vshll.u32 %v11405_v41, 16 }
  0xdd   : > { %1426 = vrot.lane.b32.xlu1 %v11399_v20, %s10901_s23  ;;  %1416 = vrot.lane.b32.xlu0 %v11421_v59, %s10901_s23  ;;  %v1020_v36 = vpop.permute.xlu1 %1019  ;;  %v914_v2 = vrot.slane %v912_v43, 1  ;;  %v1112_v43 = vrot.slane %v11494_v1, 1 }
  0xde   : > { %v1242_v23 = vsel %vm1200_vm2, %v11173_v32, %v1020_v36  ;;  %v11514_v32 = vld [vmem:[%s10994_s20 + $0xd8] sm:$0xff]   ;;  %v924_v36 = vrot.slane %v922_v22, 1 }
  0xdf   : > { %v915_v17 = vsel %vm678_vm1, %v910_v24, %v914_v2  ;;  %14729 = vst [vmem:[#allocation4_spill] sm:$0xff] %v11514_v32  ;;  %v952_v24 = vshll.u32 %v11514_v32, 16  ;;  %v950_v22 = vshrl.u32 %v11514_v32, 16  ;;  %v1114_v34 = vrot.slane %v11514_v32, 1 }
  0xe1   : > { %1035 = vrot.lane.b32.xlu0 %v900_v58, %s10900_s22  ;;  %1500 = vrot.lane.b32.xlu1 %v11460_v21, %s10902_s24  ;;  %v1161_v38 = vpop.permute.xlu1 %1160  ;;  %v11498_v58 = vld [vmem:[%s10994_s20 + $0xcc] sm:$0xff]   ;;  %v954_v44 = vrot.slane %v952_v24, 1 }
  0xe2   : > { %14728 = vst [vmem:[#allocation3_spill] sm:$0xff] %v11498_v58  ;;  %v11509_v48 = vsel %vm1281_vm3, %v1242_v23, %v1161_v38  ;;  %v1111_v52 = vrot.slane %v11498_v58, 1  ;;  %v948_v23 = vor.u32 %v946_v47, %v944_v56  ;;  %v11547_v47 = vld [vmem:[%s10994_s20 + $0xe4] sm:$0xff]   ;;  %v937_v24 = vshll.u32 %v11498_v58, 16 }
  0xe4   : > { %v1113_v38 = vsel %vm1059_vm0, %v1111_v52, %v1112_v43 }
  0xe5   : > { %1033 = vrot.lane.b32.xlu0 %v888_v55, %s10900_s22  ;;  %1184 = vrot.lane.b32.xlu1 %v1110_v31, %s10899_s21  ;;  %v11486_v63 = vpop.permute.xlu1 %1023  ;;  %v903_v31 = vor.u32 %v901_v5, %v899_v14  ;;  %v920_v14 = vshrl.u32 %v11446_v6, 16  ;;  %v1236_v5 = vsel %vm1200_vm2, %v11116_v39, %v11396_v40  ;;  %v916_v40 = vshrl.u32 %v11405_v41, 16 }
  0xe9   : > { %1422 = vrot.lane.b32.xlu0 %v11347_v13, %s10901_s23  ;;  %1182 = vrot.lane.b32.xlu1 %v1106_v19, %s10899_s21  ;;  %v933_v19 = vor.u32 %v931_v61, %v929_v51  ;;  %v11502_v55 = vpop.permute.xlu1 %1164  ;;  %v11523_v61 = vld [vmem:[%s10994_s20 + $0xe0] ss:$0 sps:$4 sm:$0x33]  }
  0xea   : > { %v957_v52 = vshll.u32 %v11523_v61, 16  ;;  %v1115_v16 = vrot.slane %v11523_v61, 1 }
  0xed   : > { %1420 = vrot.lane.b32.xlu0 %v11366_v0, %s10901_s23  ;;  %1502 = vrot.lane.b32.xlu1 %v11484_v10, %s10902_s24 }
  0xf1   : > { %1039 = vrot.lane.b32.xlu0 %v915_v17, %s10900_s22  ;;  %1045 = vrot.lane.b32.xlu1 %v933_v19, %s10900_s22  ;;  %v11529_v19 = vpop.permute.xlu1 %1021  ;;  %v925_v17 = vor.u32 %v924_v36, %v920_v14  ;;  %v955_v36 = vor.u32 %v954_v44, %v950_v22  ;;  %v11559_v22 = vpop.permute.xlu0 %1025  ;;  %v1116_v44 = vsel %vm1059_vm0, %v1114_v34, %v1115_v16 }
  0xf3   : > { %v930_v14 = vsel %vm678_vm1, %v925_v17, %v929_v51  ;;  %v967_v51 = vshll.u32 %v11547_v47, 16 }
  0xf5   : > { %1037 = vrot.lane.b32.xlu0 %v903_v31, %s10900_s22  ;;  %1504 = vrot.lane.b32.xlu1 %v11509_v48, %s10902_s24  ;;  %v11535_v31 = vsel %vm1281_vm3, %v1236_v5, %v1155_v30  ;;  %v11539_v39 = vpop.permute.xlu1 %1162  ;;  %v959_v30 = vrot.slane %v957_v52, 1  ;;  %v965_v52 = vshrl.u32 %v11547_v47, 16 }
  0xf7   : > { %v960_v5 = vsel %vm678_vm1, %v955_v36, %v959_v30 }
  0xf9   : > { %1424 = vrot.lane.b32.xlu0 %v11417_v45, %s10901_s23  ;;  %1188 = vrot.lane.b32.xlu1 %v1113_v38, %s10899_s21  ;;  %v918_v38 = vor.u32 %v916_v40, %v914_v2  ;;  %v1028_v17 = vpop.permute.xlu1 %1027  ;;  %v935_v2 = vshrl.u32 %v11498_v58, 16  ;;  %v969_v40 = vrot.slane %v967_v51, 1 }
  0xfa   : > { %v1250_v36 = vsel %vm1200_vm2, %v11206_v9, %v1028_v17 }
  0xfb   : > { %v970_v34 = vor.u32 %v969_v40, %v965_v52 }
  0xfd   : > { %1498 = vrot.lane.b32.xlu0 %v11535_v31, %s10902_s24  ;;  %1049 = vrot.lane.b32.xlu1 %v948_v23, %s10900_s22  ;;  %v11556_v23 = vld [vmem:[%s10994_s20 + $0xec] ss:$0 sps:$4 sm:$0x33]   ;;  %v1169_v32 = vpop.permute.xlu1 %1168 }
 0x101   : > { %1043 = vrot.lane.b32.xlu0 %v930_v14, %s10900_s22  ;;  %1190 = vrot.lane.b32.xlu1 %v1112_v43, %s10899_s21  ;;  %v939_v43 = vrot.slane %v937_v24, 1  ;;  %v972_v14 = vshll.u32 %v11556_v23, 16 }
 0x103   : > { %v1401_v24 = vpop.permute.xlu0 %1400  ;;  %v11575_v58 = vrot.slane %v972_v14, 1  ;;  %v14731_v14 = vrot.slane %v11449_v15, 1 }
 0x105   : > { %1041 = vrot.lane.b32.xlu0 %v918_v38, %s10900_s22  ;;  %1051 = vrot.lane.b32.xlu1 %v960_v5, %s10900_s22  ;;  %v11573_v38 = vsel %vm1281_vm3, %v1250_v36, %v1169_v32  ;;  %v940_v5 = vor.u32 %v939_v43, %v935_v2  ;;  %v975_v17 = vsel %vm678_vm1, %v970_v34, %v11575_v58  ;;  %v1117_v32 = vrot.slane %v11547_v47, 1  ;;  %v1167_v2 = vpop.permute.xlu1 %1166 }
 0x106   : > { %14730 = vst [vmem:[#allocation5_spill] sm:$0xff] %v11573_v38  ;;  %v961_v43 = vshrl.u32 %v11523_v61, 16  ;;  %v1246_v34 = vsel %vm1200_vm2, %v11188_v49, %v11486_v63  ;;  %v10905_v63 = vmov 1966171168  }
 0x107   : > { %v945_v51 = vsel %vm678_vm1, %v940_v5, %v944_v56  ;;  %v11610_v15 = vsel %vm1281_vm3, %v1246_v34, %v11502_v55 }
 0x108   : > { %v963_v36 = vor.u32 %v961_v43, %v959_v30  ;;  %14732 = vst [vmem:[#allocation6_spill] sm:$0xff] %v11610_v15  ;;  %v1730_v43 = vlaneseq }
 0x109   : > { %1428 = vrot.lane.b32.xlu0 %v11535_v31, %s10901_s23  ;;  %1192 = vrot.lane.b32.xlu1 %v1116_v44, %s10899_s21  ;;  %v14684_v44 = vrot.slane %v11556_v23, 1  ;;  %v1032_v40 = vpop.permute.xlu1 %1031 }
 0x10b   : > { %v1119_v56 = vsel %vm1059_vm0, %v1117_v32, %v14684_v44  ;;  %v1728_v32 = vunpack.c.l.s4 %v10905_v63  ;;  %v11635_v63 = vshrl.u32 %v1730_v43, 7 }
 0x10d   : > { %1430 = vrot.lane.b32.xlu0 %v11460_v21, %s10901_s23  ;;  %1512 = vrot.lane.b32.xlu1 %v11573_v38, %s10902_s24  ;;  %v1729_v34 = vunpack.c.0.s8 %v1728_v32  ;;  %14734 = vst [vmem:[#allocation8_spill] sm:$0xff] %v11635_v63 }
 0x10e   : > { %v1475_v9 = vpop.permute.xlu0 %1474 }
 0x10f   : > { %v11649_v32 = vsub.s32 %v1729_v34, %v11635_v63 }
 0x111   : > { %1047 = vrot.lane.b32.xlu0 %v945_v51, %s10900_s22  ;;  %1055 = vrot.lane.b32.xlu1 %v975_v17, %s10900_s22  ;;  %v1473_v51 = vpop.permute.xlu1 %1472 }
 0x112   : > { %v11589_v52 = vpop.permute.xlu0 %1404 }
 0x115   : > { %1186 = vrot.lane.b32.xlu0 %v14731_v14, %s10899_s21  ;;  %1196 = vrot.lane.b32.xlu1 %v1119_v56, %s10899_s21  ;;  %v11615_v30 = vpop.permute.xlu1 %1480  ;;  %v1244_v56 = vsel %vm1200_vm2, %v11179_v37, %v11529_v19  ;;  %v1204_v37 = vsel %vm1200_vm2, %v11134_v54, %v11436_v60 }
 0x117   : > { %v11598_v5 = vpop.permute.xlu0 %1478 }
 0x119   : > { %1434 = vrot.lane.b32.xlu0 %v11509_v48, %s10901_s23  ;;  %1053 = vrot.lane.b32.xlu1 %v963_v36, %s10900_s22  ;;  %v11633_v36 = vsel %vm1281_vm3, %v1244_v56, %v11539_v39  ;;  %v1285_v39 = vsel %vm1281_vm3, %v1204_v37, %v11443_v4  ;;  %v1248_v4 = vsel %vm1200_vm2, %v11166_v28, %v11559_v22 }
 0x11a   : > { %14733 = vst [vmem:[#allocation7_spill] sm:$0xff] %v11633_v36 }
 0x11b   : > { %v11606_v17 = vpop.permute.xlu0 %1408 }
 0x11d   : > { %1508 = vrot.lane.b32.xlu0 %v11610_v15, %s10902_s24  ;;  %1194 = vrot.lane.b32.xlu1 %v1115_v16, %s10899_s21  ;;  %v1202_v16 = vsel %vm1200_vm2, %v11125_v46, %v11431_v57 }
 0x11e   : > { %v1283_v46 = vsel %vm1281_vm3, %v1202_v16, %v11385_v26  ;;  %v1548_v26 = vsel %vm1544_vm6, %v1285_v39, %v1401_v24  ;;  %v11669_v39 = vsel %vm1281_vm3, %v1248_v4, %v1167_v2  ;;  %v1254_v2 = vsel %vm1200_vm2, %v11222_v25, %v1032_v40 }
 0x11f   : > { %v11617_v49 = vpop.permute.xlu0 %1482  ;;  %v1621_v34 = vsel %vm1617_vm7, %v1548_v26, %v1475_v9 }
 0x121   : > { %1432 = vrot.lane.b32.xlu0 %v11484_v10, %s10901_s23 }
 0x123   : > { %v11624_v55 = vpop.permute.xlu1 %1488  ;;  %v11626_v14 = vpop.permute.xlu0 %1412 }
 0x125   : > { %1506 = vrot.lane.b32.xlu0 %v11633_v36, %s10902_s24 }
 0x127   : > { %v11642_v19 = vpop.permute.xlu1 %1172  ;;  %v1399_v57 = vpop.permute.xlu0 %1398 }
 0x128   : > { %v1546_v43 = vsel %vm1544_vm6, %v1283_v46, %v1399_v57 }
 0x129   : > { %v1619_v54 = vsel %vm1617_vm7, %v1546_v43, %v1473_v51  ;;  %1438 = vrot.lane.b32.xlu0 %v11610_v15, %s10901_s23  ;;  %v1781_v43 = vrot.slane %v1621_v34, %v11649_v32  ;;  %v11711_v15 = vsel %vm1281_vm3, %v1254_v2, %v11642_v19 }
 0x12a   : > { %v1726_v60 = vcombine.high %v1619_v54, %v1619_v54  ;;  %v1733_v56 = vrot.slane %v1619_v54, %v11649_v32 }
 0x12b   : > { %v11657_v16 = vpop.permute.xlu1 %1170  ;;  %v1403_v44 = vpop.permute.xlu0 %1402 }
 0x12c   : > { %v1740_v37 = vrot.slane %v1726_v60, %v11649_v32  ;;  %v1741_v51 = vcombine.high %v1733_v56, %v1733_v56  ;;  %v1749_v57 = vrot.slane %v1733_v56, %v11649_v32  ;;  %v1550_v22 = vsel %vm1544_vm6, %v11325_v50, %v1403_v44 }
 0x12d   : > { %1436 = vrot.lane.b32.xlu0 %v11633_v36, %s10901_s23 }
 0x12e   : > { %v1742_v46 = vcombine.high %v1740_v37, %v1740_v37  ;;  %v1763_v24 = vrot.slane %v1741_v51, %v11649_v32  ;;  %v1756_v28 = vrot.slane %v1740_v37, %v11649_v32 }
 0x12f   : > { %v11675_v9 = vpop.permute.xlu1 %1492  ;;  %v1477_v54 = vpop.permute.xlu0 %1476 }
 0x130   : > { %v1770_v60 = vrot.slane %v1742_v46, %v11649_v32  ;;  %v2874_v26 = vcombine.low %v1749_v57, %v1763_v24  ;;  %v9941_v63 = vcombine.high %v1749_v57, %v1763_v24  ;;  %v1623_v56 = vsel %vm1617_vm7, %v1550_v22, %v1477_v54 }
 0x131   : > { %v1789_v4 = vcombine.high %v1623_v56, %v1623_v56  ;;  %v1796_v34 = vrot.slane %v1623_v56, %v11649_v32  ;;  %1510 = vrot.lane.b32.xlu0 %v11669_v39, %s10902_s24  ;;  %v1788_v46 = vrot.slane %v1781_v43, %v11649_v32  ;;  %v1552_v54 = vsel %vm1544_vm6, %v11249_v53, %v11589_v52 }
 0x132   : > { %v2876_v37 = vcombine.low %v1756_v28, %v1770_v60  ;;  %v9942_v50 = vcombine.high %v1756_v28, %v1770_v60  ;;  %v2884_v44 = vrot.slane %v2874_v26, %v11649_v32  ;;  %v2891_v51 = vrot.slane %v9941_v63, %v11649_v32 }
 0x133   : > { %v1803_v57 = vrot.slane %v1789_v4, %v11649_v32  ;;  %v1804_v24 = vcombine.high %v1796_v34, %v1796_v34  ;;  %v1812_v22 = vrot.slane %v1796_v34, %v11649_v32  ;;  %v11689_v25 = vpop.permute.xlu1 %1490  ;;  %v1407_v40 = vpop.permute.xlu0 %1406  ;;  %v1625_v53 = vsel %vm1617_vm7, %v1552_v54, %v11598_v5 }
 0x134   : > { %v2898_v28 = vrot.slane %v2876_v37, %v11649_v32  ;;  %v2905_v60 = vrot.slane %v9942_v50, %v11649_v32  ;;  %v1554_v63 = vsel %vm1544_vm6, %v11258_v62, %v1407_v40  ;;  %v2906_v34 = vcombine.low %v2884_v44, %v2891_v51 }
 0x135   : > { %v1805_v43 = vcombine.high %v1803_v57, %v1803_v57  ;;  %v1819_v26 = vrot.slane %v1803_v57, %v11649_v32  ;;  %v1826_v56 = vrot.slane %v1804_v24, %v11649_v32  ;;  %v1834_v4 = vcombine.high %v1812_v22, %v1812_v22  ;;  %1442 = vrot.lane.b32.xlu0 %v11573_v38, %s10901_s23 }
 0x136   : > { %v1627_v52 = vsel %vm1617_vm7, %v1554_v63, %v11615_v30  ;;  %v2907_v37 = vcombine.low %v2898_v28, %v2905_v60  ;;  %v2923_v38 = vcombine.low %v1788_v46, %v1812_v22  ;;  %v1844_v30 = vrot.slane %v1625_v53, %v11649_v32 }
 0x137   : > { %v1833_v62 = vrot.slane %v1805_v43, %v11649_v32  ;;  %v1835_v50 = vcombine.high %v1819_v26, %v1819_v26  ;;  %v1836_v40 = vcombine.high %v1826_v56, %v1826_v56  ;;  %v2924_v36 = vcombine.low %v1826_v56, %v1834_v4  ;;  %v11707_v57 = vpop.permute.xlu1 %1176  ;;  %v1411_v24 = vpop.permute.xlu0 %1410 }
 0x138   : > { %v1852_v10 = vcombine.high %v1627_v52, %v1627_v52  ;;  %v1859_v5 = vrot.slane %v1627_v52, %v11649_v32  ;;  %v1556_v44 = vsel %vm1544_vm6, %v11265_v7, %v11606_v17  ;;  %v2921_v46 = vrot.slane %v2907_v37, %v11649_v32 }
 0x139   : > { %v2925_v51 = vcombine.low %v1836_v40, %v1819_v26  ;;  %v2926_v54 = vcombine.low %v1833_v62, %v1835_v50  ;;  %1516 = vrot.lane.b32.xlu0 %v11711_v15, %s10902_s24  ;;  %v2940_v28 = vrot.slane %v2924_v36, %v11649_v32  ;;  %v1558_v63 = vsel %vm1544_vm6, %v11359_v29, %v1411_v24 }
 0x13a   : > { %v1866_v19 = vrot.slane %v1852_v10, %v11649_v32  ;;  %v1867_v2 = vcombine.high %v1859_v5, %v1859_v5  ;;  %v2914_v43 = vrot.slane %v2906_v34, %v11649_v32  ;;  %v2933_v26 = vrot.slane %v2923_v38, %v11649_v32 }
 0x13b   : > { %v2947_v22 = vrot.slane %v2925_v51, %v11649_v32  ;;  %v2954_v60 = vrot.slane %v2926_v54, %v11649_v32  ;;  %v11727_v7 = vpop.permute.xlu1 %1174  ;;  %v1485_v17 = vpop.permute.xlu0 %1484  ;;  %v1629_v37 = vsel %vm1617_vm7, %v1556_v44, %v11617_v49  ;;  %v1837_v50 = vcombine.high %v1833_v62, %v1833_v62 }
 0x13c   : > { %v1868_v36 = vcombine.high %v1866_v19, %v1866_v19  ;;  %v1889_v10 = vrot.slane %v1867_v2, %v11649_v32  ;;  %v1631_v56 = vsel %vm1617_vm7, %v1558_v63, %v1485_v17  ;;  %v2922_v52 = vcombine.low %v2914_v43, %v2921_v46 }
 0x13d   : > { %v1915_v4 = vcombine.high %v1631_v56, %v1631_v56  ;;  %v1922_v53 = vrot.slane %v1631_v56, %v11649_v32  ;;  %1440 = vrot.lane.b32.xlu0 %v11669_v39, %s10901_s23  ;;  %v2956_v29 = vcombine.low %v2947_v22, %v2954_v60  ;;  %v2955_v34 = vcombine.low %v2933_v26, %v2940_v28 }
 0x13e   : > { %v11739_v38 = vrot.slane %v1868_v36, %v11649_v32  ;;  %v1875_v40 = vrot.slane %v1859_v5, %v11649_v32  ;;  %10138 = vmatmul.mubr.msk.bf16.vlgmr.msra.gmra.mrb[0].mxu0 %vm3890_vm8, %v2922_v52  ;;  %v1851_v46 = vrot.slane %v1844_v30, %v11649_v32  ;;  %v11748_v22 = vrot.slane %v1866_v19, %v11649_v32 }
 0x13f   : > { %v1929_v24 = vrot.slane %v1915_v4, %v11649_v32  ;;  %v1930_v51 = vcombine.high %v1922_v53, %v1922_v53  ;;  %v11744_v54 = vpop.permute.xlu1 %1496  ;;  %v1415_v2 = vpop.permute.xlu0 %1414  ;;  %v1938_v49 = vrot.slane %v1922_v53, %v11649_v32  ;;  %v14735_v62 = vmov 0.0  }
 0x140   : > { %10141 = vmatprep.mubr.msk.bf16.mxu0 %vm10904_vm5, %v14735_v62  ;;  %v2970_v5 = vrot.slane %v2956_v29, %v11649_v32  ;;  %v1907_v44 = vrot.slane %v1629_v37, %v11649_v32  ;;  %v1560_v28 = vsel %vm1544_vm6, %v11281_v18, %v11626_v14  ;;  %v2973_v60 = vcombine.low %v1875_v40, %v1889_v10 }
 0x141   : > { %v1952_v63 = vrot.slane %v1930_v51, %v11649_v32  ;;  %1446 = vrot.lane.b32.xlu0 %v11711_v15, %s10901_s23  ;;  %v2972_v30 = vcombine.low %v1837_v50, %v1851_v46  ;;  %v2975_v19 = vcombine.low %v11748_v22, %v11739_v38  ;;  %v1562_v17 = vsel %vm1544_vm6, %v11272_v11, %v1415_v2 }
 0x142   : > { %v2963_v43 = vrot.slane %v2955_v34, %v11649_v32  ;;  %v9943_v26 = vcombine.high %v1875_v40, %v1889_v10  ;;  %v1931_v36 = vcombine.high %v1929_v24, %v1929_v24  ;;  %v1945_v56 = vrot.slane %v1929_v24, %v11649_v32 }
 0x143   : > { %v1962_v18 = vcombine.high %v1952_v63, %v1952_v63  ;;  %v11767_v14 = vpop.permute.xlu1 %1494  ;;  %v1487_v4 = vpop.permute.xlu0 %1486  ;;  %v1960_v53 = vcombine.high %v1938_v49, %v1938_v49  ;;  %v1635_v52 = vsel %vm1617_vm7, %v1562_v17, %v11624_v55  ;;  %v1914_v50 = vrot.slane %v1907_v44, %v11649_v32 }
 0x144   : > { %v1633_v29 = vsel %vm1617_vm7, %v1560_v28, %v1487_v4  ;;  %v2971_v37 = vcombine.low %v2963_v43, %v2970_v5  ;;  %v2989_v11 = vrot.slane %v2973_v60, %v11649_v32  ;;  %v976_v10 = vshrl.u32 %v11556_v23, 16 }
 0x145   : > { %v3003_v34 = vrot.slane %v2975_v19, %v11649_v32  ;;  %v3024_v40 = vcombine.low %v1962_v18, %v1945_v56  ;;  %v1985_v24 = vrot.slane %v1635_v52, %v11649_v32  ;;  %v1970_v51 = vrot.slane %v1633_v29, %v11649_v32 }
 0x146   : > { %v2996_v2 = vrot.slane %v9943_v26, %v11649_v32  ;;  %v1959_v55 = vrot.slane %v1931_v36, %v11649_v32  ;;  %v3022_v46 = vcombine.low %v1914_v50, %v1938_v49  ;;  %10142 = vmatmul.mubr.msk.bf16.gmra.mrb[4].mxu0 %vm3890_vm8, %v2971_v37  ;;  %v2982_v28 = vrot.slane %v2972_v30, %v11649_v32 }
 0x147   : > { %v11781_v5 = vpop.permute.xlu1 %1180  ;;  %v1030_v44 = vpop.permute.xlu0 %1029  ;;  %v3023_v60 = vcombine.low %v1952_v63, %v1960_v53  ;;  %v1978_v17 = vcombine.high %v1635_v52, %v1635_v52  ;;  %v1993_v19 = vcombine.high %v1985_v24, %v1985_v24  ;;  %10145 = vmatprep.mubr.msk.bf16.mxu0 %vm10904_vm5, %v14735_v62  ;;  %v9944_v26 = vcombine.high %v11748_v22, %v11739_v38 }
 0x148   : > { %v1252_v43 = vsel %vm1200_vm2, %v11212_v12, %v1030_v44  ;;  %v3004_v36 = vcombine.low %v2982_v28, %v2989_v11  ;;  %v978_v18 = vor.u32 %v976_v10, %v11575_v58  ;;  %v3052_v63 = vrot.slane %v3024_v40, %v11649_v32 }
 0x149   : > { %v11792_v49 = vsel %vm1281_vm3, %v1252_v43, %v11657_v16  ;;  %v1977_v30 = vrot.slane %v1970_v51, %v11649_v32  ;;  %v3005_v12 = vcombine.low %v2996_v2, %v3003_v34  ;;  %v1961_v4 = vcombine.high %v1945_v56, %v1945_v56 }
 0x14a   : > { %1444 = vrot.lane.b32.xlu0 %v11792_v49, %s10901_s23  ;;  %1514 = vrot.lane.b32.xlu1 %v11792_v49, %s10902_s24  ;;  %v3038_v38 = vrot.slane %v3022_v46, %v11649_v32  ;;  %v2015_v16 = vrot.slane %v1993_v19, %v11649_v32  ;;  %v3045_v58 = vrot.slane %v3023_v60, %v11649_v32 }
 0x14b   : > { %v11803_v22 = vpop.permute.xlu1 %1178  ;;  %v1419_v53 = vpop.permute.xlu0 %1418  ;;  %v1992_v52 = vrot.slane %v1978_v17, %v11649_v32  ;;  %v1963_v29 = vcombine.high %v1959_v55, %v1959_v55  ;;  %v2001_v50 = vrot.slane %v1985_v24, %v11649_v32  ;;  %v3012_v11 = vrot.slane %v3004_v36, %v11649_v32 }
 0x14c   : > { %v1566_v37 = vsel %vm1544_vm6, %v11391_v35, %v1419_v53  ;;  %v3019_v10 = vrot.slane %v3005_v12, %v11649_v32  ;;  %v3031_v34 = vrot.slane %v9944_v26, %v11649_v32  ;;  %v3054_v51 = vcombine.low %v3045_v58, %v3052_v63 }
 0x14d   : > { %v1639_v56 = vsel %vm1617_vm7, %v1566_v37, %v11675_v9  ;;  %v3071_v40 = vcombine.low %v1963_v29, %v1977_v30  ;;  %v3072_v2 = vcombine.low %v2001_v50, %v2015_v16  ;;  %v9945_v46 = vcombine.high %v2001_v50, %v2015_v16 }
 0x14e   : > { %1057 = vrot.lane.b32.xlu0 %v978_v18, %s10900_s22  ;;  %v2048_v44 = vrot.slane %v1639_v56, %v11649_v32  ;;  %v3020_v35 = vcombine.low %v3012_v11, %v3019_v10  ;;  %v3053_v60 = vcombine.low %v3031_v34, %v3038_v38  ;;  %v3070_v9 = vcombine.low %v1959_v55, %v1961_v4 }
 0x14f   : > { %v11817_v28 = vpop.permute.xlu1 %1426  ;;  %v1417_v24 = vpop.permute.xlu0 %1416  ;;  %v1994_v17 = vcombine.high %v1992_v52, %v1992_v52  ;;  %v2041_v43 = vcombine.high %v1639_v56, %v1639_v56  ;;  %v3094_v55 = vrot.slane %v3072_v2, %v11649_v32  ;;  %v3101_v30 = vrot.slane %v9945_v46, %v11649_v32 }
 0x150   : > { %v1564_v19 = vsel %vm1544_vm6, %v11297_v27, %v1417_v24  ;;  %v2056_v26 = vcombine.high %v2048_v44, %v2048_v44  ;;  %v2064_v36 = vrot.slane %v2048_v44, %v11649_v32  ;;  %10146 = vmatmul.mubr.msk.bf16.gmra.mrb[8].mxu0 %vm3890_vm8, %v3020_v35  ;;  %v3087_v27 = vrot.slane %v3071_v40, %v11649_v32 }
 0x151   : > { %v1637_v18 = vsel %vm1617_vm7, %v1564_v19, %v11689_v25  ;;  %10149 = vmatprep.mubr.msk.bf16.mxu0 %vm10904_vm5, %v14735_v62  ;;  %v3068_v38 = vrot.slane %v3054_v51, %v11649_v32  ;;  %v2022_v16 = vrot.slane %v1994_v17, %v11649_v32  ;;  %v3080_v25 = vrot.slane %v3070_v9, %v11649_v32  ;;  %v10868_v9 = vld [vmem:[%s10994_s20 + $0xa4] ss:$0 sps:$4 sm:$0x33]  }
 0x152   : > { %v2033_v63 = vrot.slane %v1637_v18, %v11649_v32  ;;  %v2055_v58 = vrot.slane %v2041_v43, %v11649_v32  ;;  %v2078_v29 = vrot.slane %v2056_v26, %v11649_v32  ;;  %v2086_v37 = vcombine.high %v2064_v36, %v2064_v36 }
 0x153   : > { %v11831_v12 = vpop.permute.xlu1 %1500  ;;  %v1036_v4 = vpop.permute.xlu0 %1035  ;;  %v3061_v50 = vrot.slane %v3053_v60, %v11649_v32  ;;  %v2008_v56 = vrot.slane %v1992_v52, %v11649_v32  ;;  %v3102_v10 = vcombine.low %v3080_v25, %v3087_v27  ;;  %v3103_v2 = vcombine.low %v3094_v55, %v3101_v30 }
 0x154   : > { %v2040_v53 = vrot.slane %v2033_v63, %v11649_v32  ;;  %v1258_v11 = vsel %vm1200_vm2, %v11350_v8, %v1036_v4  ;;  %v2057_v52 = vcombine.high %v2055_v58, %v2055_v58  ;;  %v2071_v17 = vrot.slane %v2055_v58, %v11649_v32 }
 0x155   : > { %v3069_v40 = vcombine.low %v3061_v50, %v3068_v38  ;;  %v3119_v44 = vcombine.low %v2008_v56, %v2022_v16  ;;  %v9946_v35 = vcombine.high %v2008_v56, %v2022_v16  ;;  %v11847_v24 = vsel %vm1281_vm3, %v1258_v11, %v11707_v57 }
 0x156   : > { %v3121_v34 = vcombine.low %v2040_v53, %v2064_v36  ;;  %v3122_v8 = vcombine.low %v2078_v29, %v2086_v37  ;;  %1450 = vrot.lane.b32.xlu0 %v11847_v24, %s10901_s23  ;;  %1520 = vrot.lane.b32.xlu1 %v11847_v24, %s10902_s24  ;;  %v3110_v26 = vrot.slane %v3102_v10, %v11649_v32 }
 0x157   : > { %v1034_v51 = vpop.permute.xlu0 %1033  ;;  %v11843_v46 = vpop.permute.xlu1 %1184  ;;  %v3117_v36 = vrot.slane %v3103_v2, %v11649_v32  ;;  %v3129_v63 = vrot.slane %v3119_v44, %v11649_v32  ;;  %v3136_v55 = vrot.slane %v9946_v35, %v11649_v32  ;;  %v2088_v30 = vcombine.high %v2078_v29, %v2078_v29 }
 0x158   : > { %v1256_v60 = vsel %vm1200_vm2, %v10868_v9, %v1034_v51  ;;  %10150 = vmatmul.mubr.msk.bf16.gmra.mrb[12].mxu0 %vm3890_vm8, %v3069_v40  ;;  %v3143_v19 = vrot.slane %v3121_v34, %v11649_v32  ;;  %v2087_v4 = vcombine.high %v2071_v17, %v2071_v17  ;;  %v3150_v38 = vrot.slane %v3122_v8, %v11649_v32 }
 0x159   : > { %v11860_v57 = vsel %vm1281_vm3, %v1256_v60, %v11727_v7  ;;  %10153 = vmatprep.mubr.msk.bf16.mxu0 %vm10904_vm5, %v14735_v62  ;;  %v2085_v7 = vrot.slane %v2057_v52, %v11649_v32  ;;  %v3118_v58 = vcombine.low %v3110_v26, %v3117_v36  ;;  %v3168_v50 = vcombine.low %v2088_v30, %v2071_v17 }
 0x15a   : > { %1448 = vrot.lane.b32.xlu0 %v11860_v57, %s10901_s23  ;;  %1518 = vrot.lane.b32.xlu1 %v11860_v57, %s10902_s24  ;;  %v3151_v34 = vcombine.low %v3129_v63, %v3136_v55  ;;  %v14736_v51 = vrot.slane %v11556_v23, 1 }
 0x15b   : > { %v1423_v43 = vpop.permute.xlu0 %1422  ;;  %v11866_v18 = vpop.permute.xlu1 %1182  ;;  %v3178_v60 = vrot.slane %v3168_v50, %v11649_v32  ;;  %v2089_v52 = vcombine.high %v2085_v7, %v2085_v7 }
 0x15c   : > { %v1570_v27 = vsel %vm1544_vm6, %v11309_v42, %v1423_v43  ;;  %v3152_v42 = vcombine.low %v3143_v19, %v3150_v38  ;;  %v3159_v19 = vrot.slane %v3151_v34, %v11649_v32 }
 0x15d   : > { %v1643_v16 = vsel %vm1617_vm7, %v1570_v27, %v11744_v54  ;;  %v3169_v54 = vcombine.low %v2085_v7, %v2087_v4  ;;  %v1574_v7 = vsel %vm1544_vm6, %v11347_v13, %v11817_v28 }
 0x15e   : > { %v2111_v25 = vrot.slane %v1643_v16, %v11649_v32  ;;  %v2104_v53 = vcombine.high %v1643_v16, %v1643_v16  ;;  %1198 = vrot.lane.b32.xlu1 %v14736_v51, %s10899_s21  ;;  %v1647_v28 = vsel %vm1617_vm7, %v1574_v7, %v11831_v12 }
 0x15f   : > { %v1421_v29 = vpop.permute.xlu0 %1420  ;;  %v11881_v37 = vpop.permute.xlu1 %1502  ;;  %v3185_v43 = vrot.slane %v3169_v54, %v11649_v32 }
 0x160   : > { %v2119_v56 = vcombine.high %v2111_v25, %v2111_v25  ;;  %v1568_v11 = vsel %vm1544_vm6, %v11421_v59, %v1421_v29  ;;  %10154 = vmatmul.mubr.msk.bf16.gmra.mrb[16].mxu0 %vm3890_vm8, %v3118_v58  ;;  %v2118_v44 = vrot.slane %v2104_v53, %v11649_v32  ;;  %v2127_v59 = vrot.slane %v2111_v25, %v11649_v32 }
 0x161   : > { %v1641_v10 = vsel %vm1617_vm7, %v1568_v11, %v11767_v14  ;;  %10157 = vmatprep.mubr.msk.bf16.mxu0 %vm10904_vm5, %v14735_v62  ;;  %v3166_v14 = vrot.slane %v3152_v42, %v11649_v32  ;;  %v3200_v13 = vcombine.low %v3178_v60, %v3185_v43 }
 0x162   : > { %v11889_v40 = vrot.slane %v2119_v56, %v11649_v32  ;;  %v2096_v2 = vrot.slane %v1641_v10, %v11649_v32  ;;  %v2120_v26 = vcombine.high %v2118_v44, %v2118_v44  ;;  %v2134_v58 = vrot.slane %v2118_v44, %v11649_v32 }
 0x163   : > { %v1040_v35 = vpop.permute.xlu0 %1039  ;;  %v11900_v9 = vpop.permute.xlu1 %1045  ;;  %v3167_v63 = vcombine.low %v3159_v19, %v3166_v14  ;;  %v3208_v12 = vrot.slane %v3200_v13, %v11649_v32  ;;  %v2167_v10 = vcombine.high %v1647_v28, %v1647_v28 }
 0x164   : > { %v2103_v23 = vrot.slane %v2096_v2, %v11649_v32  ;;  %v3171_v17 = vcombine.low %v2127_v59, %v11889_v40  ;;  %v1262_v8 = vsel %vm1200_vm2, %v11402_v33, %v1040_v35  ;;  %v2148_v16 = vrot.slane %v2120_v26, %v11649_v32 }
 0x165   : > { %v11911_v55 = vsel %vm1281_vm3, %v1262_v8, %v11781_v5  ;;  %v9947_v2 = vcombine.high %v2127_v59, %v11889_v40 }
 0x166   : > { %v3170_v36 = vcombine.low %v2089_v52, %v2103_v23  ;;  %1454 = vrot.lane.b32.xlu0 %v11911_v55, %s10901_s23  ;;  %1524 = vrot.lane.b32.xlu1 %v11911_v55, %s10902_s24  ;;  %v3199_v4 = vrot.slane %v3171_v17, %v11649_v32  ;;  %v3218_v42 = vcombine.low %v2134_v58, %v2148_v16 }
 0x167   : > { %v1038_v30 = vpop.permute.xlu0 %1037  ;;  %v11913_v27 = vpop.permute.xlu1 %1504  ;;  %v2181_v17 = vrot.slane %v2167_v10, %v11649_v32  ;;  %v3227_v8 = vrot.slane %v9947_v2, %v11649_v32 }
 0x168   : > { %v1260_v33 = vsel %vm1200_vm2, %v11353_v3, %v1038_v30  ;;  %v3192_v5 = vrot.slane %v3170_v36, %v11649_v32  ;;  %10158 = vmatmul.mubr.msk.bf16.gmra.mrb[20].mxu0 %vm3890_vm8, %v3167_v63  ;;  %v3234_v14 = vrot.slane %v3218_v42, %v11649_v32 }
 0x169   : > { %v11929_v38 = vsel %vm1281_vm3, %v1260_v33, %v11803_v22  ;;  %10161 = vmatprep.mubr.msk.bf16.mxu0 %vm10904_vm5, %v14735_v62  ;;  %v2174_v22 = vrot.slane %v1647_v28, %v11649_v32 }
 0x16a   : > { %v3201_v25 = vcombine.low %v3192_v5, %v3199_v4  ;;  %1452 = vrot.lane.b32.xlu0 %v11929_v38, %s10901_s23  ;;  %1522 = vrot.lane.b32.xlu1 %v11929_v38, %s10902_s24  ;;  %v3249_v30 = vcombine.low %v3227_v8, %v3234_v14  ;;  %v2197_v4 = vrot.slane %v2181_v17, %v11649_v32 }
 0x16b   : > { %v1425_v3 = vpop.permute.xlu0 %1424  ;;  %v11936_v53 = vpop.permute.xlu1 %1188  ;;  %v2182_v51 = vcombine.high %v2174_v22, %v2174_v22  ;;  %v2190_v35 = vrot.slane %v2174_v22, %v11649_v32 }
 0x16c   : > { %v3215_v29 = vrot.slane %v3201_v25, %v11649_v32  ;;  %v1572_v50 = vsel %vm1544_vm6, %v11366_v0, %v1425_v3  ;;  %v9948_v0 = vcombine.high %v2134_v58, %v2148_v16  ;;  %v3257_v3 = vrot.slane %v3249_v30, %v11649_v32 }
 0x16d   : > { %v2204_v59 = vrot.slane %v2182_v51, %v11649_v32  ;;  %v2212_v28 = vcombine.high %v2190_v35, %v2190_v35  ;;  %v2213_v58 = vcombine.high %v2197_v4, %v2197_v4 }
 0x16e   : > { %v3216_v11 = vcombine.low %v3208_v12, %v3215_v29  ;;  %v3241_v26 = vrot.slane %v9948_v0, %v11649_v32 }
 0x16f   : > { %v1499_v56 = vpop.permute.xlu0 %1498  ;;  %v11948_v54 = vpop.permute.xlu1 %1049  ;;  %v2214_v5 = vcombine.high %v2204_v59, %v2204_v59 }
 0x170   : > { %v1645_v34 = vsel %vm1617_vm7, %v1572_v50, %v1499_v56  ;;  %10162 = vmatmul.mubr.msk.bf16.gmra.mrb[24].mxu0 %vm3890_vm8, %v3216_v11  ;;  %v3266_v56 = vcombine.low %v2204_v59, %v2212_v28 }
 0x171   : > { %v2159_v44 = vrot.slane %v1645_v34, %v11649_v32  ;;  %10165 = vmatprep.mubr.msk.bf16.mxu0 %vm10904_vm5, %v14735_v62  ;;  %v3267_v12 = vcombine.low %v2214_v5, %v2197_v4 }
 0x173   : > { %v2166_v60 = vrot.slane %v2159_v44, %v11649_v32  ;;  %v1044_v52 = vpop.permute.xlu0 %1043  ;;  %v11959_v23 = vpop.permute.xlu1 %1190  ;;  %v3283_v2 = vrot.slane %v3267_v12, %v11649_v32 }
 0x174   : > { %v1266_v40 = vsel %vm1200_vm2, %v11446_v6, %v1044_v52  ;;  %v2183_v6 = vcombine.high %v2181_v17, %v2181_v17 }
 0x175   : > { %v3220_v19 = vcombine.low %v2166_v60, %v2190_v35  ;;  %v11968_v43 = vsel %vm1281_vm3, %v1266_v40, %v11843_v46  ;;  %v3276_v60 = vrot.slane %v3266_v56, %v11649_v32 }
 0x176   : > { %1528 = vrot.lane.b32.xlu1 %v11968_v43, %s10902_s24  ;;  %v2211_v22 = vrot.slane %v2183_v6, %v11649_v32 }
 0x177   : > { %v3248_v36 = vrot.slane %v3220_v19, %v11649_v32  ;;  %v1042_v63 = vpop.permute.xlu0 %1041  ;;  %v11974_v7 = vpop.permute.xlu1 %1051  ;;  %v3298_v30 = vcombine.low %v3276_v60, %v3283_v2 }
 0x178   : > { %v1264_v33 = vsel %vm1200_vm2, %v11405_v41, %v1042_v63  ;;  %v2215_v34 = vcombine.high %v2211_v22, %v2211_v22 }
 0x179   : > { %v3250_v46 = vcombine.low %v3241_v26, %v3248_v36  ;;  %v11981_v13 = vsel %vm1281_vm3, %v1264_v33, %v11866_v18  ;;  %v14737_v36 = vld [vmem:[#allocation3_spill] sm:$0xff] }
 0x17a   : > { %1456 = vrot.lane.b32.xlu0 %v11981_v13, %s10901_s23  ;;  %1526 = vrot.lane.b32.xlu1 %v11981_v13, %s10902_s24 }
 0x17b   : > { %v1429_v16 = vpop.permute.xlu0 %1428  ;;  %v3264_v41 = vrot.slane %v3250_v46, %v11649_v32  ;;  %v11989_v25 = vpop.permute.xlu1 %1192 }
 0x17c   : > { %v1576_v18 = vsel %vm1544_vm6, %v11417_v45, %v1429_v16 }
 0x17d   : > { %v1649_v29 = vsel %vm1617_vm7, %v1576_v18, %v11881_v37  ;;  %v3265_v42 = vcombine.low %v3257_v3, %v3264_v41  ;;  %v3268_v37 = vcombine.low %v2211_v22, %v2213_v58  ;;  %v3306_v18 = vrot.slane %v3298_v30, %v11649_v32 }
 0x17e   : > { %v2222_v50 = vrot.slane %v1649_v29, %v11649_v32  ;;  %1458 = vrot.lane.b32.xlu1 %v11968_v43, %s10901_s23 }
 0x17f   : > { %10166 = vmatmul.mubr.msk.bf16.gmra.mrb[28].mxu0 %vm3890_vm8, %v3265_v42  ;;  %v1431_v11 = vpop.permute.xlu0 %1430  ;;  %v12000_v10 = vpop.permute.xlu1 %1512  ;;  %v3290_v19 = vrot.slane %v3268_v37, %v11649_v32 }
 0x180   : > { %v2229_v45 = vrot.slane %v2222_v50, %v11649_v32  ;;  %v1578_v51 = vsel %vm1544_vm6, %v11399_v20, %v1431_v11  ;;  %10169 = vmatprep.mubr.msk.bf16.mxu0 %vm10904_vm5, %v14735_v62  ;;  %v1272_v20 = vsel %vm1200_vm2, %v11494_v1, %v11948_v54 }
 0x181   : > { %v1651_v44 = vsel %vm1617_vm7, %v1578_v51, %v11913_v27  ;;  %v10869_v27 = vld [vmem:[%s10994_s20 + $0xc8] ss:$0 sps:$4 sm:$0x33]   ;;  %v12031_v4 = vsel %vm1281_vm3, %v1272_v20, %v11959_v23 }
 0x182   : > { %v3269_v35 = vcombine.low %v2215_v34, %v2229_v45  ;;  %v2230_v0 = vcombine.high %v1651_v44, %v1651_v44  ;;  %v2237_v14 = vrot.slane %v1651_v44, %v11649_v32  ;;  %v1268_v26 = vsel %vm1200_vm2, %v10869_v27, %v11900_v9 }
 0x183   : > { %v1048_v52 = vpop.permute.xlu0 %1047  ;;  %v1056_v17 = vpop.permute.xlu1 %1055 }
 0x184   : > { %v3297_v40 = vrot.slane %v3269_v35, %v11649_v32  ;;  %v2244_v59 = vrot.slane %v2230_v0, %v11649_v32  ;;  %v2245_v8 = vcombine.high %v2237_v14, %v2237_v14  ;;  %v1270_v63 = vsel %vm1200_vm2, %v14737_v36, %v1048_v52 }
 0x185   : > { %v2253_v33 = vrot.slane %v2237_v14, %v11649_v32  ;;  %v12027_v54 = vsel %vm1281_vm3, %v1270_v63, %v11936_v53  ;;  %v14738_v53 = vld [vmem:[#allocation4_spill] sm:$0xff]  ;;  %v1278_v37 = vsel %vm1200_vm2, %v11547_v47, %v1056_v17 }
 0x186   : > { %v2246_v6 = vcombine.high %v2244_v59, %v2244_v59  ;;  %v2267_v1 = vrot.slane %v2245_v8, %v11649_v32  ;;  %v2260_v5 = vrot.slane %v2244_v59, %v11649_v32  ;;  %1532 = vrot.lane.b32.xlu1 %v12027_v54, %s10902_s24  ;;  %v3299_v46 = vcombine.low %v3290_v19, %v3297_v40 }
 0x187   : > { %v1187_v9 = vpop.permute.xlu0 %1186  ;;  %v1197_v28 = vpop.permute.xlu1 %1196  ;;  %v1274_v23 = vsel %vm1200_vm2, %v14738_v53, %v11974_v7 }
 0x188   : > { %v2274_v16 = vrot.slane %v2246_v6, %v11649_v32  ;;  %v3315_v3 = vcombine.low %v2253_v33, %v2267_v1  ;;  %v9949_v41 = vcombine.high %v2253_v33, %v2267_v1  ;;  %v12038_v22 = vsel %vm1281_vm3, %v1268_v26, %v1187_v9 }
 0x189   : > { %1530 = vrot.lane.b32.xlu0 %v12038_v22, %s10902_s24  ;;  %v3313_v58 = vrot.slane %v3299_v46, %v11649_v32  ;;  %v1355_v51 = vsel %vm1281_vm3, %v1274_v23, %v11989_v25  ;;  %v1359_v47 = vsel %vm1281_vm3, %v1278_v37, %v1197_v28 }
 0x18a   : > { %v3317_v12 = vcombine.low %v2260_v5, %v2274_v16  ;;  %v9950_v29 = vcombine.high %v2260_v5, %v2274_v16  ;;  %v3325_v42 = vrot.slane %v3315_v3, %v11649_v32  ;;  %v3332_v50 = vrot.slane %v9949_v41, %v11649_v32  ;;  %1534 = vrot.lane.b32.xlu1 %v12031_v4, %s10902_s24 }
 0x18b   : > { %v1435_v56 = vpop.permute.xlu0 %1434  ;;  %v3314_v11 = vcombine.low %v3306_v18, %v3313_v58  ;;  %v1054_v34 = vpop.permute.xlu1 %1053 }
 0x18c   : > { %v3339_v7 = vrot.slane %v3317_v12, %v11649_v32  ;;  %v3346_v45 = vrot.slane %v9950_v29, %v11649_v32  ;;  %v3347_v2 = vcombine.low %v3325_v42, %v3332_v50  ;;  %v1582_v35 = vsel %vm1544_vm6, %v11460_v21, %v1435_v56  ;;  %v10854_v12 = vld [vmem:[%s14673_s5 + $0x8] sm:$0xff]  }
 0x18d   : > { %10170 = vmatmul.mubr.msk.bf16.gmra.mrb[32].mxu0 %vm3890_vm8, %v3314_v11  ;;  %1460 = vrot.lane.b32.xlu0 %v12038_v22, %s10901_s23  ;;  %v1276_v21 = vsel %vm1200_vm2, %v11523_v61, %v1054_v34 }
 0x18e   : > { %10173 = vmatprep.mubr.msk.bf16.mxu0 %vm10904_vm5, %v14735_v62  ;;  %v3348_v44 = vcombine.low %v3339_v7, %v3346_v45  ;;  %1536 = vrot.lane.b32.xlu1 %v1355_v51, %s10902_s24  ;;  %v3355_v14 = vrot.slane %v3347_v2, %v11649_v32 }
 0x18f   : > { %v1509_v0 = vpop.permute.xlu0 %1508  ;;  %v1195_v20 = vpop.permute.xlu1 %1194 }
 0x190   : > { %v1655_v25 = vsel %vm1617_vm7, %v1582_v35, %v1509_v0  ;;  %v3362_v60 = vrot.slane %v3348_v44, %v11649_v32  ;;  %v1357_v26 = vsel %vm1281_vm3, %v1276_v21, %v1195_v20 }
 0x191   : > { %v2293_v52 = vcombine.high %v1655_v25, %v1655_v25  ;;  %v2300_v17 = vrot.slane %v1655_v25, %v11649_v32  ;;  %1462 = vrot.lane.b32.xlu0 %v12027_v54, %s10901_s23 }
 0x192   : > { %v3363_v40 = vcombine.low %v3355_v14, %v3362_v60  ;;  %1540 = vrot.lane.b32.xlu1 %v1359_v47, %s10902_s24 }
 0x193   : > { %v2307_v59 = vrot.slane %v2293_v52, %v11649_v32  ;;  %v2308_v8 = vcombine.high %v2300_v17, %v2300_v17  ;;  %v2316_v19 = vrot.slane %v2300_v17, %v11649_v32  ;;  %v1433_v27 = vpop.permute.xlu0 %1432 }
 0x194   : > { %v1580_v61 = vsel %vm1544_vm6, %v11535_v31, %v1433_v27  ;;  %v10853_v31 = vld [vmem:[%s14673_s5] sm:$0xff]  }
 0x195   : > { %v2309_v36 = vcombine.high %v2307_v59, %v2307_v59  ;;  %v2323_v63 = vrot.slane %v2307_v59, %v11649_v32  ;;  %v2330_v30 = vrot.slane %v2308_v8, %v11649_v32  ;;  %10174 = vmatmul.mubr.msk.bf16.gmra.mrb[36].mxu0 %vm3890_vm8, %v3363_v40  ;;  %1466 = vrot.lane.b32.xlu0 %v1355_v51, %s10901_s23 }
 0x196   : > { %10177 = vmatprep.mubr.msk.bf16.mxu0 %vm10904_vm5, %v14735_v62  ;;  %v2338_v33 = vcombine.high %v2316_v19, %v2316_v19  ;;  %1538 = vrot.lane.b32.xlu1 %v1357_v26, %s10902_s24 }
 0x197   : > { %v2337_v6 = vrot.slane %v2309_v36, %v11649_v32  ;;  %v2339_v1 = vcombine.high %v2323_v63, %v2323_v63  ;;  %v2340_v5 = vcombine.high %v2330_v30, %v2330_v30  ;;  %v1507_v9 = vpop.permute.xlu0 %1506  ;;  %10222 = vmatpush3.bf16.msra.mxu1 %v10853_v31 }
 0x198   : > { %v1653_v46 = vsel %vm1617_vm7, %v1580_v61, %v1507_v9  ;;  %v3365_v41 = vcombine.low %v2330_v30, %v2338_v33  ;;  %10223 = vmatprep.subr.bf16.mxu1 %v14735_v62 }
 0x199   : > { %v3366_v28 = vcombine.low %v2340_v5, %v2323_v63  ;;  %v3367_v16 = vcombine.low %v2337_v6, %v2339_v1  ;;  %v2285_v3 = vrot.slane %v1653_v46, %v11649_v32  ;;  %1464 = vrot.lane.b32.xlu0 %v12031_v4, %s10901_s23  ;;  %v2341_v27 = vcombine.high %v2337_v6, %v2337_v6  ;;  %v14740_v5 = vld [vmem:[#allocation6_spill] sm:$0xff] }
 0x19a   : > { %v3381_v34 = vrot.slane %v3365_v41, %v11649_v32 }
 0x19b   : > { %v3388_v53 = vrot.slane %v3366_v28, %v11649_v32  ;;  %v3395_v23 = vrot.slane %v3367_v16, %v11649_v32  ;;  %v2292_v18 = vrot.slane %v2285_v3, %v11649_v32  ;;  %v1439_v58 = vpop.permute.xlu0 %1438  ;;  %10224 = vmatpush3.bf16.msra.mxu1 %v10854_v12 }
 0x19c   : > { %v1586_v29 = vsel %vm1544_vm6, %v11509_v48, %v1439_v58 }
 0x19d   : > { %v3364_v42 = vcombine.low %v2292_v18, %v2316_v19  ;;  %v1659_v50 = vsel %vm1617_vm7, %v1586_v29, %v12000_v10  ;;  %1468 = vrot.lane.b32.xlu0 %v1357_v26, %s10901_s23  ;;  %v3397_v51 = vcombine.low %v3388_v53, %v3395_v23  ;;  %v14739_v10 = vld [vmem:[#allocation2_spill] sm:$0xff]  ;;  %s446_s23 = scalar_lea.vmem %s14677_s9, %s10045_s12 }
 0x19e   : > { %v2356_v56 = vcombine.high %v1659_v50, %v1659_v50  ;;  %v2363_v11 = vrot.slane %v1659_v50, %v11649_v32 }
 0x19f   : > { %v3374_v7 = vrot.slane %v3364_v42, %v11649_v32  ;;  %v1437_v45 = vpop.permute.xlu0 %1436  ;;  %v3411_v14 = vrot.slane %v3397_v51, %v11649_v32 }
 0x1a0   : > { %v2370_v48 = vrot.slane %v2356_v56, %v11649_v32  ;;  %v2371_v37 = vcombine.high %v2363_v11, %v2363_v11  ;;  %v1584_v0 = vsel %vm1544_vm6, %v14739_v10, %v1437_v45  ;;  %v2379_v60 = vrot.slane %v2363_v11, %v11649_v32 }
 0x1a1   : > { %v3396_v2 = vcombine.low %v3374_v7, %v3381_v34  ;;  %v14741_v7 = vld [vmem:[#allocation7_spill] sm:$0xff] }
 0x1a2   : > { %v2372_v44 = vcombine.high %v2370_v48, %v2370_v48  ;;  %v2393_v35 = vrot.slane %v2371_v37, %v11649_v32  ;;  %v2386_v52 = vrot.slane %v2370_v48, %v11649_v32 }
 0x1a3   : > { %v1511_v25 = vpop.permute.xlu0 %1510  ;;  %v3404_v47 = vrot.slane %v3396_v2, %v11649_v32 }
 0x1a4   : > { %v2400_v17 = vrot.slane %v2372_v44, %v11649_v32  ;;  %v1657_v21 = vsel %vm1617_vm7, %v1584_v0, %v1511_v25  ;;  %v9951_v59 = vcombine.high %v2379_v60, %v2393_v35  ;;  %v3414_v19 = vcombine.low %v2379_v60, %v2393_v35 }
 0x1a5   : > { %v2348_v20 = vrot.slane %v1657_v21, %v11649_v32  ;;  %v3412_v40 = vcombine.low %v3404_v47, %v3411_v14 }
 0x1a6   : > { %v3416_v8 = vcombine.low %v2386_v52, %v2400_v17  ;;  %v3437_v61 = vrot.slane %v9951_v59, %v11649_v32  ;;  %v3430_v33 = vrot.slane %v3414_v19, %v11649_v32  ;;  %v9952_v44 = vcombine.high %v2386_v52, %v2400_v17  ;;  %v14742_v19 = vld [vmem:[#allocation5_spill] sm:$0xff] }
 0x1a7   : > { %v2355_v26 = vrot.slane %v2348_v20, %v11649_v32  ;;  %10178 = vmatmul.mubr.msk.bf16.gmra.mrb[40].mxu0 %vm3890_vm8, %v3412_v40  ;;  %v1443_v36 = vpop.permute.xlu0 %1442 }
 0x1a8   : > { %v3444_v63 = vrot.slane %v3416_v8, %v11649_v32  ;;  %10181 = vmatprep.mubr.msk.bf16.mxu0 %vm10904_vm5, %v14735_v62  ;;  %v1590_v6 = vsel %vm1544_vm6, %v14740_v5, %v1443_v36  ;;  %v3472_v47 = vrot.slane %v9952_v44, %v11649_v32 }
 0x1a9   : > { %v3413_v30 = vcombine.low %v2341_v27, %v2355_v26 }
 0x1aa   : > { %v3446_v28 = vcombine.low %v3437_v61, %v3444_v63 }
 0x1ab   : > { %v3423_v1 = vrot.slane %v3413_v30, %v11649_v32  ;;  %v1517_v9 = vpop.permute.xlu0 %1516 }
 0x1ac   : > { %v1663_v46 = vsel %vm1617_vm7, %v1590_v6, %v1517_v9  ;;  %v3460_v53 = vrot.slane %v3446_v28, %v11649_v32  ;;  %v12166_v9 = vld [vmem:[%s14670_s2] sm:$0xff] }
 0x1ad   : > { %v3445_v16 = vcombine.low %v3423_v1, %v3430_v33  ;;  %v2426_v3 = vrot.slane %v1663_v46, %v11649_v32  ;;  %v2419_v23 = vcombine.high %v1663_v46, %v1663_v46  ;;  %v14743_v46 = vld [vmem:[#allocation8_spill] sm:$0xff] }
 0x1ae   : > { %v12169_v28 = vsub.s32 1, %v14743_v46 }
 0x1af   : > { %v3453_v31 = vrot.slane %v3445_v16, %v11649_v32  ;;  %v2434_v41 = vcombine.high %v2426_v3, %v2426_v3  ;;  %v2433_v12 = vrot.slane %v2419_v23, %v11649_v32  ;;  %v2442_v29 = vrot.slane %v2426_v3, %v11649_v32  ;;  %v1441_v50 = vpop.permute.xlu0 %1440  ;;  %v10870_v3 = vld [vmem:[%s10994_s20 + $0xec] ss:$0 sps:$4 sm:$0x33]   ;;  %s10913_s20 = smov 96  }
 0x1b0   : > { %v1588_v45 = vsel %vm1544_vm6, %v14741_v7, %v1441_v50 }
 0x1b1   : > { %v3461_v18 = vcombine.low %v3453_v31, %v3460_v53  ;;  %v2456_v58 = vrot.slane %v2434_v41, %v11649_v32  ;;  %v2449_v56 = vrot.slane %v2433_v12, %v11649_v32  ;;  %v2464_v11 = vcombine.high %v2442_v29, %v2442_v29 }
 0x1b2   : > { %v2435_v17 = vcombine.high %v2433_v12, %v2433_v12  ;;  %v5474_v53 = vsub.s32 2, %v14743_v46  ;;  %v5460_v12 = vrot.slane %v12166_v9, %v12169_v28 }
 0x1b3   : > { %10182 = vmatmul.mubr.msk.bf16.gmra.mrb[44].mxu0 %vm3890_vm8, %v3461_v18  ;;  %v2466_v42 = vcombine.high %v2456_v58, %v2456_v58  ;;  %v3464_v37 = vcombine.low %v2456_v58, %v2464_v11  ;;  %v1447_v21 = vpop.permute.xlu0 %1446  ;;  %v2465_v16 = vcombine.high %v2449_v56, %v2449_v56 }
 0x1b4   : > { %10185 = vmatprep.mubr.msk.bf16.mxu0 %vm10904_vm5, %v14735_v62  ;;  %v1594_v27 = vsel %vm1544_vm6, %v14742_v19, %v1447_v21  ;;  %v2463_v33 = vrot.slane %v2435_v17, %v11649_v32  ;;  %5462 = vbcast.lane.b32.xlu0 %v5460_v12, 256 }
 0x1b5   : > { %v3465_v34 = vcombine.low %v2466_v42, %v2449_v56  ;;  %v3486_v0 = vrot.slane %v3464_v37, %v11649_v32 }
 0x1b6   : > { %v2467_v7 = vcombine.high %v2463_v33, %v2463_v33 }
 0x1b7   : > { %v3493_v35 = vrot.slane %v3465_v34, %v11649_v32  ;;  %v3511_v34 = vcombine.low %v2463_v33, %v2465_v16 }
 0x1b9   : > { %v3495_v60 = vcombine.low %v3486_v0, %v3493_v35 }
 0x1bb   : > { %v3509_v59 = vrot.slane %v3495_v60, %v11649_v32 }
 0x1bc   : > { %v1515_v51 = vpop.permute.xlu1 %1514  ;;  %v1445_v8 = vpop.permute.xlu0 %1444 }
 0x1bd   : > { %v1661_v48 = vsel %vm1617_vm7, %v1588_v45, %v1515_v51  ;;  %v1592_v1 = vsel %vm1544_vm6, %v11669_v39, %v1445_v8  ;;  %v5475_v51 = vrot.slane %v12166_v9, %v5474_v53 }
 0x1be   : > { %v2411_v2 = vrot.slane %v1661_v48, %v11649_v32 }
 0x1bf   : > { %5477 = vbcast.lane.b32.xlu0 %v5475_v51, 256 }
 0x1c0   : > { %v2418_v10 = vrot.slane %v2411_v2, %v11649_v32  ;;  %v1058_v63 = vpop.permute.xlu0 %1057 }
 0x1c1   : > { %v1280_v31 = vsel %vm1200_vm2, %v10870_v3, %v1058_v63 }
 0x1c2   : > { %v3463_v25 = vcombine.low %v2418_v10, %v2442_v29  ;;  %v3521_v10 = vrot.slane %v3511_v34, %v11649_v32  ;;  %v5519_v34 = vsub.s32 5, %v14743_v46 }
 0x1c3   : > { %5470 = vbcast.lane.b32.xlu0 %v5460_v12, 272 }
 0x1c4   : > { %v3479_v14 = vrot.slane %v3463_v25, %v11649_v32  ;;  %v5489_v25 = vsub.s32 3, %v14743_v46 }
 0x1c6   : > { %v3494_v20 = vcombine.low %v3472_v47, %v3479_v14 }
 0x1c8   : > { %v3502_v40 = vrot.slane %v3494_v20, %v11649_v32  ;;  %v1521_v26 = vpop.permute.xlu1 %1520  ;;  %v1451_v50 = vpop.permute.xlu0 %1450 }
 0x1c9   : > { %v1667_v36 = vsel %vm1617_vm7, %v1594_v27, %v1521_v26  ;;  %v1598_v14 = vsel %vm1544_vm6, %v11711_v15, %v1451_v50  ;;  %v5490_v15 = vrot.slane %v12166_v9, %v5489_v25 }
 0x1ca   : > { %v3510_v52 = vcombine.low %v3502_v40, %v3509_v59  ;;  %v2482_v30 = vcombine.high %v1667_v36, %v1667_v36  ;;  %v2489_v61 = vrot.slane %v1667_v36, %v11649_v32 }
 0x1cb   : > { %5492 = vbcast.lane.b32.xlu0 %v5490_v15, 256 }
 0x1cc   : > { %10186 = vmatmul.mubr.msk.bf16.gmra.mrb[48].mxu0 %vm3890_vm8, %v3510_v52  ;;  %v2497_v5 = vcombine.high %v2489_v61, %v2489_v61  ;;  %v1519_v6 = vpop.permute.xlu1 %1518  ;;  %v2496_v39 = vrot.slane %v2482_v30, %v11649_v32  ;;  %v2505_v23 = vrot.slane %v2489_v61, %v11649_v32  ;;  %v1449_v60 = vpop.permute.xlu0 %1448 }
 0x1cd   : > { %10189 = vmatprep.mubr.msk.bf16.mxu0 %vm10904_vm5, %v14735_v62  ;;  %v1665_v41 = vsel %vm1617_vm7, %v1592_v1, %v1519_v6  ;;  %v1596_v17 = vsel %vm1544_vm6, %v11792_v49, %v1449_v60 }
 0x1ce   : > { %v2519_v18 = vrot.slane %v2497_v5, %v11649_v32  ;;  %v2474_v58 = vrot.slane %v1665_v41, %v11649_v32  ;;  %v2498_v48 = vcombine.high %v2496_v39, %v2496_v39  ;;  %v2512_v59 = vrot.slane %v2496_v39, %v11649_v32 }
 0x1cf   : > { %5500 = vbcast.lane.b32.xlu0 %v5490_v15, 272 }
 0x1d0   : > { %v3513_v29 = vcombine.low %v2505_v23, %v2519_v18  ;;  %v9953_v42 = vcombine.high %v2505_v23, %v2519_v18  ;;  %v2481_v56 = vrot.slane %v2474_v58, %v11649_v32  ;;  %v1199_v11 = vpop.permute.xlu1 %1198  ;;  %v2526_v47 = vrot.slane %v2498_v48, %v11649_v32 }
 0x1d1   : > { %v1361_v45 = vsel %vm1281_vm3, %v1280_v31, %v1199_v11  ;;  %v5504_v18 = vsub.s32 4, %v14743_v46 }
 0x1d2   : > { %v3535_v37 = vrot.slane %v3513_v29, %v11649_v32  ;;  %v3542_v2 = vrot.slane %v9953_v42, %v11649_v32  ;;  %1542 = vrot.lane.b32.xlu1 %v1361_v45, %s10902_s24  ;;  %v3512_v44 = vcombine.low %v2467_v7, %v2481_v56  ;;  %v3560_v26 = vcombine.low %v2512_v59, %v2526_v47 }
 0x1d3   : > { %v9954_v36 = vcombine.high %v2512_v59, %v2526_v47  ;;  %v5505_v11 = vrot.slane %v12166_v9, %v5504_v18 }
 0x1d4   : > { %v3544_v35 = vcombine.low %v3535_v37, %v3542_v2  ;;  %v3528_v0 = vrot.slane %v3512_v44, %v11649_v32  ;;  %v3570_v3 = vrot.slane %v3560_v26, %v11649_v32 }
 0x1d5   : > { %v3577_v31 = vrot.slane %v9954_v36, %v11649_v32  ;;  %5511 = vbcast.lane.b32.xlu0 %v5505_v11, 264 }
 0x1d6   : > { %5466 = vbcast.lane.b32.xlu1 %v5460_v12, 264  ;;  %v3543_v20 = vcombine.low %v3521_v10, %v3528_v0  ;;  %v3558_v27 = vrot.slane %v3544_v35, %v11649_v32  ;;  %v5520_v10 = vrot.slane %v12166_v9, %v5519_v34 }
 0x1d7   : > { %v3592_v42 = vcombine.low %v3570_v3, %v3577_v31 }
 0x1d8   : > { %v1525_v21 = vpop.permute.xlu1 %1524  ;;  %v3551_v19 = vrot.slane %v3543_v20, %v11649_v32  ;;  %v1455_v39 = vpop.permute.xlu0 %1454 }
 0x1d9   : > { %v1671_v40 = vsel %vm1617_vm7, %v1598_v14, %v1525_v21  ;;  %v3600_v14 = vrot.slane %v3592_v42, %v11649_v32  ;;  %5522 = vbcast.lane.b32.xlu0 %v5520_v10, 256 }
 0x1da   : > { %v2545_v8 = vcombine.high %v1671_v40, %v1671_v40  ;;  %v2552_v52 = vrot.slane %v1671_v40, %v11649_v32  ;;  %5481 = vbcast.lane.b32.xlu1 %v5475_v51, 264  ;;  %v3559_v1 = vcombine.low %v3551_v19, %v3558_v27 }
 0x1dc   : > { %v2560_v63 = vcombine.high %v2552_v52, %v2552_v52  ;;  %v2568_v30 = vrot.slane %v2552_v52, %v11649_v32  ;;  %v1523_v61 = vpop.permute.xlu1 %1522  ;;  %v2559_v49 = vrot.slane %v2545_v8, %v11649_v32  ;;  %10190 = vmatmul.mubr.msk.bf16.gmra.mrb[52].mxu0 %vm3890_vm8, %v3559_v1  ;;  %v1453_v44 = vpop.permute.xlu0 %1452 }
 0x1dd   : > { %v1669_v33 = vsel %vm1617_vm7, %v1596_v17, %v1523_v61  ;;  %10193 = vmatprep.mubr.msk.bf16.mxu0 %vm10904_vm5, %v14735_v62  ;;  %5530 = vbcast.lane.b32.xlu0 %v5520_v10, 272 }
 0x1de   : > { %v2582_v5 = vrot.slane %v2560_v63, %v11649_v32  ;;  %v2590_v6 = vcombine.high %v2568_v30, %v2568_v30  ;;  %v2537_v16 = vrot.slane %v1669_v33, %v11649_v32  ;;  %5485 = vbcast.lane.b32.xlu1 %v5475_v51, 272  ;;  %v2561_v58 = vcombine.high %v2559_v49, %v2559_v49 }
 0x1df   : > { %v2575_v12 = vrot.slane %v2559_v49, %v11649_v32  ;;  %v1602_v51 = vsel %vm1544_vm6, %v11847_v24, %v1455_v39  ;;  %v1600_v24 = vsel %vm1544_vm6, %v11860_v57, %v1453_v44  ;;  %v5534_v57 = vsub.s32 6, %v14743_v46  ;;  %v12279_v44 = vld [vmem:[%s14670_s2 + $0x8] sm:$0xff] }
 0x1e0   : > { %v3563_v41 = vcombine.low %v2582_v5, %v2590_v6  ;;  %v2544_v23 = vrot.slane %v2537_v16, %v11649_v32  ;;  %v2589_v7 = vrot.slane %v2561_v58, %v11649_v32  ;;  %v2592_v37 = vcombine.high %v2582_v5, %v2582_v5 }
 0x1e1   : > { %v2591_v45 = vcombine.high %v2575_v12, %v2575_v12  ;;  %v5549_v33 = vsub.s32 7, %v14743_v46  ;;  %v5535_v5 = vrot.slane %v12166_v9, %v5534_v57 }
 0x1e2   : > { %v3562_v29 = vcombine.low %v2544_v23, %v2568_v30  ;;  %v3591_v50 = vrot.slane %v3563_v41, %v11649_v32  ;;  %5496 = vbcast.lane.b32.xlu1 %v5490_v15, 264  ;;  %v3609_v40 = vcombine.low %v2592_v37, %v2575_v12  ;;  %v2593_v26 = vcombine.high %v2589_v7, %v2589_v7 }
 0x1e3   : > { %v3610_v59 = vcombine.low %v2589_v7, %v2591_v45  ;;  %5541 = vbcast.lane.b32.xlu0 %v5535_v5, 264  ;;  %v5550_v41 = vrot.slane %v12166_v9, %v5549_v33  ;;  %v12273_v45 = vsub.s32 0, %v14743_v46 }
 0x1e4   : > { %v3584_v56 = vrot.slane %v3562_v29, %v11649_v32  ;;  %v3619_v63 = vrot.slane %v3609_v40, %v11649_v32 }
 0x1e5   : > { %v3626_v30 = vrot.slane %v3610_v59, %v11649_v32 }
 0x1e6   : > { %v3593_v2 = vcombine.low %v3584_v56, %v3591_v50  ;;  %5507 = vbcast.lane.b32.xlu1 %v5505_v11, 256 }
 0x1e7   : > { %v3641_v31 = vcombine.low %v3619_v63, %v3626_v30  ;;  %5552 = vbcast.lane.b32.xlu0 %v5550_v41, 256 }
 0x1e8   : > { %v1529_v48 = vpop.permute.xlu1 %1528  ;;  %v3607_v60 = vrot.slane %v3593_v2, %v11649_v32 }
 0x1e9   : > { %v1675_v35 = vsel %vm1617_vm7, %v1602_v51, %v1529_v48  ;;  %v3649_v50 = vrot.slane %v3641_v31, %v11649_v32 }
 0x1ea   : > { %v2615_v0 = vrot.slane %v1675_v35, %v11649_v32  ;;  %v2608_v47 = vcombine.high %v1675_v35, %v1675_v35  ;;  %v3608_v52 = vcombine.low %v3600_v14, %v3607_v60  ;;  %5515 = vbcast.lane.b32.xlu1 %v5505_v11, 272 }
 0x1eb   : > { %5560 = vbcast.lane.b32.xlu0 %v5550_v41, 272 }
 0x1ec   : > { %v2623_v21 = vcombine.high %v2615_v0, %v2615_v0  ;;  %v1527_v20 = vpop.permute.xlu1 %1526  ;;  %v2622_v27 = vrot.slane %v2608_v47, %v11649_v32  ;;  %v12243_v15 = vrot.slane %v2615_v0, %v11649_v32  ;;  %10194 = vmatmul.mubr.msk.bf16.gmra.mrb[56].mxu0 %vm3890_vm8, %v3608_v52  ;;  %v1457_v58 = vpop.permute.xlu0 %1456 }
 0x1ed   : > { %v1673_v8 = vsel %vm1617_vm7, %v1600_v24, %v1527_v20  ;;  %10197 = vmatprep.mubr.msk.bf16.mxu0 %vm10904_vm5, %v14735_v62  ;;  %v1604_v11 = vsel %vm1544_vm6, %v11929_v38, %v1457_v58 }
 0x1ee   : > { %v12238_v17 = vrot.slane %v2623_v21, %v11649_v32  ;;  %v2600_v19 = vrot.slane %v1673_v8, %v11649_v32  ;;  %v2624_v1 = vcombine.high %v2622_v27, %v2622_v27  ;;  %5526 = vbcast.lane.b32.xlu1 %v5520_v10, 264  ;;  %v2638_v12 = vrot.slane %v2622_v27, %v11649_v32 }
 0x1ef   : > { %v5565_v21 = vrot.slane %v12279_v44, %v12273_v45 }
 0x1f0   : > { %v2607_v36 = vrot.slane %v2600_v19, %v11649_v32  ;;  %v3612_v61 = vcombine.low %v12243_v15, %v12238_v17  ;;  %v1459_v3 = vpop.permute.xlu1 %1458  ;;  %v2652_v39 = vrot.slane %v2624_v1, %v11649_v32  ;;  %v9955_v38 = vcombine.high %v12243_v15, %v12238_v17 }
 0x1f1   : > { %v1606_v29 = vsel %vm1544_vm6, %v11911_v55, %v1459_v3  ;;  %5571 = vbcast.lane.b32.xlu0 %v5565_v21, 264  ;;  %v12303_v1 = vrot.slane %v12279_v44, %v12169_v28 }
 0x1f2   : > { %v3611_v49 = vcombine.low %v2593_v26, %v2607_v36  ;;  %v3640_v6 = vrot.slane %v3612_v61, %v11649_v32  ;;  %5537 = vbcast.lane.b32.xlu1 %v5535_v5, 256  ;;  %v3659_v51 = vcombine.low %v2638_v12, %v2652_v39  ;;  %v9956_v24 = vcombine.high %v2638_v12, %v2652_v39 }
 0x1f3   : > { %v3668_v27 = vrot.slane %v9955_v38, %v11649_v32  ;;  %v12313_v12 = vrot.slane %v12166_v9, %v12273_v45 }
 0x1f4   : > { %v3633_v16 = vrot.slane %v3611_v49, %v11649_v32  ;;  %v3675_v20 = vrot.slane %v3659_v51, %v11649_v32  ;;  %v3682_v49 = vrot.slane %v9956_v24, %v11649_v32 }
 0x1f5   : > { %5582 = vbcast.lane.b32.xlu0 %v12303_v1, 256 }
 0x1f6   : > { %v3642_v23 = vcombine.low %v3633_v16, %v3640_v6  ;;  %5545 = vbcast.lane.b32.xlu1 %v5535_v5, 272  ;;  %v3690_v5 = vcombine.low %v3668_v27, %v3675_v20 }
 0x1f8   : > { %v1533_v42 = vpop.permute.xlu1 %1532  ;;  %v3656_v56 = vrot.slane %v3642_v23, %v11649_v32 }
 0x1f9   : > { %v1679_v7 = vsel %vm1617_vm7, %v1606_v29, %v1533_v42  ;;  %5447 = vbcast.lane.b32.xlu0 %v12313_v12, 256 }
 0x1fa   : > { %v2671_v48 = vcombine.high %v1679_v7, %v1679_v7  ;;  %v2678_v37 = vrot.slane %v1679_v7, %v11649_v32  ;;  %v3657_v55 = vcombine.low %v3649_v50, %v3656_v56  ;;  %5556 = vbcast.lane.b32.xlu1 %v5550_v41, 264 }
 0x1fb   : > { %v1531_v2 = vpop.permute.xlu0 %1530 }
 0x1fc   : > { %v1677_v35 = vsel %vm1617_vm7, %v1604_v11, %v1531_v2  ;;  %v2685_v10 = vrot.slane %v2671_v48, %v11649_v32  ;;  %v2686_v0 = vcombine.high %v2678_v37, %v2678_v37  ;;  %v2694_v47 = vrot.slane %v2678_v37, %v11649_v32  ;;  %10198 = vmatmul.mubr.msk.bf16.gmra.mrb[60].mxu0 %vm3890_vm8, %v3657_v55  ;;  %v1535_v60 = vpop.permute.xlu1 %1534 }
 0x1fd   : > { %v2663_v14 = vrot.slane %v1677_v35, %v11649_v32  ;;  %10201 = vmatprep.mubr.msk.bf16.mxu0 %vm10904_vm5, %v14735_v62  ;;  %v3698_v55 = vrot.slane %v3690_v5, %v11649_v32  ;;  %5590 = vbcast.lane.b32.xlu0 %v12303_v1, 272 }
 0x1fe   : > { %v2687_v40 = vcombine.high %v2685_v10, %v2685_v10  ;;  %v2701_v59 = vrot.slane %v2685_v10, %v11649_v32  ;;  %v2708_v8 = vrot.slane %v2686_v0, %v11649_v32  ;;  %v2716_v26 = vcombine.high %v2694_v47, %v2694_v47  ;;  %5567 = vbcast.lane.b32.xlu1 %v5565_v21, 256 }
 0x1ff   : > { %v1461_v52 = vpop.permute.xlu0 %1460  ;;  %v2670_v17 = vrot.slane %v2663_v14, %v11649_v32 }
 0x200   : > { %v1608_v19 = vsel %vm1544_vm6, %v11981_v13, %v1461_v52  ;;  %v2715_v15 = vrot.slane %v2687_v40, %v11649_v32  ;;  %v2718_v36 = vcombine.high %v2708_v8, %v2708_v8  ;;  %v1537_v63 = vpop.permute.xlu1 %1536  ;;  %v2717_v6 = vcombine.high %v2701_v59, %v2701_v59 }
 0x201   : > { %v3661_v30 = vcombine.low %v2670_v17, %v2694_v47  ;;  %v1681_v61 = vsel %vm1617_vm7, %v1608_v19, %v1535_v60  ;;  %v3707_v39 = vcombine.low %v2708_v8, %v2716_v26 }
 0x202   : > { %v3708_v16 = vcombine.low %v2718_v36, %v2701_v59  ;;  %v2726_v31 = vrot.slane %v1681_v61, %v11649_v32  ;;  %v2719_v23 = vcombine.high %v2715_v15, %v2715_v15  ;;  %v3709_v7 = vcombine.low %v2715_v15, %v2717_v6  ;;  %5575 = vbcast.lane.b32.xlu1 %v5565_v21, 272 }
 0x203   : > { %v1463_v13 = vpop.permute.xlu0 %1462  ;;  %v3689_v3 = vrot.slane %v3661_v30, %v11649_v32  ;;  %v3717_v35 = vrot.slane %v3707_v39, %v11649_v32 }
 0x204   : > { %v1610_v41 = vsel %vm1544_vm6, %v11968_v43, %v1463_v13  ;;  %v2733_v42 = vrot.slane %v2726_v31, %v11649_v32  ;;  %v1541_v11 = vpop.permute.xlu1 %1540  ;;  %v3724_v43 = vrot.slane %v3708_v16, %v11649_v32 }
 0x205   : > { %v1683_v58 = vsel %vm1617_vm7, %v1610_v41, %v1537_v63  ;;  %v3691_v29 = vcombine.low %v3682_v49, %v3689_v3 }
 0x206   : > { %v2734_v50 = vcombine.high %v1683_v58, %v1683_v58  ;;  %v2741_v56 = vrot.slane %v1683_v58, %v11649_v32  ;;  %v3710_v51 = vcombine.low %v2719_v23, %v2733_v42  ;;  %5586 = vbcast.lane.b32.xlu1 %v12303_v1, 264  ;;  %v3739_v8 = vcombine.low %v3717_v35, %v3724_v43  ;;  %v12355_v23 = vld [vmem:[%s14672_s4] ss:$0 sm:$0xff] }
 0x207   : > { %v1467_v2 = vpop.permute.xlu0 %1466  ;;  %v3705_v38 = vrot.slane %v3691_v29, %v11649_v32 }
 0x208   : > { %v2748_v48 = vrot.slane %v2734_v50, %v11649_v32  ;;  %v2749_v37 = vcombine.high %v2741_v56, %v2741_v56  ;;  %v1614_v9 = vsel %vm1544_vm6, %v12027_v54, %v1467_v2  ;;  %v3738_v10 = vrot.slane %v3710_v51, %v11649_v32  ;;  %v1539_v59 = vpop.permute.xlu1 %1538 }
 0x209   : > { %v2757_v14 = vrot.slane %v2741_v56, %v11649_v32  ;;  %v1687_v60 = vsel %vm1617_vm7, %v1614_v9, %v1541_v11  ;;  %v3706_v24 = vcombine.low %v3698_v55, %v3705_v38  ;;  %v3731_v54 = vrot.slane %v3709_v7, %v11649_v32 }
 0x20a   : > { %v2750_v0 = vcombine.high %v2748_v48, %v2748_v48  ;;  %v2771_v47 = vrot.slane %v2749_v37, %v11649_v32  ;;  %v2764_v21 = vrot.slane %v2748_v48, %v11649_v32  ;;  %v2797_v17 = vcombine.high %v1687_v60, %v1687_v60  ;;  %5451 = vbcast.lane.b32.xlu1 %v12313_v12, 264 }
 0x20b   : > { %v1465_v40 = vpop.permute.xlu0 %1464  ;;  %v2804_v19 = vrot.slane %v1687_v60, %v11649_v32  ;;  %10202 = vmatmul.mubr.msk.bf16.gmra.mrb[64].mxu0 %vm3890_vm8, %v3706_v24  ;;  %v3740_v15 = vcombine.low %v3731_v54, %v3738_v10  ;;  %v3747_v16 = vrot.slane %v3739_v8, %v11649_v32 }
 0x20c   : > { %v2778_v20 = vrot.slane %v2750_v0, %v11649_v32  ;;  %v3756_v52 = vcombine.low %v2757_v14, %v2771_v47  ;;  %v1612_v27 = vsel %vm1544_vm6, %v12038_v22, %v1465_v40  ;;  %v9957_v26 = vcombine.high %v2757_v14, %v2771_v47  ;;  %10205 = vmatprep.mubr.msk.bf16.mxu0 %vm10904_vm5, %v14735_v62 }
 0x20d   : > { %v2811_v30 = vrot.slane %v2797_v17, %v11649_v32  ;;  %v2812_v61 = vcombine.high %v2804_v19, %v2804_v19  ;;  %v2820_v49 = vrot.slane %v2804_v19, %v11649_v32  ;;  %v1685_v5 = vsel %vm1617_vm7, %v1612_v27, %v1539_v59 }
 0x20e   : > { %v3758_v36 = vcombine.low %v2764_v21, %v2778_v20  ;;  %v9958_v63 = vcombine.high %v2764_v21, %v2778_v20  ;;  %v2789_v13 = vrot.slane %v1685_v5, %v11649_v32  ;;  %v3766_v3 = vrot.slane %v3756_v52, %v11649_v32  ;;  %5455 = vbcast.lane.b32.xlu1 %v12313_v12, 272 }
 0x20f   : > { %v2813_v31 = vcombine.high %v2811_v30, %v2811_v30  ;;  %v2827_v41 = vrot.slane %v2811_v30, %v11649_v32  ;;  %v2834_v39 = vrot.slane %v2812_v61, %v11649_v32  ;;  %v3773_v58 = vrot.slane %v9957_v26, %v11649_v32 }
 0x210   : > { %v3780_v6 = vrot.slane %v3758_v36, %v11649_v32  ;;  %v3787_v22 = vrot.slane %v9958_v63, %v11649_v32  ;;  %v2842_v29 = vcombine.high %v2820_v49, %v2820_v49  ;;  %v2796_v42 = vrot.slane %v2789_v13, %v11649_v32 }
 0x211   : > { %v3992_v50 = vpop.f32.mrb[0].mxu0  ;;  %v3754_v1 = vrot.slane %v3740_v15, %v11649_v32  ;;  %v12361_v56 = vrot.slane %v2813_v31, %v11649_v32  ;;  %v2843_v11 = vcombine.high %v2827_v41, %v2827_v41  ;;  %v2844_v7 = vcombine.high %v2834_v39, %v2834_v39 }
 0x212   : > { %v10139_v43 = vpop.f32.mrb[1].mxu0  ;;  %v3805_v51 = vcombine.low %v2796_v42, %v2820_v49  ;;  %v3993_v48 = vadd.f32 %v12355_v23, %v3992_v50  ;;  %v3789_v9 = vcombine.low %v3780_v6, %v3787_v22  ;;  %v3788_v0 = vcombine.low %v3766_v3, %v3773_v58 }
 0x213   : > { %v3995_v37 = vpop.f32.mrb[2].mxu0  ;;  %v3755_v2 = vcombine.low %v3747_v16, %v3754_v1  ;;  %v3807_v55 = vcombine.low %v2844_v7, %v2827_v41  ;;  %v3808_v38 = vcombine.low %v12361_v56, %v2843_v11  ;;  %v3806_v47 = vcombine.low %v2834_v39, %v2842_v29 }
 0x214   : > { %v3996_v35 = vadd.f32 %v12355_v23, %v3995_v37  ;;  %v10140_v10 = vpop.f32.mrb[3].mxu0  ;;  %v4158_v14 = vmax.f32 %v3993_v48, 0.0  ;;  %v3815_v54 = vrot.slane %v3805_v51, %v11649_v32  ;;  %v3803_v21 = vrot.slane %v3789_v9, %v11649_v32 }
 0x215   : > { %10206 = vmatmul.mubr.msk.bf16.gmra.mrb[68].mxu0 %vm3890_vm8, %v3755_v2  ;;  %v3829_v12 = vrot.slane %v3807_v55, %v11649_v32  ;;  %v3836_v24 = vrot.slane %v3808_v38, %v11649_v32  ;;  %v3822_v40 = vrot.slane %v3806_v47, %v11649_v32  ;;  %v3796_v8 = vrot.slane %v3788_v0, %v11649_v32 }
 0x216   : > { %v4159_v60 = vmax.f32 %v3996_v35, 0.0  ;;  %10209 = vmatprep.mubr.msk.bf16.mxu0 %vm10904_vm5, %v14735_v62 }
 0x217   : > { %v3837_v19 = vcombine.low %v3815_v54, %v3822_v40  ;;  %v3804_v15 = vcombine.low %v3796_v8, %v3803_v21  ;;  %v3838_v26 = vcombine.low %v3829_v12, %v3836_v24 }
 0x218   : > { %v4199_v20 = vpack.c.bf16 %v4159_v60, %v4158_v14 }
 0x219   : > { %v4000_v59 = vpop.f32.mrb[4].mxu0  ;;  %v3845_v49 = vrot.slane %v3837_v19, %v11649_v32  ;;  %v3852_v5 = vrot.slane %v3838_v26, %v11649_v32  ;;  %v1469_v19 = vpop.permute.xlu0 %1468 }
 0x21a   : > { %v4001_v52 = vadd.f32 %v12355_v23, %v4000_v59  ;;  %v10143_v17 = vpop.f32.mrb[5].mxu0  ;;  %10226 = vmatmul.mubr.msk.bf16.vlgmr.msra.gmra.mrb[0].mxu1 %vm4243_vm9, %v4199_v20 }
 0x21b   : > { %v4003_v27 = vpop.f32.mrb[6].mxu0  ;;  %10229 = vmatprep.mubr.msk.bf16.mxu1 %vm10904_vm5, %v14735_v62  ;;  %v3853_v13 = vcombine.low %v3845_v49, %v3852_v5 }
 0x21c   : > { %v4004_v36 = vadd.f32 %v12355_v23, %v4003_v27  ;;  %v10144_v63 = vpop.f32.mrb[7].mxu0  ;;  %v4160_v30 = vmax.f32 %v4001_v52, 0.0 }
 0x21d   : > { %10210 = vmatmul.mubr.msk.bf16.gmra.mrb[72].mxu0 %vm3890_vm8, %v3804_v15 }
 0x21e   : > { %v4161_v61 = vmax.f32 %v4004_v36, 0.0  ;;  %10213 = vmatprep.mubr.msk.bf16.mxu0 %vm10904_vm5, %v14735_v62 }
 0x220   : > { %v4200_v6 = vpack.c.bf16 %v4161_v61, %v4160_v30  ;;  %v1616_v30 = vsel %vm1544_vm6, %v12031_v4, %v1469_v19 }
 0x222   : > { %10230 = vmatmul.mubr.msk.bf16.gmra.mrb[4].mxu1 %vm4243_vm9, %v4200_v6 }
 0x223   : > { %v4008_v22 = vpop.f32.mrb[8].mxu0  ;;  %10233 = vmatprep.mubr.msk.bf16.mxu1 %vm10904_vm5, %v14735_v62 }
 0x224   : > { %v4009_v16 = vadd.f32 %v12355_v23, %v4008_v22  ;;  %v10147_v3 = vpop.f32.mrb[9].mxu0 }
 0x225   : > { %v4011_v31 = vpop.f32.mrb[10].mxu0  ;;  %10214 = vmatmul.mubr.msk.bf16.gmra.mrb[76].mxu0 %vm3890_vm8, %v3853_v13 }
 0x226   : > { %v4012_v41 = vadd.f32 %v12355_v23, %v4011_v31  ;;  %v10148_v39 = vpop.f32.mrb[11].mxu0  ;;  %10217 = vmatprep.mubr.msk.bf16.mxu0 %vm10904_vm5, %v14735_v62  ;;  %v4162_v58 = vmax.f32 %v4009_v16, 0.0  ;;  %v2845_v16 = vcombine.high %v12361_v56, %v12361_v56 }
 0x228   : > { %v4163_v29 = vmax.f32 %v4012_v41, 0.0 }
 0x22a   : > { %v4201_v42 = vpack.c.bf16 %v4163_v29, %v4162_v58 }
 0x22b   : > { %v4016_v50 = vpop.f32.mrb[12].mxu0 }
 0x22c   : > { %v4017_v1 = vadd.f32 %v12355_v23, %v4016_v50  ;;  %v10151_v11 = vpop.f32.mrb[13].mxu0  ;;  %10234 = vmatmul.mubr.msk.bf16.gmra.mrb[8].mxu1 %vm4243_vm9, %v4201_v42 }
 0x22d   : > { %v4019_v7 = vpop.f32.mrb[14].mxu0  ;;  %10237 = vmatprep.mubr.msk.bf16.mxu1 %vm10904_vm5, %v14735_v62 }
 0x22e   : > { %v4020_v43 = vadd.f32 %v12355_v23, %v4019_v7  ;;  %v10152_v51 = vpop.f32.mrb[15].mxu0  ;;  %v4164_v48 = vmax.f32 %v4017_v1, 0.0 }
 0x230   : > { %v4165_v37 = vmax.f32 %v4020_v43, 0.0 }
 0x232   : > { %v4202_v2 = vpack.c.bf16 %v4165_v37, %v4164_v48 }
 0x233   : > { %v4024_v9 = vpop.f32.mrb[16].mxu0 }
 0x234   : > { %v4025_v55 = vadd.f32 %v12355_v23, %v4024_v9  ;;  %v10155_v38 = vpop.f32.mrb[17].mxu0  ;;  %10238 = vmatmul.mubr.msk.bf16.gmra.mrb[12].mxu1 %vm4243_vm9, %v4202_v2 }
 0x235   : > { %v4027_v35 = vpop.f32.mrb[18].mxu0  ;;  %10241 = vmatprep.mubr.msk.bf16.mxu1 %vm10904_vm5, %v14735_v62 }
 0x236   : > { %v4028_v10 = vadd.f32 %v12355_v23, %v4027_v35  ;;  %v10156_v0 = vpop.f32.mrb[19].mxu0  ;;  %v4166_v47 = vmax.f32 %v4025_v55, 0.0 }
 0x238   : > { %v4167_v14 = vmax.f32 %v4028_v10, 0.0 }
 0x23a   : > { %v4203_v60 = vpack.c.bf16 %v4167_v14, %v4166_v47 }
 0x23b   : > { %v4032_v12 = vpop.f32.mrb[20].mxu0 }
 0x23c   : > { %v4033_v24 = vadd.f32 %v12355_v23, %v4032_v12  ;;  %v10159_v54 = vpop.f32.mrb[21].mxu0  ;;  %10242 = vmatmul.mubr.msk.bf16.gmra.mrb[16].mxu1 %vm4243_vm9, %v4203_v60 }
 0x23d   : > { %v4035_v21 = vpop.f32.mrb[22].mxu0  ;;  %10245 = vmatprep.mubr.msk.bf16.mxu1 %vm10904_vm5, %v14735_v62 }
 0x23e   : > { %v4036_v20 = vadd.f32 %v12355_v23, %v4035_v21  ;;  %v10160_v40 = vpop.f32.mrb[23].mxu0  ;;  %v4168_v59 = vmax.f32 %v4033_v24, 0.0 }
 0x240   : > { %v4169_v8 = vmax.f32 %v4036_v20, 0.0 }
 0x242   : > { %v4204_v52 = vpack.c.bf16 %v4169_v8, %v4168_v59 }
 0x243   : > { %v4040_v17 = vpop.f32.mrb[24].mxu0 }
 0x244   : > { %10246 = vmatmul.mubr.msk.bf16.gmra.mrb[20].mxu1 %vm4243_vm9, %v4204_v52  ;;  %v4041_v27 = vadd.f32 %v12355_v23, %v4040_v17  ;;  %v10163_v15 = vpop.f32.mrb[25].mxu0  ;;  %v1543_v61 = vpop.permute.xlu1 %1542 }
 0x245   : > { %v4043_v26 = vpop.f32.mrb[26].mxu0  ;;  %10249 = vmatprep.mubr.msk.bf16.mxu1 %vm10904_vm5, %v14735_v62  ;;  %v1689_v5 = vsel %vm1617_vm7, %v1616_v30, %v1543_v61  ;;  %v5595_v15 = vrot.slane %v12279_v44, %v5474_v53 }
 0x246   : > { %v4044_v36 = vadd.f32 %v12355_v23, %v4043_v26  ;;  %v10164_v63 = vpop.f32.mrb[27].mxu0  ;;  %v4170_v49 = vmax.f32 %v4041_v27, 0.0  ;;  %v2852_v22 = vrot.slane %v1689_v5, %v11649_v32 }
 0x247   : > { %5597 = vbcast.lane.b32.xlu0 %v5595_v15, 256  ;;  %5601 = vbcast.lane.b32.xlu1 %v5595_v15, 264 }
 0x248   : > { %v4171_v6 = vmax.f32 %v4044_v36, 0.0  ;;  %v2859_v3 = vrot.slane %v2852_v22, %v11649_v32  ;;  %v5610_v36 = vrot.slane %v12279_v44, %v5489_v25  ;;  %v5640_v25 = vrot.slane %v12279_v44, %v5519_v34 }
 0x24a   : > { %v4205_v13 = vpack.c.bf16 %v4171_v6, %v4170_v49  ;;  %v3854_v31 = vcombine.low %v2845_v16, %v2859_v3  ;;  %v12464_v16 = vpop.permute.xlu0 %5462  ;;  %v12466_v3 = vpop.permute.xlu1 %5466 }
 0x24b   : > { %5612 = vbcast.lane.b32.xlu1 %v5610_v36, 256  ;;  %5605 = vbcast.lane.b32.xlu0 %v5595_v15, 272 }
 0x24c   : > { %10250 = vmatmul.mubr.msk.bf16.gmra.mrb[24].mxu1 %vm4243_vm9, %v4205_v13  ;;  %v3861_v4 = vrot.slane %v3854_v31, %v11649_v32  ;;  %v5625_v13 = vrot.slane %v12279_v44, %v5504_v18 }
 0x24d   : > { %10253 = vmatprep.mubr.msk.bf16.mxu1 %vm10904_vm5, %v14735_v62 }
 0x24e   : > { %v3868_v41 = vrot.slane %v3861_v4, %v11649_v32 }
 0x24f   : > { %5620 = vbcast.lane.b32.xlu1 %v5610_v36, 272  ;;  %5616 = vbcast.lane.b32.xlu0 %v5610_v36, 264  ;;  %v10906_v36 = vmov 269488144  }
 0x250   : > { %10218 = vmatmul.mubr.msk.bf16.gmra.mrb[80].mxu0 %vm3890_vm8, %v3868_v41  ;;  %v12469_v41 = vpop.permute.xlu0 %5477 }
 0x252   : > { %v4048_v39 = vpop.f32.mrb[28].mxu0 }
 0x253   : > { %v4049_v58 = vadd.f32 %v12355_v23, %v4048_v39  ;;  %v10167_v29 = vpop.f32.mrb[29].mxu0  ;;  %5627 = vbcast.lane.b32.xlu1 %v5625_v13, 256  ;;  %5631 = vbcast.lane.b32.xlu0 %v5625_v13, 264 }
 0x254   : > { %v4051_v42 = vpop.f32.mrb[30].mxu0 }
 0x255   : > { %v4052_v56 = vadd.f32 %v12355_v23, %v4051_v42  ;;  %v10168_v50 = vpop.f32.mrb[31].mxu0  ;;  %v4172_v1 = vmax.f32 %v4049_v58, 0.0  ;;  %v12471_v58 = vpop.permute.xlu1 %5481 }
 0x257   : > { %v4173_v11 = vmax.f32 %v4052_v56, 0.0  ;;  %5646 = vbcast.lane.b32.xlu1 %v5640_v25, 264  ;;  %5635 = vbcast.lane.b32.xlu0 %v5625_v13, 272 }
 0x259   : > { %v4206_v7 = vpack.c.bf16 %v4173_v11, %v4172_v1  ;;  %v12474_v1 = vpop.permute.xlu0 %5470  ;;  %v12476_v11 = vpop.permute.xlu1 %5485 }
 0x25b   : > { %10254 = vmatmul.mubr.msk.bf16.gmra.mrb[28].mxu1 %vm4243_vm9, %v4206_v7  ;;  %5650 = vbcast.lane.b32.xlu1 %v5640_v25, 272 }
 0x25c   : > { %10257 = vmatprep.mubr.msk.bf16.mxu1 %vm10904_vm5, %v14735_v62  ;;  %5642 = vbcast.lane.b32.xlu0 %v5640_v25, 256 }
 0x25d   : > { %v12481_v7 = vpop.permute.xlu0 %5492 }
 0x260   : > { %v4056_v43 = vpop.f32.mrb[32].mxu0 }
 0x261   : > { %v4057_v32 = vadd.f32 %v12355_v23, %v4056_v43  ;;  %v10171_v51 = vpop.f32.mrb[33].mxu0  ;;  %v12483_v43 = vpop.permute.xlu1 %5496 }
 0x262   : > { %v4059_v48 = vpop.f32.mrb[34].mxu0 }
 0x263   : > { %v4060_v37 = vadd.f32 %v12355_v23, %v4059_v48  ;;  %v10172_v2 = vpop.f32.mrb[35].mxu0  ;;  %v4174_v9 = vmax.f32 %v4057_v32, 0.0  ;;  %v12485_v32 = vpop.permute.xlu0 %5500 }
 0x265   : > { %v4175_v55 = vmax.f32 %v4060_v37, 0.0  ;;  %v12487_v51 = vpop.permute.xlu1 %5507 }
 0x267   : > { %v4207_v38 = vpack.c.bf16 %v4175_v55, %v4174_v9 }
 0x268   : > { %v4064_v35 = vpop.f32.mrb[36].mxu0 }
 0x269   : > { %v4065_v10 = vadd.f32 %v12355_v23, %v4064_v35  ;;  %v10175_v0 = vpop.f32.mrb[37].mxu0  ;;  %10258 = vmatmul.mubr.msk.bf16.gmra.mrb[32].mxu1 %vm4243_vm9, %v4207_v38  ;;  %v12491_v35 = vpop.permute.xlu0 %5511 }
 0x26a   : > { %v4067_v47 = vpop.f32.mrb[38].mxu0  ;;  %10261 = vmatprep.mubr.msk.bf16.mxu1 %vm10904_vm5, %v14735_v62 }
 0x26b   : > { %v4068_v14 = vadd.f32 %v12355_v23, %v4067_v47  ;;  %v10176_v60 = vpop.f32.mrb[39].mxu0  ;;  %v4176_v12 = vmax.f32 %v4065_v10, 0.0  ;;  %v12493_v47 = vpop.permute.xlu1 %5515 }
 0x26d   : > { %v4177_v24 = vmax.f32 %v4068_v14, 0.0  ;;  %v12498_v60 = vpop.permute.xlu0 %5522 }
 0x26f   : > { %v4208_v54 = vpack.c.bf16 %v4177_v24, %v4176_v12  ;;  %v12500_v12 = vpop.permute.xlu1 %5526 }
 0x271   : > { %10262 = vmatmul.mubr.msk.bf16.gmra.mrb[36].mxu1 %vm4243_vm9, %v4208_v54 }
 0x272   : > { %10265 = vmatprep.mubr.msk.bf16.mxu1 %vm10904_vm5, %v14735_v62 }
 0x27a   : > { %v4072_v21 = vpop.f32.mrb[40].mxu0 }
 0x27b   : > { %v4073_v20 = vadd.f32 %v12355_v23, %v4072_v21  ;;  %v10179_v40 = vpop.f32.mrb[41].mxu0 }
 0x27c   : > { %v4075_v59 = vpop.f32.mrb[42].mxu0  ;;  %v12503_v40 = vpop.permute.xlu0 %5530 }
 0x27d   : > { %v4076_v8 = vadd.f32 %v12355_v23, %v4075_v59  ;;  %v10180_v52 = vpop.f32.mrb[43].mxu0  ;;  %v4178_v17 = vmax.f32 %v4073_v20, 0.0 }
 0x27e   : > { %v12506_v52 = vpop.permute.xlu1 %5537 }
 0x27f   : > { %v4179_v19 = vmax.f32 %v4076_v8, 0.0 }
 0x280   : > { %v12508_v15 = vpop.permute.xlu0 %5541 }
 0x281   : > { %v4209_v27 = vpack.c.bf16 %v4179_v19, %v4178_v17 }
 0x283   : > { %10266 = vmatmul.mubr.msk.bf16.gmra.mrb[40].mxu1 %vm4243_vm9, %v4209_v27 }
 0x284   : > { %10269 = vmatprep.mubr.msk.bf16.mxu1 %vm10904_vm5, %v14735_v62 }
 0x286   : > { %v4080_v26 = vpop.f32.mrb[44].mxu0 }
 0x287   : > { %v4081_v63 = vadd.f32 %v12355_v23, %v4080_v26  ;;  %v10183_v30 = vpop.f32.mrb[45].mxu0  ;;  %v12511_v26 = vpop.permute.xlu1 %5545 }
 0x288   : > { %v4083_v61 = vpop.f32.mrb[46].mxu0 }
 0x289   : > { %v4084_v49 = vadd.f32 %v12355_v23, %v4083_v61  ;;  %v10184_v5 = vpop.f32.mrb[47].mxu0  ;;  %v4180_v53 = vmax.f32 %v4081_v63, 0.0  ;;  %v5767_v63 = vunpack.c.l.s4 %v10906_v36  ;;  %v12515_v61 = vpop.permute.xlu0 %5552 }
 0x28b   : > { %v4181_v6 = vmax.f32 %v4084_v49, 0.0  ;;  %v10907_v49 = vmov 842150450   ;;  %v12518_v25 = vpop.permute.xlu1 %5556 }
 0x28c   : > { %v5774_v5 = vunpack.c.l.s4 %v10907_v49  ;;  %14744 = vst [vmem:[#allocation3_spill] sm:$0xff] %v12518_v25 }
 0x28d   : > { %v4210_v22 = vpack.c.bf16 %v4181_v6, %v4180_v53  ;;  %v10908_v53 = vmov 1414812756  }
 0x28e   : > { %v5781_v6 = vunpack.c.l.s4 %v10908_v53 }
 0x28f   : > { %10270 = vmatmul.mubr.msk.bf16.gmra.mrb[44].mxu1 %vm4243_vm9, %v4210_v22 }
 0x290   : > { %10273 = vmatprep.mubr.msk.bf16.mxu1 %vm10904_vm5, %v14735_v62 }
 0x29f   : > { %v4088_v18 = vpop.f32.mrb[48].mxu0 }
 0x2a0   : > { %v4089_v31 = vadd.f32 %v12355_v23, %v4088_v18  ;;  %v10187_v4 = vpop.f32.mrb[49].mxu0  ;;  %v10909_v18 = vmov 1987475062  }
 0x2a1   : > { %v4091_v39 = vpop.f32.mrb[50].mxu0 }
 0x2a2   : > { %v4092_v29 = vadd.f32 %v12355_v23, %v4091_v39  ;;  %v10188_v34 = vpop.f32.mrb[51].mxu0  ;;  %v4182_v42 = vmax.f32 %v4089_v31, 0.0  ;;  %v5788_v31 = vunpack.c.l.s4 %v10909_v18 }
 0x2a3   : > { %v5768_v34 = vunpack.c.0.s8 %v5767_v63 }
 0x2a4   : > { %v4183_v56 = vmax.f32 %v4092_v29, 0.0 }
 0x2a6   : > { %v4211_v50 = vpack.c.bf16 %v4183_v56, %v4182_v42  ;;  %v5775_v42 = vunpack.c.0.s8 %v5774_v5  ;;  %v5782_v56 = vunpack.c.0.s8 %v5781_v6 }
 0x2a8   : > { %10274 = vmatmul.mubr.msk.bf16.gmra.mrb[48].mxu1 %vm4243_vm9, %v4211_v50 }
 0x2a9   : > { %10277 = vmatprep.mubr.msk.bf16.mxu1 %vm10904_vm5, %v14735_v62 }
 0x2af   : > { %v4096_v48 = vpop.f32.mrb[52].mxu0 }
 0x2b0   : > { %v4097_v37 = vadd.f32 %v12355_v23, %v4096_v48  ;;  %v10191_v2 = vpop.f32.mrb[53].mxu0 }
 0x2b1   : > { %v4099_v9 = vpop.f32.mrb[54].mxu0  ;;  %v12521_v2 = vpop.permute.xlu0 %5560 }
 0x2b2   : > { %v4100_v55 = vadd.f32 %v12355_v23, %v4099_v9  ;;  %v10192_v38 = vpop.f32.mrb[55].mxu0  ;;  %v4184_v10 = vmax.f32 %v4097_v37, 0.0  ;;  %v5789_v37 = vunpack.c.0.s8 %v5788_v31  ;;  %14745 = vst [vmem:[#allocation4_spill] sm:$0xff] %v12521_v2  ;;  %v10910_v31 = vmov 1983009808  }
 0x2b3   : > { %v12526_v38 = vsub.s32 %v5768_v34, %v14743_v46  ;;  %v4591_v34 = vunpack.c.l.s4 %v10910_v31 }
 0x2b4   : > { %v4185_v0 = vmax.f32 %v4100_v55, 0.0  ;;  %v12523_v55 = vpop.permute.xlu1 %5567 }
 0x2b5   : > { %14746 = vst [vmem:[#allocation2_spill] sm:$0xff] %v12523_v55 }
 0x2b6   : > { %v4212_v14 = vpack.c.bf16 %v4185_v0, %v4184_v10  ;;  %v12529_v10 = vsub.s32 %v5775_v42, %v14743_v46  ;;  %v12532_v0 = vsub.s32 %v5782_v56, %v14743_v46 }
 0x2b8   : > { %10278 = vmatmul.mubr.msk.bf16.gmra.mrb[52].mxu1 %vm4243_vm9, %v4212_v14  ;;  %v12536_v14 = vsub.s32 %v5789_v37, %v14743_v46  ;;  %v12566_v5 = vpop.permute.xlu1 %5575 }
 0x2b9   : > { %10281 = vmatprep.mubr.msk.bf16.mxu1 %vm10904_vm5, %v14735_v62  ;;  %14748 = vst [vmem:[#allocation7_spill] sm:$0xff] %v12566_v5 }
 0x2bf   : > { %v4104_v24 = vpop.f32.mrb[56].mxu0 }
 0x2c0   : > { %v4105_v54 = vadd.f32 %v12355_v23, %v4104_v24  ;;  %v10195_v21 = vpop.f32.mrb[57].mxu0 }
 0x2c1   : > { %v4107_v20 = vpop.f32.mrb[58].mxu0 }
 0x2c2   : > { %v4108_v59 = vadd.f32 %v12355_v23, %v4107_v20  ;;  %v10196_v8 = vpop.f32.mrb[59].mxu0  ;;  %v4186_v17 = vmax.f32 %v4105_v54, 0.0 }
 0x2c4   : > { %v4187_v19 = vmax.f32 %v4108_v59, 0.0 }
 0x2c6   : > { %v4213_v27 = vpack.c.bf16 %v4187_v19, %v4186_v17 }
 0x2c8   : > { %10282 = vmatmul.mubr.msk.bf16.gmra.mrb[56].mxu1 %vm4243_vm9, %v4213_v27  ;;  %v12556_v27 = vpop.permute.xlu0 %5571 }
 0x2c9   : > { %10285 = vmatprep.mubr.msk.bf16.mxu1 %vm10904_vm5, %v14735_v62  ;;  %14747 = vst [vmem:[#allocation6_spill] sm:$0xff] %v12556_v27 }
 0x2cf   : > { %v4112_v30 = vpop.f32.mrb[60].mxu0 }
 0x2d0   : > { %v4113_v22 = vadd.f32 %v12355_v23, %v4112_v30  ;;  %v10199_v13 = vpop.f32.mrb[61].mxu0 }
 0x2d1   : > { %v4115_v4 = vpop.f32.mrb[62].mxu0  ;;  %v12612_v13 = vpop.permute.xlu1 %5586 }
 0x2d2   : > { %v4116_v39 = vadd.f32 %v12355_v23, %v4115_v4  ;;  %v10200_v29 = vpop.f32.mrb[63].mxu0  ;;  %v4188_v50 = vmax.f32 %v4113_v22, 0.0  ;;  %14750 = vst [vmem:[#allocation8_spill] sm:$0xff] %v12612_v13 }
 0x2d4   : > { %v4189_v48 = vmax.f32 %v4116_v39, 0.0 }
 0x2d5   : > { %v12657_v22 = vpop.permute.xlu1 %5451 }
 0x2d6   : > { %v4214_v9 = vpack.c.bf16 %v4189_v48, %v4188_v50  ;;  %v12605_v48 = vpop.permute.xlu0 %5582 }
 0x2d7   : > { %14749 = vst [vmem:[#allocation5_spill] sm:$0xff] %v12605_v48 }
 0x2d8   : > { %10286 = vmatmul.mubr.msk.bf16.gmra.mrb[60].mxu1 %vm4243_vm9, %v4214_v9 }
 0x2d9   : > { %10289 = vmatprep.mubr.msk.bf16.mxu1 %vm10904_vm5, %v14735_v62  ;;  %v12697_v18 = vpop.permute.xlu1 %5455 }
 0x2da   : > { %v12646_v6 = vpop.permute.xlu0 %5447 }
 0x2db   : > { %v5779_v37 = vrot.slane %v12646_v6, %v12529_v10  ;;  %v5793_v63 = vrot.slane %v12646_v6, %v12536_v14 }
 0x2de   : > { %v4120_v56 = vpop.f32.mrb[64].mxu0 }
 0x2df   : > { %v4121_v9 = vadd.f32 %v12355_v23, %v4120_v56  ;;  %v10203_v39 = vpop.f32.mrb[65].mxu0 }
 0x2e0   : > { %v4123_v4 = vpop.f32.mrb[66].mxu0 }
 0x2e1   : > { %v4124_v56 = vadd.f32 %v12355_v23, %v4123_v4  ;;  %v10204_v29 = vpop.f32.mrb[67].mxu0  ;;  %v5800_v4 = vrot.slane %v12657_v22, %v12526_v38 }
 0x2e2   : > { %v4190_v29 = vmax.f32 %v4121_v9, 0.0 }
 0x2e3   : > { %v4191_v39 = vmax.f32 %v4124_v56, 0.0  ;;  %v4592_v56 = vunpack.c.0.s8 %v4591_v34 }
 0x2e5   : > { %v4215_v9 = vpack.c.bf16 %v4191_v39, %v4190_v29  ;;  %v12669_v29 = vsub.s32 %v4592_v56, %v14743_v46  ;;  %v12683_v56 = vld [vmem:[%s14674_s6] ss:$0 sm:$0xff] }
 0x2e7   : > { %10290 = vmatmul.mubr.msk.bf16.gmra.mrb[64].mxu1 %vm4243_vm9, %v4215_v9 }
 0x2e8   : > { %v4128_v31 = vpop.f32.mrb[68].mxu0  ;;  %10293 = vmatprep.mubr.msk.bf16.mxu1 %vm10904_vm5, %v14735_v62 }
 0x2e9   : > { %v4129_v50 = vadd.f32 %v12355_v23, %v4128_v31  ;;  %v10207_v34 = vpop.f32.mrb[69].mxu0 }
 0x2ea   : > { %v4131_v39 = vpop.f32.mrb[70].mxu0 }
 0x2eb   : > { %v4132_v9 = vadd.f32 %v12355_v23, %v4131_v39  ;;  %v10208_v34 = vpop.f32.mrb[71].mxu0  ;;  %v4192_v53 = vmax.f32 %v4129_v50, 0.0 }
 0x2ed   : > { %v4193_v30 = vmax.f32 %v4132_v9, 0.0  ;;  %v4341_v17 = vpop.f32.mrb[0].mxu1 }
 0x2ee   : > { %v4342_v19 = vadd.f32 %v12683_v56, %v4341_v17  ;;  %v10227_v39 = vpop.f32.mrb[1].mxu1 }
 0x2ef   : > { %v4216_v9 = vpack.c.bf16 %v4193_v30, %v4192_v53  ;;  %v4344_v49 = vpop.f32.mrb[2].mxu1 }
 0x2f0   : > { %v4507_v39 = vmax.f32 %v4342_v19, 0.0  ;;  %v4345_v59 = vadd.f32 %v12683_v56, %v4344_v49  ;;  %v4136_v21 = vpop.f32.mrb[72].mxu0  ;;  %v10228_v54 = vpop.f32.mrb[3].mxu1  ;;  %v12738_v19 = vrot.slane %v12279_v44, %v5534_v57  ;;  %v10871_v57 = vld [vmem:[%s14670_s2 + $0x8] sm:$0xff] }
 0x2f1   : > { %v4137_v53 = vadd.f32 %v12355_v23, %v4136_v21  ;;  %v10211_v36 = vpop.f32.mrb[73].mxu0  ;;  %10294 = vmatmul.mubr.msk.bf16.gmra.mrb[68].mxu1 %vm4243_vm9, %v4216_v9  ;;  %v12751_v44 = vrot.slane %v10871_v57, %v5549_v33 }
 0x2f2   : > { %v4589_v49 = vcombine.high %v4507_v39, %v4507_v39  ;;  %v4596_v24 = vrot.slane %v4507_v39, %v12669_v29  ;;  %v4508_v17 = vmax.f32 %v4345_v59, 0.0  ;;  %v4139_v50 = vpop.f32.mrb[74].mxu0  ;;  %10297 = vmatprep.mubr.msk.bf16.mxu1 %vm10904_vm5, %v14735_v62 }
 0x2f3   : > { %v4140_v36 = vadd.f32 %v12355_v23, %v4139_v50  ;;  %v10212_v9 = vpop.f32.mrb[75].mxu0  ;;  %v4194_v20 = vmax.f32 %v4137_v53, 0.0  ;;  %v5441_v53 = vld [vmem:[%s14670_s2 + $0x10] sm:$0x3] }
 0x2f4   : > { %v4603_v39 = vrot.slane %v4589_v49, %v12669_v29  ;;  %v4604_v8 = vcombine.high %v4596_v24, %v4596_v24  ;;  %v4606_v30 = vcombine.high %v4508_v17, %v4508_v17  ;;  %v4613_v21 = vrot.slane %v4508_v17, %v12669_v29 }
 0x2f5   : > { %v4195_v50 = vmax.f32 %v4140_v36, 0.0  ;;  %v4349_v9 = vpop.f32.mrb[4].mxu1 }
 0x2f6   : > { %v4605_v54 = vcombine.high %v4603_v39, %v4603_v39  ;;  %v4620_v49 = vrot.slane %v4606_v30, %v12669_v29  ;;  %v4621_v34 = vcombine.high %v4613_v21, %v4613_v21  ;;  %v10231_v31 = vpop.f32.mrb[5].mxu1  ;;  %v4350_v46 = vadd.f32 %v12683_v56, %v4349_v9 }
 0x2f7   : > { %v4217_v36 = vpack.c.bf16 %v4195_v50, %v4194_v20  ;;  %v4352_v33 = vpop.f32.mrb[6].mxu1  ;;  %v12769_v31 = vmul.f32 %v5779_v37, %v4604_v8  ;;  %v12773_v17 = vmul.f32 %v5800_v4, %v4613_v21  ;;  %v14754_v9 = vrot.slane %v12646_v6, %v12526_v38 }
 0x2f8   : > { %v12771_v30 = vmul.f32 %v5793_v63, %v4605_v54  ;;  %v10232_v42 = vpop.f32.mrb[7].mxu1  ;;  %v4144_v20 = vpop.f32.mrb[76].mxu0  ;;  %v4509_v5 = vmax.f32 %v4350_v46, 0.0  ;;  %v4353_v59 = vadd.f32 %v12683_v56, %v4352_v33  ;;  %v12783_v8 = vrot.slane %v5441_v53, %v12273_v45 }
 0x2f9   : > { %14751 = vst [vmem:[#allocation9_spill] sm:$0xff] %v12769_v31  ;;  %14753 = vst [vmem:[#allocation11_spill] sm:$0xff] %v12773_v17  ;;  %v7062_v57 = vmul.f32 %v14754_v9, %v4596_v24  ;;  %v10215_v2 = vpop.f32.mrb[77].mxu0  ;;  %10298 = vmatmul.mubr.msk.bf16.gmra.mrb[72].mxu1 %vm4243_vm9, %v4217_v36  ;;  %v14756_v63 = vrot.slane %v12646_v6, %v12532_v0  ;;  %v14758_v37 = vrot.slane %v12657_v22, %v12529_v10 }
 0x2fa   : > { %14752 = vst [vmem:[#allocation10_spill] sm:$0xff] %v12771_v30  ;;  %14755 = vst [vmem:[#allocation12_spill] sm:$0xff] %v12783_v8  ;;  %v14759_v24 = vrot.slane %v12657_v22, %v12532_v0  ;;  %v4147_v45 = vpop.f32.mrb[78].mxu0  ;;  %10301 = vmatprep.mubr.msk.bf16.mxu1 %vm10904_vm5, %v14735_v62  ;;  %v4623_v6 = vcombine.high %v4509_v5, %v4509_v5  ;;  %v4630_v21 = vrot.slane %v4509_v5, %v12669_v29 }
 0x2fb   : > { %v12788_v42 = vmul.f32 %v14756_v63, %v4603_v39  ;;  %v12793_v4 = vmul.f32 %v14758_v37, %v4621_v34  ;;  %v4510_v39 = vmax.f32 %v4353_v59, 0.0  ;;  %v10216_v36 = vpop.f32.mrb[79].mxu0  ;;  %v4622_v46 = vcombine.high %v4620_v49, %v4620_v49 }
 0x2fc   : > { %v12798_v54 = vmul.f32 %v14759_v24, %v4620_v49  ;;  %v7368_v33 = vcombine.low %v7062_v57, %v12769_v31  ;;  %v12811_v63 = vrot.slane %v5441_v53, %v12169_v28  ;;  %v4637_v37 = vrot.slane %v4623_v6, %v12669_v29 }
 0x2fd   : > { %14757 = vst [vmem:[#allocation13_spill] sm:$0xff] %v12788_v42  ;;  %v4638_v24 = vcombine.high %v4630_v21, %v4630_v21  ;;  %v4640_v2 = vcombine.high %v4510_v39, %v4510_v39  ;;  %v4647_v5 = vrot.slane %v4510_v39, %v12669_v29  ;;  %v7369_v59 = vcombine.low %v12788_v42, %v12771_v30 }
 0x2fe   : > { %14760 = vst [vmem:[#allocation14_spill] sm:$0xff] %v12811_v63  ;;  %v8376_v57 = vcombine.low %v12793_v4, %v12798_v54  ;;  %v4639_v28 = vcombine.high %v4637_v37, %v4637_v37  ;;  %v14761_v53 = vrot.slane %v12464_v16, %v12526_v38  ;;  %v14762_v39 = vrot.slane %v12464_v16, %v12529_v10 }
 0x2ff   : > { %v4654_v34 = vrot.slane %v4640_v2, %v12669_v29  ;;  %v4357_v50 = vpop.f32.mrb[8].mxu1  ;;  %v4655_v30 = vcombine.high %v4647_v5, %v4647_v5  ;;  %v4145_v49 = vadd.f32 %v12355_v23, %v4144_v20  ;;  %v14763_v42 = vrot.slane %v12657_v22, %v12536_v14 }
 0x300   : > { %v7071_v6 = vmul.f32 %v14761_v53, %v4638_v24  ;;  %v7072_v9 = vmul.f32 %v14762_v39, %v4637_v37  ;;  %v14764_v36 = vrot.slane %v12697_v18, %v12526_v38  ;;  %v10235_v24 = vpop.f32.mrb[9].mxu1  ;;  %v7376_v53 = vrot.slane %v7368_v33, %v12669_v29 }
 0x301   : > { %v12834_v31 = vmul.f32 %v14763_v42, %v4622_v46  ;;  %v14765_v2 = vrot.slane %v12464_v16, %v12532_v0  ;;  %v14766_v20 = vrot.slane %v12464_v16, %v12536_v14  ;;  %v4360_v22 = vpop.f32.mrb[10].mxu1  ;;  %v7385_v42 = vcombine.low %v12773_v17, %v12793_v4 }
 0x302   : > { %v12839_v13 = vmul.f32 %v14764_v36, %v4630_v21  ;;  %v7402_v39 = vcombine.low %v7071_v6, %v7072_v9  ;;  %v4656_v46 = vcombine.high %v4654_v34, %v4654_v34  ;;  %v14767_v18 = vrot.slane %v12466_v3, %v12526_v38  ;;  %v10236_v36 = vpop.f32.mrb[11].mxu1 }
 0x303   : > { %v7073_v37 = vmul.f32 %v14765_v2, %v4639_v28  ;;  %v7074_v63 = vmul.f32 %v14766_v20, %v4647_v5  ;;  %v7383_v28 = vrot.slane %v7369_v59, %v12669_v29  ;;  %v14768_v16 = vrot.slane %v12466_v3, %v12529_v10 }
 0x304   : > { %v7075_v21 = vmul.f32 %v14767_v18, %v4655_v30  ;;  %v8377_v33 = vcombine.low %v12834_v31, %v12839_v13  ;;  %v4196_v4 = vmax.f32 %v4145_v49, 0.0  ;;  %v12862_v20 = vrot.slane %v8376_v57, %v12669_v29 }
 0x305   : > { %v8393_v6 = vcombine.low %v7072_v9, %v7073_v37  ;;  %v12859_v5 = vmul.f32 %v14768_v16, %v4654_v34  ;;  %v7403_v24 = vcombine.low %v7073_v37, %v7074_v63  ;;  %v7410_v18 = vrot.slane %v7402_v39, %v12669_v29 }
 0x306   : > { %v8394_v2 = vcombine.low %v7074_v63, %v7075_v21  ;;  %14769 = vst [vmem:[#allocation15_spill] sm:$0xff] %v12862_v20  ;;  %v12865_v30 = vrot.slane %v8377_v33, %v12669_v29  ;;  %v4148_v59 = vadd.f32 %v12355_v23, %v4147_v45  ;;  %v14771_v34 = vrot.slane %v12466_v3, %v12532_v0 }
 0x307   : > { %v12869_v36 = vrot.slane %v8393_v6, %v12669_v29  ;;  %v7417_v9 = vrot.slane %v7403_v24, %v12669_v29  ;;  %v4358_v37 = vadd.f32 %v12683_v56, %v4357_v50  ;;  %v7419_v33 = vcombine.low %v7075_v21, %v12859_v5  ;;  %v4365_v23 = vpop.f32.mrb[12].mxu1 }
 0x308   : > { %14770 = vst [vmem:[#allocation16_spill] sm:$0xff] %v12865_v30  ;;  %v7077_v63 = vmul.f32 %v14771_v34, %v4656_v46  ;;  %v12877_v49 = vrot.slane %v8394_v2, %v12669_v29  ;;  %v4197_v6 = vmax.f32 %v4148_v59, 0.0  ;;  %v4361_v16 = vadd.f32 %v12683_v56, %v4360_v22  ;;  %v10239_v2 = vpop.f32.mrb[13].mxu1 }
 0x309   : > { %v12882_v39 = vcombine.low %v7410_v18, %v7417_v9  ;;  %v12887_v45 = vrot.slane %v7385_v42, %v12669_v29  ;;  %v4511_v46 = vmax.f32 %v4358_v37, 0.0  ;;  %v4366_v24 = vadd.f32 %v12683_v56, %v4365_v23  ;;  %v4368_v9 = vpop.f32.mrb[14].mxu1 }
 0x30a   : > { %v12892_v57 = vcombine.low %v7376_v53, %v7383_v28  ;;  %v4218_v21 = vpack.c.bf16 %v4197_v6, %v4196_v4  ;;  %v4512_v18 = vmax.f32 %v4361_v16, 0.0  ;;  %v8410_v22 = vcombine.low %v12859_v5, %v7077_v63  ;;  %v10240_v30 = vpop.f32.mrb[15].mxu1 }
 0x30b   : > { %14772 = vst [vmem:[#allocation17_spill] sm:$0xff] %v12887_v45  ;;  %v4657_v59 = vcombine.high %v4511_v46, %v4511_v46  ;;  %v4664_v42 = vrot.slane %v4511_v46, %v12669_v29  ;;  %v4513_v37 = vmax.f32 %v4366_v24, 0.0  ;;  %v7427_v23 = vrot.slane %v7419_v33, %v12669_v29 }
 0x30c   : > { %14773 = vst [vmem:[#allocation18_spill] sm:$0xff] %v12892_v57  ;;  %v4674_v2 = vcombine.high %v4512_v18, %v4512_v18  ;;  %v4681_v34 = vrot.slane %v4512_v18, %v12669_v29  ;;  %10302 = vmatmul.mubr.msk.bf16.gmra.mrb[76].mxu1 %vm4243_vm9, %v4218_v21  ;;  %v4369_v53 = vadd.f32 %v12683_v56, %v4368_v9 }
 0x30d   : > { %v4671_v28 = vrot.slane %v4657_v59, %v12669_v29  ;;  %v4672_v4 = vcombine.high %v4664_v42, %v4664_v42  ;;  %v14774_v5 = vrot.slane %v12466_v3, %v12536_v14  ;;  %v4691_v16 = vcombine.high %v4513_v37, %v4513_v37  ;;  %10305 = vmatprep.mubr.msk.bf16.mxu1 %vm10904_vm5, %v14735_v62 }
 0x30e   : > { %v4688_v30 = vrot.slane %v4674_v2, %v12669_v29  ;;  %v4689_v33 = vcombine.high %v4681_v34, %v4681_v34  ;;  %v14775_v46 = vrot.slane %v12469_v41, %v12532_v0  ;;  %v4698_v21 = vrot.slane %v4513_v37, %v12669_v29 }
 0x30f   : > { %v7078_v6 = vmul.f32 %v14774_v5, %v4664_v42  ;;  %v4673_v18 = vcombine.high %v4671_v28, %v4671_v28  ;;  %v14776_v9 = vrot.slane %v12474_v1, %v12526_v38  ;;  %v14777_v3 = vrot.slane %v12469_v41, %v12526_v38  ;;  %v4373_v20 = vpop.f32.mrb[16].mxu1 }
 0x310   : > { %v7082_v24 = vmul.f32 %v14775_v46, %v4681_v34  ;;  %v4690_v62 = vcombine.high %v4688_v30, %v4688_v30  ;;  %v14778_v2 = vrot.slane %v12469_v41, %v12536_v14  ;;  %v14779_v34 = vrot.slane %v12471_v58, %v12526_v38 }
 0x311   : > { %v7079_v59 = vmul.f32 %v14776_v9, %v4672_v4  ;;  %v7080_v42 = vmul.f32 %v14777_v3, %v4671_v28  ;;  %v7420_v5 = vcombine.low %v7077_v63, %v7078_v6  ;;  %v4705_v37 = vrot.slane %v4691_v16, %v12669_v29  ;;  %v10243_v3 = vpop.f32.mrb[17].mxu1 }
 0x312   : > { %v7083_v50 = vmul.f32 %v14778_v2, %v4689_v33  ;;  %v7084_v46 = vmul.f32 %v14779_v34, %v4688_v30  ;;  %v14780_v1 = vrot.slane %v12469_v41, %v12529_v10  ;;  %v14781_v33 = vrot.slane %v12471_v58, %v12529_v10  ;;  %v4376_v34 = vpop.f32.mrb[18].mxu1 }
 0x313   : > { %v7434_v9 = vrot.slane %v7420_v5, %v12669_v29  ;;  %v8047_v63 = vrot.slane %v7079_v59, %v12669_v29  ;;  %v8411_v28 = vcombine.low %v7078_v6, %v7079_v59  ;;  %v4706_v30 = vcombine.high %v4698_v21, %v4698_v21 }
 0x314   : > { %v7081_v4 = vmul.f32 %v14780_v1, %v4673_v18  ;;  %v7085_v2 = vmul.f32 %v14781_v33, %v4690_v62  ;;  %v7437_v57 = vcombine.low %v7082_v24, %v7083_v50  ;;  %v8428_v17 = vcombine.low %v7083_v50, %v7084_v46  ;;  %v10244_v18 = vpop.f32.mrb[19].mxu1 }
 0x315   : > { %v12935_v16 = vrot.slane %v8410_v22, %v12669_v29  ;;  %v12937_v48 = vcombine.low %v7427_v23, %v7434_v9  ;;  %v12940_v1 = vrot.slane %v8047_v63, 1  ;;  %v4707_v50 = vcombine.high %v4705_v37, %v4705_v37 }
 0x316   : > { %v7436_v41 = vcombine.low %v7080_v42, %v7081_v4  ;;  %v7451_v6 = vrot.slane %v7437_v57, %v12669_v29  ;;  %v7453_v59 = vcombine.low %v7084_v46, %v7085_v2  ;;  %v8427_v3 = vcombine.low %v7081_v4, %v7082_v24 }
 0x317   : > { %v14782_v33 = vrot.slane %v12471_v58, %v12532_v0  ;;  %v14783_v23 = vrot.slane %v12471_v58, %v12536_v14  ;;  %v12951_v9 = vrot.slane %v8411_v28, %v12669_v29  ;;  %v12954_v63 = vrot.slane %v8428_v17, %v12669_v29 }
 0x318   : > { %v7444_v62 = vrot.slane %v7436_v41, %v12669_v29  ;;  %v14784_v57 = vrot.slane %v12476_v11, %v12526_v38  ;;  %v4514_v46 = vmax.f32 %v4369_v53, 0.0  ;;  %v7461_v41 = vrot.slane %v7453_v59, %v12669_v29 }
 0x319   : > { %v7086_v22 = vmul.f32 %v14782_v33, %v4698_v21  ;;  %v7087_v42 = vmul.f32 %v14783_v23, %v4706_v30  ;;  %v12963_v58 = vrot.slane %v8427_v3, %v12669_v29  ;;  %v14785_v17 = vrot.slane %v12481_v7, %v12526_v38  ;;  %v12969_v23 = vpop.f32.mrb[20].mxu1 }
 0x31a   : > { %v7088_v24 = vmul.f32 %v14784_v57, %v4705_v37  ;;  %v12959_v4 = vcombine.low %v7444_v62, %v7451_v6  ;;  %v4708_v30 = vcombine.high %v4514_v46, %v4514_v46  ;;  %v4715_v28 = vrot.slane %v4514_v46, %v12669_v29  ;;  %v10247_v6 = vpop.f32.mrb[21].mxu1 }
 0x31b   : > { %v7454_v21 = vcombine.low %v7086_v22, %v7087_v42  ;;  %v8444_v18 = vcombine.low %v7085_v2, %v7086_v22  ;;  %v7089_v33 = vmul.f32 %v14785_v17, %v4707_v50  ;;  %v4374_v37 = vadd.f32 %v12683_v56, %v4373_v20  ;;  %v12979_v57 = vpop.f32.mrb[22].mxu1 }
 0x31c   : > { %v8054_v53 = vrot.slane %v7088_v24, %v12669_v29  ;;  %v4377_v2 = vadd.f32 %v12683_v56, %v4376_v34  ;;  %v8445_v59 = vcombine.low %v7087_v42, %v7088_v24  ;;  %v4722_v62 = vrot.slane %v4708_v30, %v12669_v29  ;;  %v10248_v5 = vpop.f32.mrb[23].mxu1 }
 0x31d   : > { %v7468_v11 = vrot.slane %v7454_v21, %v12669_v29  ;;  %v12976_v3 = vrot.slane %v8444_v18, %v12669_v29  ;;  %v4723_v22 = vcombine.high %v4715_v28, %v4715_v28  ;;  %v14786_v46 = vrot.slane %v12481_v7, %v12529_v10 }
 0x31e   : > { %v4515_v17 = vmax.f32 %v4374_v37, 0.0  ;;  %v4516_v20 = vmax.f32 %v4377_v2, 0.0  ;;  %v4724_v34 = vcombine.high %v4722_v62, %v4722_v62  ;;  %v14787_v42 = vrot.slane %v12481_v7, %v12532_v0 }
 0x31f   : > { %v12981_v50 = vcombine.low %v7461_v41, %v7468_v11  ;;  %v7090_v21 = vmul.f32 %v14786_v46, %v4715_v28  ;;  %v14788_v18 = vrot.slane %v12481_v7, %v12536_v14  ;;  %v8426_v41 = vcombine.low %v12935_v16, %v12951_v9 }
 0x320   : > { %v7091_v24 = vmul.f32 %v14787_v42, %v4723_v22  ;;  %v4725_v6 = vcombine.high %v4515_v17, %v4515_v17  ;;  %v4732_v27 = vrot.slane %v4515_v17, %v12669_v29  ;;  %v4742_v28 = vcombine.high %v4516_v20, %v4516_v20 }
 0x321   : > { %v7092_v30 = vmul.f32 %v14788_v18, %v4722_v62  ;;  %v7470_v11 = vcombine.low %v7089_v33, %v7090_v21  ;;  %v14789_v5 = vrot.slane %v12483_v43, %v12526_v38  ;;  %v4749_v22 = vrot.slane %v4516_v20, %v12669_v29 }
 0x322   : > { %v8461_v46 = vcombine.low %v7090_v21, %v7091_v24  ;;  %v4739_v7 = vrot.slane %v4725_v6, %v12669_v29  ;;  %v4740_v62 = vcombine.high %v4732_v27, %v4732_v27  ;;  %v14790_v16 = vrot.slane %v12483_v43, %v12529_v10 }
 0x323   : > { %v7093_v37 = vmul.f32 %v14789_v5, %v4724_v34  ;;  %v7471_v2 = vcombine.low %v7091_v24, %v7092_v30  ;;  %v7478_v42 = vrot.slane %v7470_v11, %v12669_v29  ;;  %v13004_v33 = vrot.slane %v8054_v53, 1  ;;  %v4389_v24 = vpop.f32.mrb[24].mxu1 }
 0x324   : > { %v7094_v9 = vmul.f32 %v14790_v16, %v4732_v27  ;;  %v13007_v17 = vrot.slane %v8445_v59, %v12669_v29  ;;  %v4756_v21 = vrot.slane %v4742_v28, %v12669_v29  ;;  %v4741_v20 = vcombine.high %v4739_v7, %v4739_v7  ;;  %v10251_v53 = vpop.f32.mrb[25].mxu1 }
 0x325   : > { %v7485_v34 = vrot.slane %v7471_v2, %v12669_v29  ;;  %v14791_v18 = vrot.slane %v12483_v43, %v12532_v0  ;;  %v14792_v6 = vrot.slane %v12483_v43, %v12536_v14  ;;  %v8462_v59 = vcombine.low %v7092_v30, %v7093_v37  ;;  %v13019_v2 = vpop.f32.mrb[26].mxu1 }
 0x326   : > { %v7487_v27 = vcombine.low %v7093_v37, %v7094_v9  ;;  %v4757_v55 = vcombine.high %v4749_v22, %v4749_v22  ;;  %v4758_v45 = vcombine.high %v4756_v21, %v4756_v21  ;;  %v13022_v28 = vrot.slane %v8461_v46, %v12669_v29  ;;  %v10252_v43 = vpop.f32.mrb[27].mxu1 }
 0x327   : > { %v7095_v11 = vmul.f32 %v14791_v18, %v4740_v62  ;;  %v7096_v5 = vmul.f32 %v14792_v6, %v4739_v7  ;;  %v13017_v16 = vcombine.low %v7478_v42, %v7485_v34  ;;  %v14793_v8 = vrot.slane %v12485_v32, %v12526_v38 }
 0x328   : > { %v14794_v7 = vrot.slane %v12487_v51, %v12526_v38  ;;  %v14795_v30 = vrot.slane %v12487_v51, %v12529_v10  ;;  %v14796_v34 = vrot.slane %v12487_v51, %v12532_v0  ;;  %v14797_v6 = vrot.slane %v12487_v51, %v12536_v14 }
 0x329   : > { %v7097_v62 = vmul.f32 %v14793_v8, %v4741_v20  ;;  %v7488_v18 = vcombine.low %v7095_v11, %v7096_v5  ;;  %v8478_v25 = vcombine.low %v7094_v9, %v7095_v11  ;;  %v7495_v8 = vrot.slane %v7487_v27, %v12669_v29 }
 0x32a   : > { %v7098_v42 = vmul.f32 %v14794_v7, %v4749_v22  ;;  %v7099_v37 = vmul.f32 %v14795_v30, %v4757_v55  ;;  %v7100_v46 = vmul.f32 %v14796_v34, %v4756_v21  ;;  %v13039_v32 = vmul.f32 %v14797_v6, %v4758_v45  ;;  %v13057_v7 = vpop.f32.mrb[80].mxu0 }
 0x32b   : > { %v7502_v9 = vrot.slane %v7488_v18, %v12669_v29  ;;  %v8061_v20 = vrot.slane %v7097_v62, %v12669_v29  ;;  %v8479_v22 = vcombine.low %v7096_v5, %v7097_v62  ;;  %v13045_v11 = vrot.slane %v8462_v59, %v12669_v29 }
 0x32c   : > { %v7504_v55 = vcombine.low %v7098_v42, %v7099_v37  ;;  %v7505_v53 = vcombine.low %v7100_v46, %v13039_v32  ;;  %v14798_v21 = vcombine.low %v12869_v36, %v12877_v49  ;;  %v13054_v45 = vrot.slane %v8478_v25, %v12669_v29  ;;  %v10219_v25 = vpop.f32.mrb[81].mxu0 }
 0x32d   : > { %v13051_v51 = vcombine.low %v7495_v8, %v7502_v9  ;;  %v8495_v27 = vcombine.low %v7099_v37, %v7100_v46  ;;  %v8167_v18 = vrot.slane %v12937_v48, 1  ;;  %v13059_v5 = vrot.slane %v8061_v20, 1  ;;  %v4155_v34 = vpop.f32.mrb[82].mxu0 }
 0x32e   : > { %v10468_v43 = vpack.i.bf16 %v8426_v41, %v14798_v21  ;;  %v13062_v59 = vrot.slane %v8479_v22, %v12669_v29  ;;  %v7512_v62 = vrot.slane %v7504_v55, %v12669_v29  ;;  %v4382_v36 = vadd.f32 %v12683_v56, %v12969_v23  ;;  %v10220_v9 = vpop.f32.mrb[83].mxu0 }
 0x32f   : > { %v14799_v49 = vrot.slane %v12882_v39, 1  ;;  %v8170_v42 = vsel %vm1059_vm0, %v8167_v18, %v12940_v1  ;;  %v4385_v30 = vadd.f32 %v12683_v56, %v12979_v57  ;;  %v8443_v37 = vcombine.low %v12963_v58, %v12954_v63 }
 0x330   : > { %10469 = vrot.lane.b32.xlu1 %v10468_v43, %s10911_s17  ;;  %v7519_v46 = vrot.slane %v7505_v53, %v12669_v29  ;;  %v4517_v8 = vmax.f32 %v4382_v36, 0.0  ;;  %v8460_v23 = vcombine.low %v12976_v3, %v13007_v17  ;;  %v8171_v22 = vrot.slane %v12959_v4, 1 }
 0x331   : > { %v8168_v41 = vsel %vm1059_vm0, %v14799_v49, %v8167_v18  ;;  %v4518_v20 = vmax.f32 %v4385_v30, 0.0  ;;  %v8172_v1 = vrot.slane %v12981_v50, 1  ;;  %v4390_v55 = vadd.f32 %v12683_v56, %v4389_v24  ;;  %v13097_v49 = vpop.f32.mrb[28].mxu1 }
 0x332   : > { %v10473_v6 = vpack.i.bf16 %v8170_v42, %v8168_v41  ;;  %v13084_v57 = vrot.slane %v8495_v27, %v12669_v29  ;;  %v4759_v63 = vcombine.high %v4517_v8, %v4517_v8  ;;  %v4766_v58 = vrot.slane %v4517_v8, %v12669_v29  ;;  %v10255_v34 = vpop.f32.mrb[29].mxu1 }
 0x333   : > { %v10478_v53 = vpack.i.bf16 %v8460_v23, %v8443_v37  ;;  %v4776_v21 = vcombine.high %v4518_v20, %v4518_v20  ;;  %v4783_v3 = vrot.slane %v4518_v20, %v12669_v29  ;;  %v8173_v17 = vsel %vm1059_vm0, %v8171_v22, %v8172_v1 }
 0x334   : > { %10474 = vrot.lane.b32.xlu1 %v10473_v6, %s10912_s18  ;;  %v8175_v43 = vsel %vm1059_vm0, %v8172_v1, %v13004_v33  ;;  %v4773_v24 = vrot.slane %v4759_v63, %v12669_v29  ;;  %v4774_v18 = vcombine.high %v4766_v58, %v4766_v58  ;;  %v14800_v27 = vrot.slane %v12491_v35, %v12526_v38  ;;  %v13111_v1 = vpop.f32.mrb[30].mxu1 }
 0x335   : > { %10479 = vrot.lane.b32.xlu0 %v10478_v53, %s10911_s17  ;;  %v10483_v25 = vpack.i.bf16 %v8175_v43, %v8173_v17  ;;  %v4790_v41 = vrot.slane %v4776_v21, %v12669_v29  ;;  %v4791_v42 = vcombine.high %v4783_v3, %v4783_v3  ;;  %v14801_v30 = vrot.slane %v12493_v47, %v12526_v38 }
 0x336   : > { %v7102_v36 = vmul.f32 %v14800_v27, %v4766_v58  ;;  %v4519_v33 = vmax.f32 %v4390_v55, 0.0  ;;  %v4775_v6 = vcombine.high %v4773_v24, %v4773_v24  ;;  %v14802_v8 = vrot.slane %v12491_v35, %v12529_v10 }
 0x337   : > { %v7106_v37 = vmul.f32 %v14801_v30, %v4783_v3  ;;  %v14803_v9 = vrot.slane %v12491_v35, %v12532_v0  ;;  %v4792_v63 = vcombine.high %v4790_v41, %v4790_v41  ;;  %v14804_v47 = vrot.slane %v12498_v60, %v12526_v38  ;;  %v10256_v3 = vpop.f32.mrb[31].mxu1 }
 0x338   : > { %v7103_v23 = vmul.f32 %v14802_v8, %v4774_v18  ;;  %v8496_v22 = vcombine.low %v13039_v32, %v7102_v36  ;;  %5657 = vbcast.lane.b32.xlu1 %v12738_v19, 256  ;;  %v14805_v58 = vrot.slane %v12498_v60, %v12529_v10  ;;  %v13120_v17 = vcombine.low %v7512_v62, %v7519_v46 }
 0x339   : > { %v7104_v20 = vmul.f32 %v14803_v9, %v4773_v24  ;;  %v7107_v55 = vmul.f32 %v14804_v47, %v4791_v42  ;;  %v8068_v21 = vrot.slane %v7106_v37, %v12669_v29  ;;  %v14806_v32 = vrot.slane %v12491_v35, %v12536_v14  ;;  %10484 = vrot.lane.b32.xlu0 %v10483_v25, %s10912_s18 }
 0x33a   : > { %v7108_v53 = vmul.f32 %v14805_v58, %v4790_v41  ;;  %v7521_v24 = vcombine.low %v7102_v36, %v7103_v23  ;;  %v14807_v27 = vrot.slane %v12498_v60, %v12532_v0  ;;  %v4793_v34 = vcombine.high %v4519_v33, %v4519_v33 }
 0x33b   : > { %v7105_v43 = vmul.f32 %v14806_v32, %v4775_v6  ;;  %v8512_v18 = vcombine.low %v7103_v23, %v7104_v20  ;;  %v8477_v41 = vcombine.low %v13022_v28, %v13045_v11  ;;  %v13132_v62 = vrot.slane %v8496_v22, %v12669_v29 }
 0x33c   : > { %v7109_v42 = vmul.f32 %v14807_v27, %v4792_v63  ;;  %v7538_v30 = vcombine.low %v7107_v55, %v7108_v53  ;;  %v13134_v46 = vrot.slane %v8068_v21, 1  ;;  %v7529_v36 = vrot.slane %v7521_v24, %v12669_v29 }
 0x33d   : > { %v7522_v8 = vcombine.low %v7104_v20, %v7105_v43  ;;  %v8513_v35 = vcombine.low %v7105_v43, %v7106_v37  ;;  %v4800_v25 = vrot.slane %v4519_v33, %v12669_v29  ;;  %v4807_v23 = vrot.slane %v4793_v34, %v12669_v29  ;;  %5661 = vbcast.lane.b32.xlu0 %v12738_v19, 264 }
 0x33e   : > { %v8529_v6 = vcombine.low %v7108_v53, %v7109_v42  ;;  %v8520_v9 = vrot.slane %v8512_v18, %v12669_v29  ;;  %v7546_v63 = vrot.slane %v7538_v30, %v12669_v29  ;;  %v8494_v28 = vcombine.low %v13054_v45, %v13062_v59 }
 0x33f   : > { %v4393_v11 = vadd.f32 %v12683_v56, %v13019_v2  ;;  %v7536_v37 = vrot.slane %v7522_v8, %v12669_v29  ;;  %v4808_v20 = vcombine.high %v4800_v25, %v4800_v25  ;;  %v4809_v22 = vcombine.high %v4807_v23, %v4807_v23 }
 0x340   : > { %v14808_v33 = vrot.slane %v12498_v60, %v12536_v14  ;;  %v8527_v55 = vrot.slane %v8513_v35, %v12669_v29  ;;  %v14809_v58 = vrot.slane %v12500_v12, %v12529_v10  ;;  %v10488_v21 = vpack.i.bf16 %v8494_v28, %v8477_v41  ;;  %v10872_v35 = vld [vmem:[%s14672_s4] ss:$0 sm:$0xff] }
 0x341   : > { %v4520_v3 = vmax.f32 %v4393_v11, 0.0  ;;  %v13155_v45 = vrot.slane %v8529_v6, %v12669_v29  ;;  %v14810_v2 = vrot.slane %v12500_v12, %v12526_v38  ;;  %v14811_v32 = vrot.slane %v12500_v12, %v12532_v0 }
 0x342   : > { %v7110_v47 = vmul.f32 %v14808_v33, %v4800_v25  ;;  %v7112_v53 = vmul.f32 %v14809_v58, %v4807_v23  ;;  %10489 = vrot.lane.b32.xlu1 %v10488_v21, %s10911_s17  ;;  %v8176_v27 = vrot.slane %v13017_v16, 1  ;;  %v8177_v30 = vrot.slane %v13051_v51, 1 }
 0x343   : > { %v7111_v59 = vmul.f32 %v14810_v2, %v4808_v20  ;;  %v7113_v60 = vmul.f32 %v14811_v32, %v4809_v22  ;;  %v4810_v24 = vcombine.high %v4520_v3, %v4520_v3  ;;  %v4817_v18 = vrot.slane %v4520_v3, %v12669_v29  ;;  %v4405_v20 = vpop.f32.mrb[32].mxu1 }
 0x344   : > { %v7539_v43 = vcombine.low %v7109_v42, %v7110_v47  ;;  %v4153_v6 = vadd.f32 %v10872_v35, %v13057_v7  ;;  %v14812_v28 = vrot.slane %v12500_v12, %v12536_v14  ;;  %v13176_v22 = vcombine.low %v7529_v36, %v7536_v37  ;;  %v10259_v21 = vpop.f32.mrb[33].mxu1 }
 0x345   : > { %v7555_v41 = vcombine.low %v7111_v59, %v7112_v53  ;;  %v8530_v8 = vcombine.low %v7110_v47, %v7111_v59  ;;  %v8546_v42 = vcombine.low %v7112_v53, %v7113_v60  ;;  %v4824_v25 = vrot.slane %v4810_v24, %v12669_v29  ;;  %v4408_v12 = vpop.f32.mrb[34].mxu1 }
 0x346   : > { %v7553_v34 = vrot.slane %v7539_v43, %v12669_v29  ;;  %v4825_v23 = vcombine.high %v4817_v18, %v4817_v18  ;;  %v7114_v11 = vmul.f32 %v14812_v28, %v4817_v18  ;;  %v8178_v58 = vsel %vm1059_vm0, %v8176_v27, %v8177_v30  ;;  %5676 = vbcast.lane.b32.xlu1 %v12751_v44, 264  ;;  %v10260_v43 = vpop.f32.mrb[35].mxu1 }
 0x347   : > { %v7563_v47 = vrot.slane %v7555_v41, %v12669_v29  ;;  %v8544_v7 = vrot.slane %v8530_v8, %v12669_v29  ;;  %v4826_v53 = vcombine.high %v4824_v25, %v4824_v25  ;;  %v14813_v3 = vrot.slane %v12503_v40, %v12526_v38  ;;  %v4413_v21 = vpop.f32.mrb[36].mxu1 }
 0x348   : > { %v13178_v33 = vcombine.low %v7546_v63, %v7553_v34  ;;  %v7556_v59 = vcombine.low %v7113_v60, %v7114_v11  ;;  %v8180_v36 = vsel %vm1059_vm0, %v8177_v30, %v13059_v5  ;;  %v4198_v63 = vmax.f32 %v4153_v6, 0.0 }
 0x349   : > { %v7115_v2 = vmul.f32 %v14813_v3, %v4825_v23  ;;  %v8511_v37 = vcombine.low %v13084_v57, %v13132_v62  ;;  %v8528_v32 = vcombine.low %v8520_v9, %v8527_v55  ;;  %v8554_v24 = vrot.slane %v8546_v42, %v12669_v29 }
 0x34a   : > { %v14814_v18 = vrot.slane %v12506_v52, %v12529_v10  ;;  %v7570_v60 = vrot.slane %v7556_v59, %v12669_v29  ;;  %v14815_v34 = vrot.slane %v12506_v52, %v12526_v38  ;;  %v10493_v30 = vpack.i.bf16 %v8180_v36, %v8178_v58 }
 0x34b   : > { %v8547_v27 = vcombine.low %v7114_v11, %v7115_v2  ;;  %v4219_v41 = vpack.c.bf16 %v4198_v63, %v4198_v63  ;;  %v10498_v8 = vpack.i.bf16 %v8528_v32, %v8511_v37  ;;  %v8075_v62 = vrot.slane %v7115_v2, %v12669_v29 }
 0x34c   : > { %v13195_v40 = vmul.f32 %v14814_v18, %v4826_v53  ;;  %v7116_v5 = vmul.f32 %v14815_v34, %v4824_v25  ;;  %v13201_v57 = vcombine.low %v7563_v47, %v7570_v60  ;;  %v8181_v55 = vrot.slane %v13120_v17, 1  ;;  %10494 = vrot.lane.b32.xlu0 %v10493_v30, %s10912_s18 }
 0x34d   : > { %v8561_v9 = vrot.slane %v8547_v27, %v12669_v29  ;;  %10306 = vmatmul.mubr.msk.bf16.gmra.mrb[80].mxu1 %vm4243_vm9, %v4219_v41  ;;  %v8182_v35 = vrot.slane %v13176_v22, 1  ;;  %v4398_v6 = vadd.f32 %v12683_v56, %v13097_v49  ;;  %v4401_v42 = vadd.f32 %v12683_v56, %v13111_v1 }
 0x34e   : > { %v8545_v25 = vcombine.low %v13155_v45, %v8544_v7  ;;  %v14816_v23 = vcombine.low %v12798_v54, %v12834_v31  ;;  %v7572_v11 = vcombine.low %v7116_v5, %v13195_v40  ;;  %v8187_v58 = vrot.slane %v13201_v57, 1  ;;  %v10263_v45 = vpop.f32.mrb[37].mxu1 }
 0x34f   : > { %v8562_v47 = vcombine.low %v8554_v24, %v8561_v9  ;;  %v8183_v53 = vsel %vm1059_vm0, %v8181_v55, %v8182_v35  ;;  %v8185_v49 = vsel %vm1059_vm0, %v8182_v35, %v13134_v46  ;;  %v4521_v1 = vmax.f32 %v4398_v6, 0.0  ;;  %v13226_v54 = vpop.f32.mrb[38].mxu1 }
 0x350   : > { %v13218_v28 = vrot.slane %v14816_v23, %v12669_v29  ;;  %v4522_v3 = vmax.f32 %v4401_v42, 0.0  ;;  %v8189_v7 = vrot.slane %v8075_v62, 1  ;;  %v10503_v2 = vpack.i.bf16 %v8185_v49, %v8183_v53  ;;  %5665 = vbcast.lane.b32.xlu0 %v12738_v19, 272  ;;  %v10264_v43 = vpop.f32.mrb[39].mxu1 }
 0x351   : > { %v10508_v59 = vpack.i.bf16 %v8562_v47, %v8545_v25  ;;  %v8186_v31 = vrot.slane %v13178_v33, 1  ;;  %v4827_v36 = vcombine.high %v4521_v1, %v4521_v1  ;;  %v4834_v63 = vrot.slane %v4521_v1, %v12669_v29 }
 0x352   : > { %v4844_v37 = vcombine.high %v4522_v3, %v4522_v3  ;;  %v4851_v32 = vrot.slane %v4522_v3, %v12669_v29  ;;  %v8040_v46 = vrot.slane %v12839_v13, %v12669_v29  ;;  %10504 = vrot.lane.b32.xlu1 %v10503_v2, %s10912_s18  ;;  %v8190_v18 = vsel %vm1059_vm0, %v8187_v58, %v8189_v7  ;;  %v13352_v13 = vld [vmem:[%s14674_s6] ss:$0 sm:$0xff] }
 0x353   : > { %v8188_v24 = vsel %vm1059_vm0, %v8186_v31, %v8187_v58  ;;  %v4406_v60 = vadd.f32 %v12683_v56, %v4405_v20  ;;  %v4841_v19 = vrot.slane %v4827_v36, %v12669_v29  ;;  %v4842_v27 = vcombine.high %v4834_v63, %v4834_v63 }
 0x354   : > { %v14817_v34 = vrot.slane %v12506_v52, %v12532_v0  ;;  %v4858_v30 = vrot.slane %v4844_v37, %v12669_v29  ;;  %v7580_v41 = vrot.slane %v7572_v11, %v12669_v29  ;;  %v4859_v62 = vcombine.high %v4851_v32, %v4851_v32  ;;  %10499 = vrot.lane.b32.xlu0 %v10498_v8, %s10911_s17 }
 0x355   : > { %v4523_v9 = vmax.f32 %v4406_v60, 0.0  ;;  %v4409_v55 = vadd.f32 %v12683_v56, %v4408_v12  ;;  %v4843_v35 = vcombine.high %v4841_v19, %v4841_v19  ;;  %v14818_v20 = vrot.slane %v12506_v52, %v12536_v14 }
 0x356   : > { %v7118_v5 = vmul.f32 %v14817_v34, %v4834_v63  ;;  %v14819_v42 = vrot.slane %v12508_v15, %v12526_v38  ;;  %v14820_v11 = vrot.slane %v12508_v15, %v12532_v0  ;;  %v14821_v12 = vrot.slane %v12508_v15, %v12536_v14  ;;  %5680 = vbcast.lane.b32.xlu1 %v12751_v44, 272 }
 0x357   : > { %v7119_v6 = vmul.f32 %v14818_v20, %v4842_v27  ;;  %v10513_v8 = vpack.i.bf16 %v8190_v18, %v8188_v24  ;;  %v4861_v53 = vcombine.high %v4523_v9, %v4523_v9  ;;  %v14822_v52 = vrot.slane %v12508_v15, %v12529_v10 }
 0x358   : > { %v7120_v25 = vmul.f32 %v14819_v42, %v4841_v19  ;;  %v8563_v23 = vcombine.low %v13195_v40, %v7118_v5  ;;  %v7122_v47 = vmul.f32 %v14820_v11, %v4851_v32  ;;  %v7123_v58 = vmul.f32 %v14821_v12, %v4859_v62  ;;  %5672 = vbcast.lane.b32.xlu0 %v12751_v44, 256  ;;  %v14830_v11 = vld [vmem:[#allocation12_spill] sm:$0xff] }
 0x359   : > { %v7121_v49 = vmul.f32 %v14822_v52, %v4843_v35  ;;  %v7573_v1 = vcombine.low %v7118_v5, %v7119_v6  ;;  %v14823_v40 = vrot.slane %v12511_v26, %v12526_v38  ;;  %v4860_v7 = vcombine.high %v4858_v30, %v4858_v30 }
 0x35a   : > { %v8564_v3 = vcombine.low %v7119_v6, %v7120_v25  ;;  %v7590_v2 = vcombine.low %v7122_v47, %v7123_v58  ;;  %v4868_v31 = vrot.slane %v4523_v9, %v12669_v29  ;;  %v4414_v36 = vadd.f32 %v12683_v56, %v4413_v21  ;;  %10509 = vrot.lane.b32.xlu1 %v10508_v59, %s10911_s17  ;;  %v14828_v6 = vld [vmem:[#allocation3_spill] sm:$0xff] }
 0x35b   : > { %v13265_v45 = vmul.f32 %v14823_v40, %v4858_v30  ;;  %v7587_v63 = vrot.slane %v7573_v1, %v12669_v29  ;;  %v7589_v37 = vcombine.low %v7120_v25, %v7121_v49  ;;  %v8580_v32 = vcombine.low %v7121_v49, %v7122_v47 }
 0x35c   : > { %v4524_v15 = vmax.f32 %v4409_v55, 0.0  ;;  %v13272_v43 = vrot.slane %v8563_v23, %v12669_v29  ;;  %v13275_v26 = vrot.slane %v8564_v3, %v12669_v29  ;;  %v7604_v24 = vrot.slane %v7590_v2, %v12669_v29  ;;  %10514 = vrot.lane.b32.xlu0 %v10513_v8, %s10912_s18 }
 0x35d   : > { %v4875_v18 = vrot.slane %v4861_v53, %v12669_v29  ;;  %v13280_v56 = vcombine.low %v7580_v41, %v7587_v63  ;;  %v7597_v21 = vrot.slane %v7589_v37, %v12669_v29  ;;  %v8581_v60 = vcombine.low %v7123_v58, %v13265_v45 }
 0x35e   : > { %v4876_v44 = vcombine.high %v4868_v31, %v4868_v31  ;;  %v14824_v27 = vrot.slane %v12515_v61, %v12526_v38  ;;  %v14825_v5 = vrot.slane %v12515_v61, %v12529_v10  ;;  %v14826_v59 = vrot.slane %v12515_v61, %v12536_v14  ;;  %5687 = vbcast.lane.b32.xlu1 %v14830_v11, 256 }
 0x35f   : > { %v4877_v19 = vcombine.high %v4875_v18, %v4875_v18  ;;  %v13293_v41 = vcombine.low %v7597_v21, %v7604_v24  ;;  %v14827_v9 = vrot.slane %v12515_v61, %v12532_v0  ;;  %v4878_v35 = vcombine.high %v4524_v15, %v4524_v15 }
 0x360   : > { %v7125_v34 = vmul.f32 %v14824_v27, %v4860_v7  ;;  %v7126_v30 = vmul.f32 %v14825_v5, %v4868_v31  ;;  %v7128_v62 = vmul.f32 %v14826_v59, %v4875_v18  ;;  %v4885_v20 = vrot.slane %v4524_v15, %v12669_v29  ;;  %v13314_v7 = vpop.f32.mrb[40].mxu1  ;;  %5691 = vbcast.lane.b32.xlu0 %v14830_v11, 264  ;;  %v14836_v59 = vld [vmem:[#allocation17_spill] sm:$0xff] }
 0x361   : > { %v7127_v55 = vmul.f32 %v14827_v9, %v4876_v44  ;;  %v14829_v42 = vrot.slane %v14828_v6, %v12526_v38  ;;  %v4525_v47 = vmax.f32 %v4414_v36, 0.0  ;;  %v8579_v12 = vcombine.low %v13272_v43, %v13275_v26  ;;  %v10267_v37 = vpop.f32.mrb[41].mxu1  ;;  %v14834_v44 = vld [vmem:[#allocation4_spill] sm:$0xff] }
 0x362   : > { %v7606_v23 = vcombine.low %v7125_v34, %v7126_v30  ;;  %v8082_v58 = vrot.slane %v13265_v45, %v12669_v29  ;;  %v4892_v61 = vrot.slane %v4878_v35, %v12669_v29  ;;  %v4893_v53 = vcombine.high %v4885_v20, %v4885_v20  ;;  %v13326_v18 = vpop.f32.mrb[42].mxu1 }
 0x363   : > { %v7129_v25 = vmul.f32 %v14829_v42, %v4877_v19  ;;  %v7607_v8 = vcombine.low %v7127_v55, %v7128_v62  ;;  %v8588_v52 = vrot.slane %v8580_v32, %v12669_v29  ;;  %v8595_v49 = vrot.slane %v8581_v60, %v12669_v29  ;;  %v10268_v5 = vpop.f32.mrb[43].mxu1 }
 0x364   : > { %v14831_v1 = vrot.slane %v14828_v6, %v12529_v10  ;;  %v4895_v40 = vcombine.high %v4525_v47, %v4525_v47  ;;  %v7614_v2 = vrot.slane %v7606_v23, %v12669_v29  ;;  %v4894_v45 = vcombine.high %v4892_v61, %v4892_v61 }
 0x365   : > { %v7621_v31 = vrot.slane %v7607_v8, %v12669_v29  ;;  %v14832_v36 = vrot.slane %v14828_v6, %v12532_v0  ;;  %v8598_v32 = vcombine.low %v7128_v62, %v7129_v25  ;;  %v14833_v15 = vrot.slane %v14828_v6, %v12536_v14 }
 0x366   : > { %v7130_v3 = vmul.f32 %v14831_v1, %v4885_v20  ;;  %v4902_v24 = vrot.slane %v4525_v47, %v12669_v29  ;;  %v8597_v60 = vcombine.low %v7126_v30, %v7127_v55  ;;  %v14835_v19 = vrot.slane %v14834_v44, %v12526_v38 }
 0x367   : > { %v7131_v63 = vmul.f32 %v14832_v36, %v4893_v53  ;;  %v7132_v43 = vmul.f32 %v14833_v15, %v4892_v61  ;;  %v13328_v21 = vcombine.low %v7614_v2, %v7621_v31  ;;  %v4909_v34 = vrot.slane %v4895_v40, %v12669_v29 }
 0x368   : > { %v7623_v26 = vcombine.low %v7129_v25, %v7130_v3  ;;  %v7133_v27 = vmul.f32 %v14835_v19, %v4894_v45  ;;  %v13336_v62 = vcombine.low %v14836_v59, %v13218_v28  ;;  %v13342_v6 = vrot.slane %v8040_v46, 1 }
 0x369   : > { %v7624_v9 = vcombine.low %v7131_v63, %v7132_v43  ;;  %v8614_v20 = vcombine.low %v7130_v3, %v7131_v63  ;;  %v8194_v30 = vrot.slane %v8082_v58, 1  ;;  %v4910_v42 = vcombine.high %v4902_v24, %v4902_v24  ;;  %v14837_v3 = vld [vmem:[#allocation2_spill] sm:$0xff] }
 0x36a   : > { %v7631_v35 = vrot.slane %v7623_v26, %v12669_v29  ;;  %v8615_v55 = vcombine.low %v7132_v43, %v7133_v27  ;;  %v8612_v25 = vrot.slane %v8598_v32, %v12669_v29  ;;  %v8089_v47 = vrot.slane %v7133_v27, %v12669_v29 }
 0x36b   : > { %v7638_v23 = vrot.slane %v7624_v9, %v12669_v29  ;;  %v8596_v28 = vcombine.low %v8588_v52, %v8595_v49  ;;  %v8605_v8 = vrot.slane %v8597_v60, %v12669_v29  ;;  %v4911_v53 = vcombine.high %v4909_v34, %v4909_v34 }
 0x36c   : > { %v8629_v61 = vrot.slane %v8615_v55, %v12669_v29  ;;  %v4417_v46 = vadd.f32 %v13352_v13, %v13226_v54  ;;  %v8622_v1 = vrot.slane %v8614_v20, %v12669_v29  ;;  %v14838_v52 = vrot.slane %v14837_v3, %v12526_v38  ;;  %v14842_v20 = vld [vmem:[#allocation6_spill] sm:$0xff] }
 0x36d   : > { %v13356_v58 = vcombine.low %v7631_v35, %v7638_v23  ;;  %v10518_v40 = vpack.i.bf16 %v8596_v28, %v8579_v12  ;;  %v14839_v2 = vrot.slane %v14837_v3, %v12529_v10  ;;  %v8191_v36 = vrot.slane %v13280_v56, 1 }
 0x36e   : > { %v7134_v49 = vmul.f32 %v14838_v52, %v4902_v24  ;;  %v4526_v45 = vmax.f32 %v4417_v46, 0.0  ;;  %v8192_v63 = vrot.slane %v13293_v41, 1  ;;  %v8199_v54 = vrot.slane %v8089_v47, 1 }
 0x36f   : > { %v13365_v31 = vmul.f32 %v14839_v2, %v4910_v42  ;;  %v14840_v37 = vrot.slane %v14837_v3, %v12532_v0  ;;  %10519 = vrot.lane.b32.xlu0 %v10518_v40, %s10911_s17  ;;  %v8613_v15 = vcombine.low %v8605_v8, %v8612_v25  ;;  %v8630_v12 = vcombine.low %v8622_v1, %v8629_v61  ;;  %v4429_v25 = vpop.f32.mrb[44].mxu1  ;;  %v13408_v2 = vpop.permute.xlu0 %5590 }
 0x370   : > { %v14841_v43 = vrot.slane %v14837_v3, %v12536_v14  ;;  %v4912_v24 = vcombine.high %v4526_v45, %v4526_v45  ;;  %v4919_v60 = vrot.slane %v4526_v45, %v12669_v29  ;;  %v8193_v44 = vsel %vm1059_vm0, %v8191_v36, %v8192_v63  ;;  %v10271_v8 = vpop.f32.mrb[45].mxu1 }
 0x371   : > { %v13372_v32 = vmul.f32 %v14840_v37, %v4909_v34  ;;  %v8195_v19 = vsel %vm1059_vm0, %v8192_v63, %v8194_v30  ;;  %v10528_v27 = vpack.i.bf16 %v8630_v12, %v8613_v15  ;;  %v8196_v34 = vrot.slane %v13328_v21, 1 }
 0x372   : > { %v13378_v26 = vmul.f32 %v14841_v43, %v4911_v53  ;;  %v8197_v5 = vrot.slane %v13356_v58, 1  ;;  %v7640_v59 = vcombine.low %v7134_v49, %v13365_v31  ;;  %v4926_v9 = vrot.slane %v4912_v24, %v12669_v29 }
 0x373   : > { %v4927_v35 = vcombine.high %v4919_v60, %v4919_v60  ;;  %v14843_v55 = vrot.slane %v14842_v20, %v12526_v38  ;;  %v10523_v23 = vpack.i.bf16 %v8195_v19, %v8193_v44  ;;  %5695 = vbcast.lane.b32.xlu0 %v14830_v11, 272  ;;  %v4422_v28 = vadd.f32 %v13352_v13, %v13314_v7  ;;  %v4432_v11 = vpop.f32.mrb[46].mxu1 }
 0x374   : > { %v8198_v30 = vsel %vm1059_vm0, %v8196_v34, %v8197_v5  ;;  %v8200_v47 = vsel %vm1059_vm0, %v8197_v5, %v8199_v54  ;;  %v7641_v61 = vcombine.low %v13372_v32, %v13378_v26  ;;  %v4928_v53 = vcombine.high %v4926_v9, %v4926_v9  ;;  %v10272_v45 = vpop.f32.mrb[47].mxu1 }
 0x375   : > { %v13390_v42 = vmul.f32 %v14843_v55, %v4919_v60  ;;  %v14844_v46 = vrot.slane %v14842_v20, %v12529_v10  ;;  %10524 = vrot.lane.b32.xlu1 %v10523_v23, %s10912_s18  ;;  %v10533_v52 = vpack.i.bf16 %v8200_v47, %v8198_v30  ;;  %v4527_v49 = vmax.f32 %v4422_v28, 0.0  ;;  %v14849_v47 = vld [vmem:[#allocation5_spill] sm:$0xff] }
 0x376   : > { %v4425_v7 = vadd.f32 %v13352_v13, %v13326_v18  ;;  %v4430_v40 = vadd.f32 %v13352_v13, %v4429_v25  ;;  %v14845_v36 = vrot.slane %v14842_v20, %v12532_v0  ;;  %v14846_v54 = vrot.slane %v14842_v20, %v12536_v14 }
 0x377   : > { %v7139_v1 = vmul.f32 %v14844_v46, %v4927_v35  ;;  %v8632_v3 = vcombine.low %v13378_v26, %v13390_v42  ;;  %v6395_v12 = vrot.slane %v13408_v2, %v12526_v38  ;;  %v8631_v18 = vcombine.low %v13365_v31, %v13372_v32  ;;  %10534 = vrot.lane.b32.xlu0 %v10533_v52, %s10912_s18  ;;  %v14847_v35 = vld [vmem:[#allocation7_spill] sm:$0xff] }
 0x378   : > { %v7140_v63 = vmul.f32 %v14845_v36, %v4926_v9  ;;  %v7141_v37 = vmul.f32 %v14846_v54, %v4928_v53  ;;  %v4929_v43 = vcombine.high %v4527_v49, %v4527_v49  ;;  %v4936_v26 = vrot.slane %v4527_v49, %v12669_v29  ;;  %v14852_v53 = vld [vmem:[#allocation14_spill] sm:$0xff] }
 0x379   : > { %v7657_v15 = vcombine.low %v13390_v42, %v7139_v1  ;;  %v4528_v24 = vmax.f32 %v4425_v7, 0.0  ;;  %v7648_v60 = vrot.slane %v7640_v59, %v12669_v29  ;;  %v7655_v44 = vrot.slane %v7641_v61, %v12669_v29  ;;  %10529 = vrot.lane.b32.xlu1 %v10528_v27, %s10911_s17 }
 0x37a   : > { %v7658_v19 = vcombine.low %v7140_v63, %v7141_v37  ;;  %v4529_v34 = vmax.f32 %v4430_v40, 0.0  ;;  %v4943_v5 = vrot.slane %v4929_v43, %v12669_v29  ;;  %v4944_v9 = vcombine.high %v4936_v26, %v4936_v26 }
 0x37b   : > { %v14848_v31 = vrot.slane %v14847_v35, %v12526_v38  ;;  %v4946_v20 = vcombine.high %v4528_v24, %v4528_v24  ;;  %v7665_v55 = vrot.slane %v7657_v15, %v12669_v29  ;;  %v8648_v42 = vcombine.low %v7139_v1, %v7140_v63  ;;  %5702 = vbcast.lane.b32.xlu0 %v14852_v53, 256  ;;  %v14855_v15 = vld [vmem:[#allocation8_spill] sm:$0xff] }
 0x37c   : > { %v4953_v25 = vrot.slane %v4528_v24, %v12669_v29  ;;  %v4433_v59 = vadd.f32 %v13352_v13, %v4432_v11  ;;  %v7672_v23 = vrot.slane %v7658_v19, %v12669_v29  ;;  %v4945_v30 = vcombine.high %v4943_v5, %v4943_v5 }
 0x37d   : > { %v7142_v32 = vmul.f32 %v14848_v31, %v4936_v26  ;;  %v14850_v27 = vrot.slane %v14849_v47, %v12526_v38  ;;  %v14851_v8 = vrot.slane %v14849_v47, %v12529_v10  ;;  %v4960_v1 = vrot.slane %v4946_v20, %v12669_v29  ;;  %5706 = vbcast.lane.b32.xlu1 %v14852_v53, 264 }
 0x37e   : > { %v4961_v52 = vcombine.high %v4953_v25, %v4953_v25  ;;  %v4970_v11 = vrot.slane %v4529_v34, %v12669_v29  ;;  %v14853_v49 = vrot.slane %v14849_v47, %v12532_v0  ;;  %v14854_v45 = vrot.slane %v14849_v47, %v12536_v14 }
 0x37f   : > { %v7143_v28 = vmul.f32 %v14850_v27, %v4944_v9  ;;  %v13440_v61 = vmul.f32 %v14851_v8, %v4943_v5  ;;  %v8649_v46 = vcombine.low %v7141_v37, %v7142_v32  ;;  %v4963_v63 = vcombine.high %v4529_v34, %v4529_v34 }
 0x380   : > { %v13448_v7 = vmul.f32 %v14853_v49, %v4945_v30  ;;  %v13454_v36 = vmul.f32 %v14854_v45, %v4953_v25  ;;  %v8096_v54 = vrot.slane %v7142_v32, %v12669_v29  ;;  %v4962_v37 = vcombine.high %v4960_v1, %v4960_v1 }
 0x381   : > { %v7674_v40 = vcombine.low %v7143_v28, %v13440_v61  ;;  %v14856_v43 = vrot.slane %v14855_v15, %v12526_v38  ;;  %v14857_v24 = vrot.slane %v14855_v15, %v12529_v10  ;;  %v13466_v5 = vcombine.low %v7648_v60, %v7655_v44  ;;  %5710 = vbcast.lane.b32.xlu1 %v14852_v53, 272 }
 0x382   : > { %v8639_v9 = vrot.slane %v8631_v18, %v12669_v29  ;;  %v8646_v35 = vrot.slane %v8632_v3, %v12669_v29  ;;  %v7675_v34 = vcombine.low %v13448_v7, %v13454_v36  ;;  %v13472_v31 = vcombine.low %v7665_v55, %v7672_v23 }
 0x383   : > { %v13461_v26 = vmul.f32 %v14856_v43, %v4961_v52  ;;  %v7148_v19 = vmul.f32 %v14857_v24, %v4960_v1  ;;  %v14858_v32 = vrot.slane %v14855_v15, %v12532_v0  ;;  %v14859_v30 = vrot.slane %v14855_v15, %v12536_v14  ;;  %v5598_v15 = vpop.permute.xlu0 %5597 }
 0x384   : > { %v8656_v44 = vrot.slane %v8648_v42, %v12669_v29  ;;  %v7682_v18 = vrot.slane %v7674_v40, %v12669_v29  ;;  %v7689_v3 = vrot.slane %v7675_v34, %v12669_v29  ;;  %v4530_v55 = vmax.f32 %v4433_v59, 0.0 }
 0x385   : > { %v7149_v20 = vmul.f32 %v14858_v32, %v4962_v37  ;;  %v7691_v25 = vcombine.low %v13461_v26, %v7148_v19  ;;  %v7150_v60 = vmul.f32 %v14859_v30, %v4970_v11  ;;  %v8204_v23 = vrot.slane %v8096_v54, 1  ;;  %v13498_v37 = vpop.permute.xlu1 %5601 }
 0x386   : > { %v8663_v47 = vrot.slane %v8649_v46, %v12669_v29  ;;  %v4977_v27 = vrot.slane %v4963_v63, %v12669_v29  ;;  %v13487_v8 = vcombine.low %v7682_v18, %v7689_v3  ;;  %v4980_v52 = vcombine.high %v4530_v55, %v4530_v55 }
 0x387   : > { %v7692_v28 = vcombine.low %v7149_v20, %v7150_v60  ;;  %v7699_v1 = vrot.slane %v7691_v25, %v12669_v29  ;;  %v4978_v49 = vcombine.high %v4970_v11, %v4970_v11  ;;  %v4987_v40 = vrot.slane %v4530_v55, %v12669_v29 }
 0x388   : > { %v8201_v45 = vrot.slane %v13466_v5, 1  ;;  %v8202_v59 = vrot.slane %v13472_v31, 1  ;;  %v8682_v53 = vcombine.low %v7148_v19, %v7149_v20  ;;  %v4994_v46 = vrot.slane %v4980_v52, %v12669_v29 }
 0x389   : > { %v7706_v42 = vrot.slane %v7692_v28, %v12669_v29  ;;  %v7151_v63 = vmul.f32 %v6395_v12, %v4978_v49  ;;  %v8647_v54 = vcombine.low %v8639_v9, %v8646_v35  ;;  %v8664_v34 = vcombine.low %v8656_v44, %v8663_v47  ;;  %v14863_v49 = vld [vmem:[#allocation10_spill] sm:$0xff] }
 0x38a   : > { %v8203_v43 = vsel %vm1059_vm0, %v8201_v45, %v8202_v59  ;;  %v8205_v24 = vsel %vm1059_vm0, %v8202_v59, %v8204_v23  ;;  %v4979_v32 = vcombine.high %v4977_v27, %v4977_v27  ;;  %v6437_v20 = vrot.slane %v13498_v37, %v12529_v10  ;;  %v4437_v23 = vpop.f32.mrb[48].mxu1 }
 0x38b   : > { %v13500_v11 = vcombine.low %v7699_v1, %v7706_v42  ;;  %v8683_v25 = vcombine.low %v7150_v60, %v7151_v63  ;;  %v10548_v19 = vpack.i.bf16 %v8205_v24, %v8203_v43  ;;  %v8665_v2 = vcombine.low %v13440_v61, %v13448_v7  ;;  %v14864_v42 = vld [vmem:[#allocation11_spill] sm:$0xff] }
 0x38c   : > { %v4995_v12 = vcombine.high %v4987_v40, %v4987_v40  ;;  %v10538_v9 = vpack.i.bf16 %v8664_v34, %v8647_v54  ;;  %v6402_v35 = vrot.slane %v5598_v15, %v12526_v38  ;;  %v8666_v30 = vcombine.low %v13454_v36, %v13461_v26  ;;  %v14860_v36 = vld [vmem:[#allocation9_spill] sm:$0xff]  ;;  %v10275_v54 = vpop.f32.mrb[49].mxu1 }
 0x38d   : > { %v8690_v18 = vrot.slane %v8682_v53, %v12669_v29  ;;  %v8697_v44 = vrot.slane %v8683_v25, %v12669_v29  ;;  %10549 = vrot.lane.b32.xlu1 %v10548_v19, %s10912_s18  ;;  %v6409_v60 = vrot.slane %v5598_v15, %v12529_v10  ;;  %v4996_v3 = vcombine.high %v4994_v46, %v4994_v46  ;;  %v14861_v26 = vld [vmem:[#allocation13_spill] sm:$0xff]  ;;  %v13528_v53 = vpop.permute.xlu1 %5612 }
 0x38e   : > { %10539 = vrot.lane.b32.xlu0 %v10538_v9, %s10911_s17  ;;  %v6416_v61 = vrot.slane %v5598_v15, %v12532_v0  ;;  %v6423_v7 = vrot.slane %v5598_v15, %v12536_v14  ;;  %v7152_v55 = vmul.f32 %v6402_v35, %v4977_v27  ;;  %v14862_v1 = vcombine.low %v14860_v36, %v14861_v26  ;;  %v14866_v27 = vld [vmem:[#allocation18_spill] sm:$0xff]  ;;  %v14867_v36 = vld [vmem:[#allocation15_spill] sm:$0xff] }
 0x38f   : > { %v8698_v47 = vcombine.low %v8690_v18, %v8697_v44  ;;  %v13518_v28 = vmul.f32 %v6409_v60, %v4979_v32  ;;  %v14865_v45 = vcombine.low %v14863_v49, %v14864_v42  ;;  %v8161_v24 = vrot.slane %v14866_v27, 1  ;;  %v4440_v32 = vpop.f32.mrb[50].mxu1  ;;  %v5606_v42 = vpop.permute.xlu0 %5605 }
 0x390   : > { %v8367_v52 = vrot.slane %v14862_v1, %v12669_v29  ;;  %v7154_v43 = vmul.f32 %v6416_v61, %v4987_v40  ;;  %v7155_v15 = vmul.f32 %v6423_v7, %v4995_v12  ;;  %v8162_v34 = vrot.slane %v13336_v62, 1  ;;  %v10276_v18 = vpop.f32.mrb[51].mxu1 }
 0x391   : > { %v8374_v59 = vrot.slane %v14865_v45, %v12669_v29  ;;  %v8673_v25 = vrot.slane %v8665_v2, %v12669_v29  ;;  %v6430_v19 = vrot.slane %v13498_v37, %v12526_v38  ;;  %v7708_v9 = vcombine.low %v7152_v55, %v13518_v28  ;;  %v14868_v2 = vld [vmem:[#allocation16_spill] sm:$0xff] }
 0x392   : > { %v8680_v44 = vrot.slane %v8666_v30, %v12669_v29  ;;  %v7709_v60 = vcombine.low %v7154_v43, %v7155_v15  ;;  %v8699_v40 = vcombine.low %v13518_v28, %v7154_v43  ;;  %v8163_v12 = vsel %vm1059_vm0, %v8161_v24, %v8162_v34  ;;  %v13550_v28 = vpop.permute.xlu1 %5620 }
 0x393   : > { %v8375_v35 = vcombine.low %v8367_v52, %v8374_v59  ;;  %v8103_v61 = vrot.slane %v7151_v63, %v12669_v29  ;;  %v7716_v7 = vrot.slane %v7708_v9, %v12669_v29  ;;  %v14869_v26 = vcombine.low %v14867_v36, %v14868_v2 }
 0x394   : > { %v8165_v55 = vsel %vm1059_vm0, %v8162_v34, %v13342_v6  ;;  %v13546_v52 = vmul.f32 %v6437_v20, %v4996_v3  ;;  %v7723_v30 = vrot.slane %v7709_v60, %v12669_v29  ;;  %v7156_v63 = vmul.f32 %v6430_v19, %v4994_v46 }
 0x395   : > { %v10553_v1 = vpack.i.bf16 %v14869_v26, %v8375_v35  ;;  %v10543_v49 = vpack.i.bf16 %v8165_v55, %v8163_v12  ;;  %v8681_v59 = vcombine.low %v8673_v25, %v8680_v44  ;;  %v8209_v54 = vrot.slane %v8103_v61, 1  ;;  %v13568_v44 = vpop.permute.xlu0 %5616 }
 0x396   : > { %v13552_v45 = vcombine.low %v7716_v7, %v7723_v30  ;;  %v8206_v43 = vrot.slane %v13487_v8, 1  ;;  %v8207_v6 = vrot.slane %v13500_v11, 1  ;;  %v7725_v20 = vcombine.low %v7156_v63, %v13546_v52  ;;  %v13566_v18 = vpop.permute.xlu1 %5627 }
 0x397   : > { %10554 = vrot.lane.b32.xlu1 %v10553_v1, %s10911_s17  ;;  %10544 = vrot.lane.b32.xlu0 %v10543_v49, %s10912_s18  ;;  %v10558_v3 = vpack.i.bf16 %v8698_v47, %v8681_v59  ;;  %v4438_v19 = vadd.f32 %v13352_v13, %v4437_v23  ;;  %v6444_v25 = vrot.slane %v13498_v37, %v12532_v0 }
 0x398   : > { %14870 = vst [vmem:[#allocation3_spill] sm:$0xff] %v13552_v45  ;;  %v8208_v24 = vsel %vm1059_vm0, %v8206_v43, %v8207_v6  ;;  %v8210_v34 = vsel %vm1059_vm0, %v8207_v6, %v8209_v54  ;;  %v6451_v9 = vrot.slane %v13498_v37, %v12536_v14  ;;  %v8700_v35 = vcombine.low %v7155_v15, %v7156_v63 }
 0x399   : > { %v10563_v46 = vpack.i.bf16 %v8210_v34, %v8208_v24  ;;  %v7733_v47 = vrot.slane %v7725_v20, %v12669_v29  ;;  %v6465_v60 = vrot.slane %v13528_v53, %v12526_v38  ;;  %v4531_v12 = vmax.f32 %v4438_v19, 0.0  ;;  %v13598_v20 = vpop.permute.xlu0 %5631 }
 0x39a   : > { %v4441_v23 = vadd.f32 %v13352_v13, %v4440_v32  ;;  %v6472_v61 = vrot.slane %v13528_v53, %v12529_v10  ;;  %v6479_v37 = vrot.slane %v13528_v53, %v12532_v0  ;;  %v6486_v15 = vrot.slane %v13528_v53, %v12536_v14  ;;  %v13596_v6 = vpop.permute.xlu1 %5646 }
 0x39b   : > { %10559 = vrot.lane.b32.xlu1 %v10558_v3, %s10911_s17  ;;  %10564 = vrot.lane.b32.xlu0 %v10563_v46, %s10912_s18  ;;  %v6521_v7 = vrot.slane %v13550_v28, %v12526_v38  ;;  %v6458_v36 = vrot.slane %v5606_v42, %v12526_v38  ;;  %v4997_v2 = vcombine.high %v4531_v12, %v4531_v12 }
 0x39c   : > { %v5004_v26 = vrot.slane %v4531_v12, %v12669_v29  ;;  %v4532_v1 = vmax.f32 %v4441_v23, 0.0  ;;  %v8707_v30 = vrot.slane %v8699_v40, %v12669_v29  ;;  %v8714_v49 = vrot.slane %v8700_v35, %v12669_v29 }
 0x39d   : > { %v5011_v53 = vrot.slane %v4997_v2, %v12669_v29  ;;  %v4445_v2 = vpop.f32.mrb[52].mxu1 }
 0x39e   : > { %v5012_v63 = vcombine.high %v5004_v26, %v5004_v26  ;;  %v7158_v59 = vmul.f32 %v6444_v25, %v5004_v26  ;;  %v5014_v54 = vcombine.high %v4532_v1, %v4532_v1  ;;  %v5021_v3 = vrot.slane %v4532_v1, %v12669_v29 }
 0x39f   : > { %v8715_v40 = vcombine.low %v8707_v30, %v8714_v49  ;;  %v5013_v24 = vcombine.high %v5011_v53, %v5011_v53  ;;  %v7160_v46 = vmul.f32 %v6458_v36, %v5011_v53  ;;  %v10279_v30 = vpop.f32.mrb[53].mxu1  ;;  %v4446_v42 = vadd.f32 %v13352_v13, %v4445_v2 }
 0x3a0   : > { %v7159_v34 = vmul.f32 %v6451_v9, %v5012_v63  ;;  %v8716_v19 = vcombine.low %v13546_v52, %v7158_v59  ;;  %v5028_v12 = vrot.slane %v5014_v54, %v12669_v29  ;;  %v5029_v23 = vcombine.high %v5021_v3, %v5021_v3  ;;  %v4448_v35 = vpop.f32.mrb[54].mxu1 }
 0x3a1   : > { %v7161_v52 = vmul.f32 %v6465_v60, %v5013_v24  ;;  %v13611_v49 = vmul.f32 %v6472_v61, %v5021_v3  ;;  %v10280_v1 = vpop.f32.mrb[55].mxu1  ;;  %v6500_v60 = vrot.slane %v13568_v44, %v12529_v10  ;;  %v13625_v61 = vpop.permute.xlu1 %5650  ;;  %v6507_v2 = vrot.slane %v13568_v44, %v12532_v0 }
 0x3a2   : > { %v7726_v9 = vcombine.low %v7158_v59, %v7159_v34  ;;  %v8717_v36 = vcombine.low %v7159_v34, %v7160_v46  ;;  %v13613_v53 = vmul.f32 %v6479_v37, %v5029_v23  ;;  %v13615_v63 = vmul.f32 %v6486_v15, %v5028_v12  ;;  %v13630_v3 = vpop.permute.xlu0 %5635 }
 0x3a3   : > { %v8724_v25 = vrot.slane %v8716_v19, %v12669_v29  ;;  %v6493_v59 = vrot.slane %v13568_v44, %v12526_v38  ;;  %v7742_v37 = vcombine.low %v7161_v52, %v13611_v49  ;;  %v4533_v34 = vmax.f32 %v4446_v42, 0.0 }
 0x3a4   : > { %v7740_v54 = vrot.slane %v7726_v9, %v12669_v29  ;;  %v8731_v26 = vrot.slane %v8717_v36, %v12669_v29  ;;  %v7743_v15 = vcombine.low %v13613_v53, %v13615_v63  ;;  %v4449_v19 = vadd.f32 %v13352_v13, %v4448_v35 }
 0x3a5   : > { %v5030_v1 = vcombine.high %v5028_v12, %v5028_v12  ;;  %v7750_v9 = vrot.slane %v7742_v37, %v12669_v29  ;;  %v6514_v30 = vrot.slane %v13568_v44, %v12536_v14  ;;  %v5031_v52 = vcombine.high %v4533_v34, %v4533_v34 }
 0x3a6   : > { %v13632_v24 = vcombine.low %v7733_v47, %v7740_v54  ;;  %v8732_v23 = vcombine.low %v8724_v25, %v8731_v26  ;;  %v7757_v36 = vrot.slane %v7743_v15, %v12669_v29  ;;  %v5038_v32 = vrot.slane %v4533_v34, %v12669_v29  ;;  %v13656_v25 = vpop.permute.xlu0 %5642 }
 0x3a7   : > { %v4534_v47 = vmax.f32 %v4449_v19, 0.0  ;;  %v8110_v42 = vrot.slane %v7160_v46, %v12669_v29  ;;  %v5045_v54 = vrot.slane %v5031_v52, %v12669_v29  ;;  %v7165_v34 = vmul.f32 %v6493_v59, %v5030_v1  ;;  %v10470_v19 = vpop.permute.xlu1 %10469 }
 0x3a8   : > { %v13645_v35 = vcombine.low %v7750_v9, %v7757_v36  ;;  %v13647_v26 = vpack.i.bf16 %v8732_v23, %v8715_v40  ;;  %v5046_v37 = vcombine.high %v5038_v32, %v5038_v32  ;;  %v7166_v44 = vmul.f32 %v6500_v60, %v5038_v32 }
 0x3a9   : > { %v8212_v40 = vrot.slane %v13632_v24, 1  ;;  %v5047_v9 = vcombine.high %v5045_v54, %v5045_v54  ;;  %v5048_v52 = vcombine.high %v4534_v47, %v4534_v47  ;;  %v8214_v12 = vrot.slane %v8110_v42, 1 }
 0x3aa   : > { %14871 = vst [vmem:[#allocation12_spill] sm:$0xff] %v13645_v35  ;;  %v7167_v36 = vmul.f32 %v6507_v2, %v5046_v37  ;;  %v7168_v32 = vmul.f32 %v6514_v30, %v5045_v54  ;;  %v7759_v60 = vcombine.low %v7165_v34, %v7166_v44  ;;  %v8211_v15 = vrot.slane %v13552_v45, 1  ;;  %v4453_v54 = vpop.f32.mrb[56].mxu1  ;;  %v10480_v45 = vpop.permute.xlu0 %10479 }
 0x3ab   : > { %v8733_v46 = vcombine.low %v13611_v49, %v13613_v53  ;;  %v13667_v59 = vmul.f32 %v6521_v7, %v5047_v9  ;;  %v5055_v1 = vrot.slane %v4534_v47, %v12669_v29  ;;  %v8734_v23 = vcombine.low %v13615_v63, %v7165_v34  ;;  %v10475_v2 = vpop.permute.xlu1 %10474  ;;  %v10283_v7 = vpop.f32.mrb[57].mxu1 }
 0x3ac   : > { %v7760_v37 = vcombine.low %v7167_v36, %v7168_v32  ;;  %v8213_v30 = vsel %vm1059_vm0, %v8211_v15, %v8212_v40  ;;  %v8215_v42 = vsel %vm1059_vm0, %v8212_v40, %v8214_v12  ;;  %v10477_v43 = vunpack.i.h.bf16 %v10475_v2  ;;  %v4456_v34 = vpop.f32.mrb[58].mxu1 }
 0x3ad   : > { %v10476_v55 = vunpack.i.l.bf16 %v10475_v2  ;;  %v8751_v49 = vcombine.low %v7168_v32, %v13667_v59  ;;  %v5062_v28 = vrot.slane %v5048_v52, %v12669_v29  ;;  %v10472_v53 = vunpack.i.h.bf16 %v10470_v19  ;;  %v10284_v32 = vpop.f32.mrb[59].mxu1 }
 0x3ae   : > { %v10471_v9 = vunpack.i.l.bf16 %v10470_v19  ;;  %v7767_v47 = vrot.slane %v7759_v60, %v12669_v29  ;;  %v7774_v63 = vrot.slane %v7760_v37, %v12669_v29  ;;  %v9082_v15 = vsel %vm4243_vm9, %v12937_v48, %v10477_v43 }
 0x3af   : > { %v9081_v12 = vsel %vm4243_vm9, %v12882_v39, %v10476_v55  ;;  %v8750_v40 = vcombine.low %v7166_v44, %v7167_v36  ;;  %v5063_v2 = vcombine.high %v5055_v1, %v5055_v1  ;;  %v6584_v52 = vrot.slane %v13630_v3, %v12526_v38 }
 0x3b0   : > { %v13685_v7 = vcombine.low %v7767_v47, %v7774_v63  ;;  %v13688_v60 = vsel %vm9115_vm10, %v9081_v12, %v10471_v9  ;;  %v8765_v43 = vrot.slane %v8751_v49, %v12669_v29  ;;  %v13694_v39 = vsel %vm9115_vm10, %v9082_v15, %v10472_v53  ;;  %v10485_v47 = vpop.permute.xlu0 %10484 }
 0x3b1   : > { %v5064_v55 = vcombine.high %v5062_v28, %v5062_v28  ;;  %v8741_v44 = vrot.slane %v8733_v46, %v12669_v29  ;;  %v8748_v36 = vrot.slane %v8734_v23, %v12669_v29  ;;  %v10568_v37 = vpack.i.bf16 %v13694_v39, %v13688_v60 }
 0x3b2   : > { %v10573_v63 = vpack.i.bf16 %v8215_v42, %v8213_v30  ;;  %v8758_v9 = vrot.slane %v8750_v40, %v12669_v29  ;;  %v10487_v12 = vunpack.i.h.bf16 %v10485_v47  ;;  %v10486_v32 = vunpack.i.l.bf16 %v10485_v47 }
 0x3b3   : > { %v14872_v49 = vrot.slane %v13566_v18, %v12529_v10  ;;  %v10482_v53 = vunpack.i.h.bf16 %v10480_v45  ;;  %v10481_v15 = vunpack.i.l.bf16 %v10480_v45  ;;  %10569 = vrot.lane.b32.xlu0 %v10568_v37, %s10913_s20  ;;  %v4454_v46 = vadd.f32 %v13352_v13, %v4453_v54 }
 0x3b4   : > { %v4457_v23 = vadd.f32 %v13352_v13, %v4456_v34  ;;  %v9084_v30 = vsel %vm4243_vm9, %v12981_v50, %v10487_v12  ;;  %v9083_v42 = vsel %vm4243_vm9, %v12959_v4, %v10486_v32  ;;  %v14873_v40 = vrot.slane %v13566_v18, %v12536_v14 }
 0x3b5   : > { %v7171_v48 = vmul.f32 %v14872_v49, %v5063_v2  ;;  %v8766_v2 = vcombine.low %v8758_v9, %v8765_v43  ;;  %v13715_v45 = vsel %vm9115_vm10, %v9083_v42, %v10481_v15  ;;  %v13718_v37 = vsel %vm9115_vm10, %v9084_v30, %v10482_v53  ;;  %v13728_v43 = vpop.permute.xlu1 %5657  ;;  %v4461_v30 = vpop.f32.mrb[60].mxu1 }
 0x3b6   : > { %v7173_v47 = vmul.f32 %v14873_v40, %v5064_v55  ;;  %14874 = vst [vmem:[#allocation4_spill] sm:$0xff] %v13715_v45  ;;  %14875 = vst [vmem:[#allocation17_spill] sm:$0xff] %v13718_v37  ;;  %v4535_v54 = vmax.f32 %v4454_v46, 0.0  ;;  %v4536_v49 = vmax.f32 %v4457_v23, 0.0  ;;  %v8117_v34 = vrot.slane %v13667_v59, %v12669_v29 }
 0x3b7   : > { %v14876_v50 = vrot.slane %v13566_v18, %v12526_v38  ;;  %v14877_v12 = vrot.slane %v13566_v18, %v12532_v0  ;;  %v8749_v9 = vcombine.low %v8741_v44, %v8748_v36  ;;  %10574 = vrot.lane.b32.xlu0 %v10573_v63, %s10912_s18  ;;  %v10578_v53 = vpack.i.bf16 %v13718_v37, %v13715_v45 }
 0x3b8   : > { %v5065_v59 = vcombine.high %v4535_v54, %v4535_v54  ;;  %v5072_v15 = vrot.slane %v4535_v54, %v12669_v29  ;;  %v14878_v44 = vrot.slane %v13598_v20, %v12526_v38  ;;  %v5082_v63 = vcombine.high %v4536_v49, %v4536_v49 }
 0x3b9   : > { %v7170_v4 = vmul.f32 %v14876_v50, %v5055_v1  ;;  %v7172_v55 = vmul.f32 %v14877_v12, %v5062_v28  ;;  %v13736_v23 = vpack.i.bf16 %v8766_v2, %v8749_v9  ;;  %10579 = vrot.lane.b32.xlu1 %v10578_v53, %s10911_s17  ;;  %v8219_v40 = vrot.slane %v8117_v34, 1  ;;  %v10287_v2 = vpop.f32.mrb[61].mxu1 }
 0x3ba   : > { %v5079_v18 = vrot.slane %v5065_v59, %v12669_v29  ;;  %v5080_v28 = vcombine.high %v5072_v15, %v5072_v15  ;;  %v7174_v36 = vmul.f32 %v14878_v44, %v5072_v15  ;;  %v5089_v50 = vrot.slane %v4536_v49, %v12669_v29  ;;  %v4464_v42 = vpop.f32.mrb[62].mxu1 }
 0x3bb   : > { %v7776_v46 = vcombine.low %v7170_v4, %v7171_v48  ;;  %v7777_v1 = vcombine.low %v7172_v55, %v7173_v47  ;;  %v8767_v54 = vcombine.low %v7171_v48, %v7172_v55  ;;  %v13746_v4 = vpop.permute.xlu0 %5661  ;;  %10589 = vrot.lane.b32.xlu0 %v10578_v53, %s10913_s20  ;;  %v14879_v9 = vrot.slane %v13598_v20, %v12529_v10  ;;  %v10490_v55 = vpop.permute.xlu1 %10489 }
 0x3bc   : > { %v5081_v12 = vcombine.high %v5079_v18, %v5079_v18  ;;  %v14880_v15 = vrot.slane %v13598_v20, %v12532_v0  ;;  %v8768_v32 = vcombine.low %v7173_v47, %v7174_v36  ;;  %v8217_v53 = vrot.slane %v13685_v7, 1  ;;  %v10288_v2 = vpop.f32.mrb[63].mxu1 }
 0x3bd   : > { %v7175_v59 = vmul.f32 %v14879_v9, %v5080_v28  ;;  %v13763_v28 = vrot.slane %v7776_v46, %v12669_v29  ;;  %10584 = vrot.lane.b32.xlu1 %v13647_v26, %s10911_s17  ;;  %v14881_v47 = vrot.slane %v13598_v20, %v12536_v14  ;;  %v5097_v48 = vcombine.high %v5089_v50, %v5089_v50 }
 0x3be   : > { %v7176_v44 = vmul.f32 %v14880_v15, %v5079_v18  ;;  %v13766_v18 = vrot.slane %v7777_v1, %v12669_v29  ;;  %v5096_v15 = vrot.slane %v5082_v63, %v12669_v29  ;;  %v13777_v2 = vmul.f32 %v6584_v52, %v5089_v50 }
 0x3bf   : > { %v7177_v9 = vmul.f32 %v14881_v47, %v5081_v12  ;;  %v8216_v46 = vrot.slane %v13645_v35, 1  ;;  %v13781_v1 = vrot.slane %v8767_v54, %v12669_v29  ;;  %v10492_v49 = vunpack.i.h.bf16 %v10490_v55  ;;  %v13790_v52 = vpop.permute.xlu1 %5676  ;;  %v10495_v37 = vpop.permute.xlu0 %10494 }
 0x3c0   : > { %v8784_v34 = vcombine.low %v7175_v59, %v7176_v44  ;;  %v7793_v20 = vcombine.low %v7174_v36, %v7175_v59  ;;  %v10491_v12 = vunpack.i.l.bf16 %v10490_v55  ;;  %v13786_v63 = vrot.slane %v8768_v32, %v12669_v29 }
 0x3c1   : > { %v8785_v47 = vcombine.low %v7177_v9, %v13777_v2  ;;  %v8218_v3 = vsel %vm1059_vm0, %v8216_v46, %v8217_v53  ;;  %v7794_v50 = vcombine.low %v7176_v44, %v7177_v9  ;;  %v5098_v19 = vcombine.high %v5096_v15, %v5096_v15 }
 0x3c2   : > { %v8220_v54 = vsel %vm1059_vm0, %v8217_v53, %v8219_v40  ;;  %v4462_v45 = vadd.f32 %v13352_v13, %v4461_v30  ;;  %v13795_v26 = vrot.slane %v8784_v34, %v12669_v29  ;;  %v14882_v32 = vrot.slane %v13656_v25, %v12526_v38 }
 0x3c3   : > { %v13801_v59 = vrot.slane %v8785_v47, %v12669_v29  ;;  %v10593_v55 = vpack.i.bf16 %v8220_v54, %v8218_v3  ;;  %v10497_v46 = vunpack.i.h.bf16 %v10495_v37  ;;  %v10496_v35 = vunpack.i.l.bf16 %v10495_v37  ;;  %v13831_v3 = vpop.permute.xlu0 %5665 }
 0x3c4   : > { %v7179_v36 = vmul.f32 %v14882_v32, %v5097_v48  ;;  %v7801_v44 = vrot.slane %v7793_v20, %v12669_v29  ;;  %v14883_v40 = vrot.slane %v13656_v25, %v12529_v10  ;;  %v4537_v34 = vmax.f32 %v4462_v45, 0.0 }
 0x3c5   : > { %10594 = vrot.lane.b32.xlu0 %v10593_v55, %s10912_s18  ;;  %v4465_v53 = vadd.f32 %v13352_v13, %v4464_v42  ;;  %v9086_v37 = vsel %vm4243_vm9, %v13051_v51, %v10497_v46  ;;  %v9085_v20 = vsel %vm4243_vm9, %v13017_v16, %v10496_v35  ;;  %v14884_v47 = vrot.slane %v13656_v25, %v12532_v0 }
 0x3c6   : > { %v13807_v30 = vmul.f32 %v14883_v40, %v5096_v15  ;;  %v7808_v15 = vrot.slane %v7794_v50, %v12669_v29  ;;  %v13826_v13 = vsel %vm9115_vm10, %v9086_v37, %v10492_v49  ;;  %v13829_v42 = vsel %vm9115_vm10, %v9085_v20, %v10491_v12  ;;  %v10505_v50 = vpop.permute.xlu1 %10504 }
 0x3c7   : > { %v13823_v45 = vmul.f32 %v14884_v47, %v5098_v19  ;;  %14885 = vst [vmem:[#allocation2_spill] sm:$0xff] %v13826_v13  ;;  %14886 = vst [vmem:[#allocation6_spill] sm:$0xff] %v13829_v42  ;;  %v5099_v54 = vcombine.high %v4537_v34, %v4537_v34  ;;  %v5106_v51 = vrot.slane %v4537_v34, %v12669_v29  ;;  %v4538_v32 = vmax.f32 %v4465_v53, 0.0  ;;  %v10500_v53 = vpop.permute.xlu0 %10499 }
 0x3c8   : > { %v10598_v16 = vpack.i.bf16 %v13826_v13, %v13829_v42  ;;  %v7810_v35 = vcombine.low %v7179_v36, %v13807_v30  ;;  %v10507_v19 = vunpack.i.h.bf16 %v10505_v50  ;;  %v10506_v55 = vunpack.i.l.bf16 %v10505_v50  ;;  %v13846_v36 = vpop.f32.mrb[64].mxu1 }
 0x3c9   : > { %v5113_v49 = vrot.slane %v5099_v54, %v12669_v29  ;;  %v5114_v46 = vcombine.high %v5106_v51, %v5106_v51  ;;  %v13838_v40 = vcombine.low %v7801_v44, %v7808_v15  ;;  %v14887_v12 = vrot.slane %v13656_v25, %v12536_v14 }
 0x3ca   : > { %10599 = vrot.lane.b32.xlu1 %v10598_v16, %s10911_s17  ;;  %10609 = vrot.lane.b32.xlu0 %v10598_v16, %s10913_s20  ;;  %v5123_v37 = vrot.slane %v4538_v32, %v12669_v29  ;;  %v9088_v20 = vsel %vm4243_vm9, %v13176_v22, %v10507_v19  ;;  %v9087_v44 = vsel %vm4243_vm9, %v13120_v17, %v10506_v55  ;;  %v10291_v16 = vpop.f32.mrb[65].mxu1  ;;  %v10501_v50 = vunpack.i.l.bf16 %v10500_v53 }
 0x3cb   : > { %v7182_v34 = vmul.f32 %v14887_v12, %v5106_v51  ;;  %v5115_v15 = vcombine.high %v5113_v49, %v5113_v49  ;;  %v14888_v47 = vrot.slane %v13596_v6, %v12526_v38  ;;  %v13857_v25 = vcombine.low %v13763_v28, %v13766_v18  ;;  %v13859_v12 = vpop.permute.xlu1 %5680  ;;  %v13862_v22 = vpop.f32.mrb[66].mxu1 }
 0x3cc   : > { %v10502_v51 = vunpack.i.h.bf16 %v10500_v53  ;;  %v7818_v17 = vrot.slane %v7810_v35, %v12669_v29  ;;  %v8124_v19 = vrot.slane %v13777_v2, %v12669_v29  ;;  %v14890_v55 = vrot.slane %v13596_v6, %v12529_v10  ;;  %v10292_v28 = vpop.f32.mrb[67].mxu1 }
 0x3cd   : > { %v7183_v54 = vmul.f32 %v14888_v47, %v5114_v46  ;;  %14889 = vst [vmem:[#allocation7_spill] sm:$0xff] %v13857_v25  ;;  %v7811_v9 = vcombine.low %v13823_v45, %v7182_v34  ;;  %v5116_v47 = vcombine.high %v4538_v32, %v4538_v32  ;;  %v13871_v18 = vsel %vm9115_vm10, %v9087_v44, %v10501_v50  ;;  %v13886_v32 = vpop.permute.xlu0 %5672 }
 0x3ce   : > { %v7184_v46 = vmul.f32 %v14890_v55, %v5113_v49  ;;  %14891 = vst [vmem:[#allocation5_spill] sm:$0xff] %v13871_v18  ;;  %v13874_v53 = vsel %vm9115_vm10, %v9088_v20, %v10502_v51  ;;  %10604 = vrot.lane.b32.xlu1 %v13736_v23, %s10911_s17  ;;  %v14893_v35 = vrot.slane %v13596_v6, %v12532_v0  ;;  %v8222_v20 = vrot.slane %v13838_v40, 1 }
 0x3cf   : > { %14892 = vst [vmem:[#allocation14_spill] sm:$0xff] %v13874_v53  ;;  %v7825_v2 = vrot.slane %v7811_v9, %v12669_v29  ;;  %v13884_v49 = vpack.i.bf16 %v13874_v53, %v13871_v18  ;;  %v8802_v44 = vcombine.low %v7182_v34, %v7183_v54  ;;  %v5131_v50 = vcombine.high %v5123_v37, %v5123_v37  ;;  %v10510_v28 = vpop.permute.xlu1 %10509 }
 0x3d0   : > { %v7185_v16 = vmul.f32 %v14893_v35, %v5115_v15  ;;  %v8801_v9 = vcombine.low %v13807_v30, %v13823_v45  ;;  %v8224_v55 = vrot.slane %v8124_v19, 1  ;;  %v7827_v34 = vcombine.low %v7183_v54, %v7184_v46 }
 0x3d1   : > { %v13897_v35 = vcombine.low %v7818_v17, %v7825_v2  ;;  %v8221_v48 = vrot.slane %v13857_v25, 1  ;;  %v5130_v18 = vrot.slane %v5116_v47, %v12669_v29  ;;  %v14894_v23 = vrot.slane %v13596_v6, %v12536_v14  ;;  %v10515_v19 = vpop.permute.xlu0 %10514  ;;  %v4477_v6 = vpop.f32.mrb[68].mxu1 }
 0x3d2   : > { %10619 = vrot.lane.b32.xlu1 %v13884_v49, %s10911_s17  ;;  %v8818_v51 = vcombine.low %v7184_v46, %v7185_v16  ;;  %v14895_v30 = vrot.slane %v13625_v61, %v12526_v38  ;;  %v8816_v17 = vrot.slane %v8802_v44, %v12669_v29  ;;  %v14896_v54 = vcombine.low %v13781_v1, %v13786_v63 }
 0x3d3   : > { %v7186_v15 = vmul.f32 %v14894_v23, %v5123_v37  ;;  %v14897_v2 = vcombine.low %v13795_v26, %v13801_v59  ;;  %v8223_v47 = vsel %vm1059_vm0, %v8221_v48, %v8222_v20  ;;  %v8225_v53 = vsel %vm1059_vm0, %v8222_v20, %v8224_v55 }
 0x3d4   : > { %v7187_v45 = vmul.f32 %v14895_v30, %v5131_v50  ;;  %v10512_v37 = vunpack.i.h.bf16 %v10510_v28  ;;  %v10517_v23 = vunpack.i.h.bf16 %v10515_v19  ;;  %v10516_v42 = vunpack.i.l.bf16 %v10515_v19  ;;  %v10295_v50 = vpop.f32.mrb[69].mxu1 }
 0x3d5   : > { %v10623_v46 = vpack.i.bf16 %v14897_v2, %v14896_v54  ;;  %v7828_v61 = vcombine.low %v7185_v16, %v7186_v15  ;;  %v10511_v30 = vunpack.i.l.bf16 %v10510_v28  ;;  %v7835_v44 = vrot.slane %v7827_v34, %v12669_v29  ;;  %v13919_v1 = vpop.f32.mrb[70].mxu1 }
 0x3d6   : > { %v8819_v13 = vcombine.low %v7186_v15, %v7187_v45  ;;  %v10613_v25 = vpack.i.bf16 %v8225_v53, %v8223_v47  ;;  %v9090_v26 = vsel %vm4243_vm9, %v13201_v57, %v10517_v23  ;;  %v9089_v63 = vsel %vm4243_vm9, %v13178_v33, %v10516_v42  ;;  %v10296_v16 = vpop.f32.mrb[71].mxu1 }
 0x3d7   : > { %v8826_v59 = vrot.slane %v8818_v51, %v12669_v29  ;;  %v7842_v48 = vrot.slane %v7828_v61, %v12669_v29  ;;  %10624 = vrot.lane.b32.xlu1 %v10623_v46, %s10911_s17  ;;  %v13929_v20 = vsel %vm9115_vm10, %v9090_v26, %v10512_v37  ;;  %v13932_v53 = vsel %vm9115_vm10, %v9089_v63, %v10511_v30  ;;  %v13968_v61 = vpop.f32.mrb[72].mxu1  ;;  %v13970_v30 = vpop.permute.xlu0 %5691 }
 0x3d8   : > { %14898 = vst [vmem:[#allocation8_spill] sm:$0xff] %v13929_v20  ;;  %14899 = vst [vmem:[#allocation9_spill] sm:$0xff] %v13932_v53  ;;  %v5132_v15 = vcombine.high %v5130_v18, %v5130_v18  ;;  %v8833_v55 = vrot.slane %v8819_v13, %v12669_v29  ;;  %10614 = vrot.lane.b32.xlu0 %v10613_v25, %s10912_s18  ;;  %v6703_v33 = vrot.slane %v13746_v4, %v12536_v14  ;;  %v10299_v63 = vpop.f32.mrb[73].mxu1 }
 0x3d9   : > { %v13940_v42 = vcombine.low %v7835_v44, %v7842_v48  ;;  %v8131_v51 = vrot.slane %v7187_v45, %v12669_v29  ;;  %v8809_v25 = vrot.slane %v8801_v9, %v12669_v29  ;;  %v10638_v54 = vpack.i.bf16 %v13929_v20, %v13932_v53  ;;  %v13957_v45 = vld [vmem:[%s14674_s6] ss:$0 sm:$0xff] }
 0x3da   : > { %v4470_v2 = vadd.f32 %v13957_v45, %v13846_v36  ;;  %v14900_v46 = vrot.slane %v13728_v43, %v12529_v10  ;;  %v4473_v9 = vadd.f32 %v13957_v45, %v13862_v22  ;;  %v8834_v23 = vcombine.low %v8826_v59, %v8833_v55 }
 0x3db   : > { %v8817_v37 = vcombine.low %v8809_v25, %v8816_v17  ;;  %v8229_v50 = vrot.slane %v8131_v51, 1  ;;  %10639 = vrot.lane.b32.xlu1 %v10638_v54, %s10911_s17  ;;  %v8226_v44 = vrot.slane %v13897_v35, 1  ;;  %v8227_v26 = vrot.slane %v13940_v42, 1 }
 0x3dc   : > { %v13964_v47 = vmul.f32 %v14900_v46, %v5132_v15  ;;  %10629 = vrot.lane.b32.xlu0 %v13884_v49, %s10913_s20  ;;  %v4539_v36 = vmax.f32 %v4470_v2, 0.0  ;;  %v14901_v22 = vrot.slane %v13728_v43, %v12526_v38  ;;  %v4540_v59 = vmax.f32 %v4473_v9, 0.0  ;;  %v13981_v15 = vpop.f32.mrb[74].mxu1 }
 0x3dd   : > { %v10643_v48 = vpack.i.bf16 %v8834_v23, %v8817_v37  ;;  %v4478_v16 = vadd.f32 %v13957_v45, %v4477_v6  ;;  %v8228_v49 = vsel %vm1059_vm0, %v8226_v44, %v8227_v26  ;;  %v8230_v25 = vsel %vm1059_vm0, %v8227_v26, %v8229_v50  ;;  %v10300_v2 = vpop.f32.mrb[75].mxu1  ;;  %v13990_v37 = vpop.permute.xlu1 %5687 }
 0x3de   : > { %v7188_v17 = vmul.f32 %v14901_v22, %v5130_v18  ;;  %v5133_v55 = vcombine.high %v4539_v36, %v4539_v36  ;;  %v5140_v51 = vrot.slane %v4539_v36, %v12669_v29  ;;  %v6724_v46 = vrot.slane %v13886_v32, %v12529_v10 }
 0x3df   : > { %v5150_v18 = vcombine.high %v4540_v59, %v4540_v59  ;;  %v5157_v9 = vrot.slane %v4540_v59, %v12669_v29  ;;  %v14902_v36 = vrot.slane %v13728_v43, %v12532_v0  ;;  %10644 = vrot.lane.b32.xlu1 %v10643_v48, %s10911_s17  ;;  %v10633_v50 = vpack.i.bf16 %v8230_v25, %v8228_v49 }
 0x3e0   : > { %v7844_v63 = vcombine.low %v7188_v17, %v13964_v47  ;;  %v5147_v6 = vrot.slane %v5133_v55, %v12669_v29  ;;  %v5148_v23 = vcombine.high %v5140_v51, %v5140_v51  ;;  %v6731_v26 = vrot.slane %v13886_v32, %v12532_v0 }
 0x3e1   : > { %v13996_v44 = vmul.f32 %v14902_v36, %v5140_v51  ;;  %v6738_v22 = vrot.slane %v13886_v32, %v12536_v14  ;;  %v5165_v17 = vcombine.high %v5157_v9, %v5157_v9  ;;  %v4541_v59 = vmax.f32 %v4478_v16, 0.0  ;;  %v10520_v2 = vpop.permute.xlu0 %10519  ;;  %10634 = vrot.lane.b32.xlu0 %v10633_v50, %s10912_s18 }
 0x3e2   : > { %v5149_v13 = vcombine.high %v5147_v6, %v5147_v6  ;;  %v14903_v55 = vrot.slane %v13728_v43, %v12536_v14  ;;  %v5164_v48 = vrot.slane %v5150_v18, %v12669_v29  ;;  %v7852_v49 = vrot.slane %v7844_v63, %v12669_v29 }
 0x3e3   : > { %v14904_v25 = vrot.slane %v13746_v4, %v12532_v0  ;;  %v14016_v16 = vmul.f32 %v6703_v33, %v5165_v17  ;;  %v4481_v43 = vadd.f32 %v13957_v45, %v13919_v1  ;;  %v14906_v18 = vrot.slane %v13746_v4, %v12529_v10 }
 0x3e4   : > { %v7191_v34 = vmul.f32 %v14903_v55, %v5148_v23  ;;  %v14905_v23 = vrot.slane %v13746_v4, %v12526_v38  ;;  %v10522_v51 = vunpack.i.h.bf16 %v10520_v2  ;;  %v5174_v33 = vrot.slane %v4541_v59, %v12669_v29 }
 0x3e5   : > { %v14014_v36 = vmul.f32 %v14904_v25, %v5157_v9  ;;  %v7193_v50 = vmul.f32 %v14906_v18, %v5149_v13  ;;  %v5167_v25 = vcombine.high %v4541_v59, %v4541_v59  ;;  %v5166_v19 = vcombine.high %v5164_v48, %v5164_v48  ;;  %10649 = vrot.lane.b32.xlu0 %v10638_v54, %s10913_s20 }
 0x3e6   : > { %v7192_v55 = vmul.f32 %v14905_v23, %v5147_v6  ;;  %v7845_v63 = vcombine.low %v13996_v44, %v7191_v34  ;;  %v10521_v4 = vunpack.i.l.bf16 %v10520_v2  ;;  %v14907_v59 = vrot.slane %v13831_v3, %v12526_v38 }
 0x3e7   : > { %v7862_v9 = vcombine.low %v14014_v36, %v14016_v16  ;;  %v10525_v17 = vpop.permute.xlu1 %10524  ;;  %v8852_v6 = vcombine.low %v7193_v50, %v14014_v36  ;;  %v5181_v2 = vrot.slane %v5167_v25, %v12669_v29  ;;  %v14910_v3 = vrot.slane %v13886_v32, %v12526_v38 }
 0x3e8   : > { %v7859_v1 = vrot.slane %v7845_v63, %v12669_v29  ;;  %v7861_v57 = vcombine.low %v7192_v55, %v7193_v50  ;;  %v10527_v13 = vunpack.i.h.bf16 %v10525_v17  ;;  %v10526_v23 = vunpack.i.l.bf16 %v10525_v17 }
 0x3e9   : > { %v7876_v18 = vrot.slane %v7862_v9, %v12669_v29  ;;  %v8836_v20 = vcombine.low %v7191_v34, %v7192_v55  ;;  %v14040_v63 = vmul.f32 %v14907_v59, %v5164_v48  ;;  %v5182_v50 = vcombine.high %v5174_v33, %v5174_v33 }
 0x3ea   : > { %v14034_v28 = vcombine.low %v7852_v49, %v7859_v1  ;;  %v7869_v53 = vrot.slane %v7861_v57, %v12669_v29  ;;  %v9092_v36 = vsel %vm4243_vm9, %v13293_v41, %v10527_v13  ;;  %v9091_v54 = vsel %vm4243_vm9, %v13280_v56, %v10526_v23 }
 0x3eb   : > { %v14048_v49 = vsel %vm9115_vm10, %v9091_v54, %v10521_v4  ;;  %v14051_v57 = vsel %vm9115_vm10, %v9092_v36, %v10522_v51  ;;  %v7197_v48 = vmul.f32 %v14910_v3, %v5166_v19  ;;  %v5183_v55 = vcombine.high %v5181_v2, %v5181_v2 }
 0x3ec   : > { %14908 = vst [vmem:[#allocation13_spill] sm:$0xff] %v14048_v49  ;;  %14909 = vst [vmem:[#allocation10_spill] sm:$0xff] %v14051_v57  ;;  %v14053_v34 = vcombine.low %v7869_v53, %v7876_v18  ;;  %v14058_v41 = vmul.f32 %v6724_v46, %v5174_v33  ;;  %v14060_v9 = vmul.f32 %v6731_v26, %v5182_v50  ;;  %v4542_v17 = vmax.f32 %v4481_v43, 0.0  ;;  %v14076_v46 = vpop.permute.xlu0 %5695  ;;  %v14081_v33 = vpop.f32.mrb[76].mxu1 }
 0x3ed   : > { %v14062_v56 = vmul.f32 %v6738_v22, %v5181_v2  ;;  %v6766_v25 = vrot.slane %v13790_v52, %v12536_v14  ;;  %v6773_v51 = vrot.slane %v13859_v12, %v12526_v38  ;;  %v14070_v53 = vpack.i.bf16 %v14051_v57, %v14048_v49  ;;  %v10303_v13 = vpop.f32.mrb[77].mxu1 }
 0x3ee   : > { %v8853_v19 = vcombine.low %v14016_v16, %v14040_v63  ;;  %v7878_v26 = vcombine.low %v7197_v48, %v14058_v41  ;;  %v14911_v43 = vrot.slane %v13790_v52, %v12526_v38  ;;  %v5184_v4 = vcombine.high %v4542_v17, %v4542_v17  ;;  %v14098_v54 = vpop.f32.mrb[78].mxu1 }
 0x3ef   : > { %v7879_v22 = vcombine.low %v14060_v9, %v14062_v56  ;;  %v5191_v16 = vrot.slane %v4542_v17, %v12669_v29  ;;  %10659 = vrot.lane.b32.xlu1 %v14070_v53, %s10911_s17  ;;  %v8850_v18 = vrot.slane %v8836_v20, %v12669_v29  ;;  %v14912_v48 = vrot.slane %v13790_v52, %v12529_v10  ;;  %v10304_v17 = vpop.f32.mrb[79].mxu1 }
 0x3f0   : > { %v14088_v1 = vmul.f32 %v14911_v43, %v5183_v55  ;;  %v7886_v59 = vrot.slane %v7878_v26, %v12669_v29  ;;  %v5198_v50 = vrot.slane %v5184_v4, %v12669_v29  ;;  %v14913_v20 = vcombine.low %v13964_v47, %v13996_v44  ;;  %v10535_v44 = vpop.permute.xlu0 %10534 }
 0x3f1   : > { %v7893_v36 = vrot.slane %v7879_v22, %v12669_v29  ;;  %v5199_v3 = vcombine.high %v5191_v16, %v5191_v16  ;;  %v14106_v55 = vmul.f32 %v14912_v48, %v5191_v16  ;;  %v8860_v22 = vrot.slane %v8852_v6, %v12669_v29 }
 0x3f2   : > { %v8843_v26 = vrot.slane %v14913_v20, %v12669_v29  ;;  %v8867_v43 = vrot.slane %v8853_v19, %v12669_v29  ;;  %v14914_v2 = vrot.slane %v13790_v52, %v12532_v0  ;;  %v14121_v48 = vmul.f32 %v6766_v25, %v5198_v50 }
 0x3f3   : > { %v14114_v13 = vcombine.low %v7886_v59, %v7893_v36  ;;  %v7895_v17 = vcombine.low %v14088_v1, %v14106_v55  ;;  %v5200_v47 = vcombine.high %v5198_v50, %v5198_v50  ;;  %v4486_v6 = vadd.f32 %v13957_v45, %v13968_v61 }
 0x3f4   : > { %v7203_v16 = vmul.f32 %v14914_v2, %v5199_v3  ;;  %v4489_v19 = vadd.f32 %v13957_v45, %v13981_v15  ;;  %v8851_v59 = vcombine.low %v8843_v26, %v8850_v18  ;;  %v6787_v36 = vrot.slane %v13990_v37, %v12529_v10  ;;  %v10530_v26 = vpop.permute.xlu1 %10529 }
 0x3f5   : > { %v6794_v52 = vrot.slane %v13990_v37, %v12532_v0  ;;  %v7903_v2 = vrot.slane %v7895_v17, %v12669_v29  ;;  %v6801_v50 = vrot.slane %v13990_v37, %v12536_v14  ;;  %v4543_v3 = vmax.f32 %v4486_v6, 0.0 }
 0x3f6   : > { %v7896_v25 = vcombine.low %v7203_v16, %v14121_v48  ;;  %v4544_v20 = vmax.f32 %v4489_v19, 0.0  ;;  %v8868_v61 = vcombine.low %v8860_v22, %v8867_v43  ;;  %v8138_v15 = vrot.slane %v14040_v63, %v12669_v29 }
 0x3f7   : > { %v10537_v4 = vunpack.i.h.bf16 %v10535_v44  ;;  %v10536_v23 = vunpack.i.l.bf16 %v10535_v44  ;;  %v14140_v32 = vmul.f32 %v6773_v51, %v5200_v47  ;;  %v5201_v12 = vcombine.high %v4543_v3, %v4543_v3 }
 0x3f8   : > { %v7910_v18 = vrot.slane %v7896_v25, %v12669_v29  ;;  %v5208_v49 = vrot.slane %v4543_v3, %v12669_v29  ;;  %v5218_v17 = vcombine.high %v4544_v20, %v4544_v20  ;;  %v8869_v57 = vcombine.low %v14058_v41, %v14060_v9 }
 0x3f9   : > { %v8870_v22 = vcombine.low %v14062_v56, %v14088_v1  ;;  %v10663_v63 = vpack.i.bf16 %v8868_v61, %v8851_v59  ;;  %v6836_v6 = vrot.slane %v14076_v46, %v12526_v38  ;;  %v5215_v44 = vrot.slane %v5201_v12, %v12669_v29  ;;  %v14159_v56 = vpop.permute.xlu1 %5706 }
 0x3fa   : > { %v14147_v43 = vcombine.low %v7903_v2, %v7910_v18  ;;  %v5225_v51 = vrot.slane %v4544_v20, %v12669_v29  ;;  %v5232_v47 = vrot.slane %v5218_v17, %v12669_v29  ;;  %v8234_v19 = vrot.slane %v8138_v15, 1 }
 0x3fb   : > { %v10532_v25 = vunpack.i.h.bf16 %v10530_v26  ;;  %v9094_v41 = vsel %vm4243_vm9, %v13356_v58, %v10537_v4  ;;  %v9093_v9 = vsel %vm4243_vm9, %v13328_v21, %v10536_v23  ;;  %10664 = vrot.lane.b32.xlu1 %v10663_v63, %s10911_s17  ;;  %v8145_v46 = vrot.slane %v14140_v32, %v12669_v29 }
 0x3fc   : > { %v8886_v12 = vcombine.low %v14106_v55, %v7203_v16  ;;  %v5216_v1 = vcombine.high %v5208_v49, %v5208_v49  ;;  %v5217_v59 = vcombine.high %v5215_v44, %v5215_v44  ;;  %v14165_v2 = vrot.slane %v8869_v57, %v12669_v29 }
 0x3fd   : > { %v14168_v3 = vrot.slane %v8870_v22, %v12669_v29  ;;  %v10531_v58 = vunpack.i.l.bf16 %v10530_v26  ;;  %v4494_v21 = vadd.f32 %v13957_v45, %v14081_v33  ;;  %v14173_v23 = vsel %vm9115_vm10, %v9094_v41, %v10532_v25 }
 0x3fe   : > { %14915 = vst [vmem:[#allocation11_spill] sm:$0xff] %v14173_v23  ;;  %v7209_v4 = vmul.f32 %v6801_v50, %v5217_v59  ;;  %v5233_v20 = vcombine.high %v5225_v51, %v5225_v51  ;;  %v5234_v61 = vcombine.high %v5232_v47, %v5232_v47  ;;  %v14917_v57 = vrot.slane %v13970_v30, %v12526_v38 }
 0x3ff   : > { %v14176_v55 = vsel %vm9115_vm10, %v9093_v9, %v10531_v58  ;;  %v4545_v18 = vmax.f32 %v4494_v21, 0.0  ;;  %v14183_v26 = vrot.slane %v8145_v46, 1  ;;  %v8887_v33 = vcombine.low %v14121_v48, %v14140_v32  ;;  %v14193_v9 = vpop.permute.xlu1 %5710 }
 0x400   : > { %14916 = vst [vmem:[#allocation18_spill] sm:$0xff] %v14176_v55  ;;  %v7210_v16 = vmul.f32 %v14917_v57, %v5225_v51  ;;  %v14188_v50 = vrot.slane %v8886_v12, %v12669_v29  ;;  %v7207_v17 = vmul.f32 %v6787_v36, %v5216_v1  ;;  %v14918_v22 = vrot.slane %v13990_v37, %v12526_v38  ;;  %v5703_v1 = vpop.permute.xlu0 %5702 }
 0x401   : > { %v7208_v25 = vmul.f32 %v6794_v52, %v5215_v44  ;;  %v5235_v51 = vcombine.high %v4545_v18, %v4545_v18  ;;  %v14919_v46 = vrot.slane %v13970_v30, %v12529_v10  ;;  %v14920_v32 = vrot.slane %v13970_v30, %v12536_v14 }
 0x402   : > { %v7206_v63 = vmul.f32 %v14918_v22, %v5208_v49  ;;  %v8904_v41 = vcombine.low %v7209_v4, %v7210_v16  ;;  %v5242_v36 = vrot.slane %v4545_v18, %v12669_v29  ;;  %v8232_v12 = vrot.slane %v14053_v34, 1 }
 0x403   : > { %v14198_v59 = vmul.f32 %v14919_v46, %v5233_v20  ;;  %v7213_v48 = vmul.f32 %v14920_v32, %v5234_v61  ;;  %v5249_v37 = vrot.slane %v5235_v51, %v12669_v29  ;;  %v8231_v49 = vrot.slane %v14034_v28, 1 }
 0x404   : > { %v14209_v52 = vpack.i.bf16 %v14173_v23, %v14176_v55  ;;  %v4497_v44 = vadd.f32 %v13957_v45, %v14098_v54  ;;  %v7912_v58 = vcombine.low %v7206_v63, %v7207_v17  ;;  %v7913_v21 = vcombine.low %v7208_v25, %v7209_v4 }
 0x405   : > { %v14921_v20 = vrot.slane %v13970_v30, %v12532_v0  ;;  %v14216_v57 = vmul.f32 %v6836_v6, %v5242_v36  ;;  %v5250_v18 = vcombine.high %v5242_v36, %v5242_v36  ;;  %v8233_v22 = vsel %vm1059_vm0, %v8231_v49, %v8232_v12  ;;  %v10550_v36 = vpop.permute.xlu1 %10549 }
 0x406   : > { %v8235_v51 = vsel %vm1059_vm0, %v8232_v12, %v8234_v19  ;;  %10679 = vrot.lane.b32.xlu1 %v14209_v52, %s10911_s17  ;;  %v14222_v46 = vmax.f32 %v4497_v44, 0.0  ;;  %v8903_v54 = vcombine.low %v7207_v17, %v7208_v25  ;;  %v5251_v32 = vcombine.high %v5249_v37, %v5249_v37 }
 0x407   : > { %v7212_v61 = vmul.f32 %v14921_v20, %v5232_v47  ;;  %v8921_v4 = vcombine.low %v7213_v48, %v14216_v57  ;;  %v10653_v63 = vpack.i.bf16 %v8235_v51, %v8233_v22  ;;  %v6843_v6 = vrot.slane %v5703_v1, %v12526_v38  ;;  %v10540_v22 = vpop.permute.xlu0 %10539 }
 0x408   : > { %v5259_v30 = vrot.slane %v14222_v46, %v12669_v29  ;;  %v6850_v47 = vrot.slane %v5703_v1, %v12529_v10  ;;  %v8901_v19 = vrot.slane %v8887_v33, %v12669_v29  ;;  %v7929_v12 = vcombine.low %v7210_v16, %v14198_v59 }
 0x409   : > { %v7930_v15 = vcombine.low %v7212_v61, %v7213_v48  ;;  %10654 = vrot.lane.b32.xlu0 %v10653_v63, %s10912_s18  ;;  %v6857_v17 = vrot.slane %v5703_v1, %v12532_v0  ;;  %v6864_v25 = vrot.slane %v5703_v1, %v12536_v14  ;;  %v7927_v48 = vrot.slane %v7913_v21, %v12669_v29 }
 0x40a   : > { %v8920_v49 = vcombine.low %v14198_v59, %v7212_v61  ;;  %v7215_v44 = vmul.f32 %v6843_v6, %v5250_v18  ;;  %v14236_v20 = vmul.f32 %v6850_v47, %v5249_v37  ;;  %v10552_v33 = vunpack.i.h.bf16 %v10550_v36 }
 0x40b   : > { %v7217_v51 = vmul.f32 %v6857_v17, %v5251_v32  ;;  %v14238_v55 = vmul.f32 %v6864_v25, %v5259_v30  ;;  %v7920_v16 = vrot.slane %v7912_v58, %v12669_v29  ;;  %v8911_v63 = vrot.slane %v8903_v54, %v12669_v29  ;;  %v14264_v17 = vpop.permute.xlu0 %10544 }
 0x40c   : > { %v7944_v23 = vrot.slane %v7930_v15, %v12669_v29  ;;  %v7946_v1 = vcombine.low %v7215_v44, %v14236_v20  ;;  %v7937_v21 = vrot.slane %v7929_v12, %v12669_v29  ;;  %v8918_v59 = vrot.slane %v8904_v41, %v12669_v29 }
 0x40d   : > { %v7947_v37 = vcombine.low %v7217_v51, %v14238_v55  ;;  %10669 = vrot.lane.b32.xlu0 %v14070_v53, %s10913_s20  ;;  %v10551_v61 = vunpack.i.l.bf16 %v10550_v36  ;;  %v14249_v18 = vcombine.low %v7920_v16, %v7927_v48  ;;  %v5267_v32 = vcombine.high %v5259_v30, %v5259_v30  ;;  %v14275_v48 = vpop.permute.xlu1 %10554 }
 0x40e   : > { %v7954_v58 = vrot.slane %v7946_v1, %v12669_v29  ;;  %v9096_v15 = vsel %vm4243_vm9, %v13472_v31, %v10552_v33  ;;  %v10542_v41 = vunpack.i.h.bf16 %v10540_v22  ;;  %v10541_v47 = vunpack.i.l.bf16 %v10540_v22 }
 0x40f   : > { %v7961_v54 = vrot.slane %v7947_v37, %v12669_v29  ;;  %v9095_v6 = vsel %vm4243_vm9, %v13466_v5, %v10551_v61  ;;  %v14257_v12 = vcombine.low %v7937_v21, %v7944_v23  ;;  %v8152_v53 = vrot.slane %v14216_v57, %v12669_v29  ;;  %v10565_v1 = vpop.permute.xlu0 %10564 }
 0x410   : > { %v8885_v30 = vcombine.low %v14165_v2, %v14168_v3  ;;  %v8902_v36 = vcombine.low %v14188_v50, %v8901_v19  ;;  %v8935_v31 = vrot.slane %v8921_v4, %v12669_v29  ;;  %v14270_v5 = vsel %vm9115_vm10, %v9096_v15, %v10542_v41 }
 0x411   : > { %v14267_v25 = vcombine.low %v7954_v58, %v7961_v54  ;;  %v14273_v23 = vsel %vm9115_vm10, %v9095_v6, %v10541_v47  ;;  %v14922_v57 = vrot.slane %v14159_v56, %v12526_v38  ;;  %v8236_v50 = vrot.slane %v14114_v13, 1 }
 0x412   : > { %v10683_v3 = vpack.i.bf16 %v8902_v36, %v8885_v30  ;;  %v8237_v4 = vrot.slane %v14147_v43, 1  ;;  %v8928_v19 = vrot.slane %v8920_v49, %v12669_v29  ;;  %v10698_v33 = vpack.i.bf16 %v14270_v5, %v14273_v23 }
 0x413   : > { %v14280_v2 = vmul.f32 %v14922_v57, %v5267_v32  ;;  %v8919_v16 = vcombine.low %v8911_v63, %v8918_v59  ;;  %v8937_v21 = vcombine.low %v14236_v20, %v7217_v51  ;;  %v10560_v32 = vpop.permute.xlu1 %10559  ;;  %v8244_v58 = vrot.slane %v8152_v53, 1 }
 0x414   : > { %10684 = vrot.lane.b32.xlu1 %v10683_v3, %s10911_s17  ;;  %v8238_v44 = vsel %vm1059_vm0, %v8236_v50, %v8237_v4  ;;  %v8240_v22 = vsel %vm1059_vm0, %v8237_v4, %v14183_v26  ;;  %v8936_v61 = vcombine.low %v8928_v19, %v8935_v31  ;;  %v8241_v15 = vrot.slane %v14249_v18, 1 }
 0x415   : > { %v10673_v37 = vpack.i.bf16 %v8240_v22, %v8238_v44  ;;  %v8938_v49 = vcombine.low %v14238_v55, %v14280_v2  ;;  %v8242_v54 = vrot.slane %v14257_v12, 1  ;;  %v10567_v6 = vunpack.i.h.bf16 %v10565_v1 }
 0x416   : > { %v10703_v26 = vpack.i.bf16 %v8936_v61, %v8919_v16  ;;  %v10566_v41 = vunpack.i.l.bf16 %v10565_v1  ;;  %v10562_v63 = vunpack.i.h.bf16 %v10560_v32  ;;  %v10561_v59 = vunpack.i.l.bf16 %v10560_v32 }
 0x417   : > { %10674 = vrot.lane.b32.xlu0 %v10673_v37, %s10912_s18  ;;  %v8243_v20 = vsel %vm1059_vm0, %v8241_v15, %v8242_v54  ;;  %v8245_v51 = vsel %vm1059_vm0, %v8242_v54, %v8244_v58  ;;  %v9098_v55 = vsel %vm4243_vm9, %v13500_v11, %v10567_v6  ;;  %v14305_v53 = vrot.slane %v8937_v21, %v12669_v29 }
 0x418   : > { %10699 = vrot.lane.b32.xlu1 %v10698_v33, %s10911_s17  ;;  %v9097_v47 = vsel %vm4243_vm9, %v13487_v8, %v10566_v41  ;;  %v14308_v30 = vsel %vm9115_vm10, %v9098_v55, %v10562_v63  ;;  %v14314_v31 = vrot.slane %v8938_v49, %v12669_v29  ;;  %v10693_v57 = vpack.i.bf16 %v8245_v51, %v8243_v20 }
 0x419   : > { %v14311_v36 = vsel %vm9115_vm10, %v9097_v47, %v10561_v59  ;;  %v5252_v3 = vcombine.high %v14222_v46, %v14222_v46  ;;  %v6885_v44 = vrot.slane %v14159_v56, %v12532_v0  ;;  %v10546_v1 = vunpack.i.l.bf16 %v14264_v17 }
 0x41a   : > { %v14321_v8 = vpack.i.bf16 %v14308_v30, %v14311_v36  ;;  %v8953_v11 = vcombine.low %v14305_v53, %v14314_v31  ;;  %v10547_v37 = vunpack.i.h.bf16 %v14264_v17  ;;  %v10556_v15 = vunpack.i.l.bf16 %v14275_v48 }
 0x41b   : > { %10689 = vrot.lane.b32.xlu0 %v14209_v52, %s10913_s20  ;;  %v6878_v52 = vrot.slane %v14159_v56, %v12529_v10  ;;  %v5266_v50 = vrot.slane %v5252_v3, %v12669_v29  ;;  %v9079_v17 = vsel %vm4243_vm9, %v14866_v27, %v10546_v1 }
 0x41c   : > { %10704 = vrot.lane.b32.xlu1 %v10703_v26, %s10911_s17  ;;  %v9080_v26 = vsel %vm4243_vm9, %v13336_v62, %v10547_v37 }
 0x41d   : > { %v7220_v4 = vmul.f32 %v6878_v52, %v5266_v50  ;;  %v5268_v22 = vcombine.high %v5266_v50, %v5266_v50 }
 0x41f   : > { %10694 = vrot.lane.b32.xlu0 %v10693_v57, %s10912_s18  ;;  %v7963_v58 = vcombine.low %v14280_v2, %v7220_v4  ;;  %v7221_v49 = vmul.f32 %v6885_v44, %v5268_v22 }
 0x420   : > { %10719 = vrot.lane.b32.xlu1 %v14321_v8, %s10911_s17  ;;  %v4501_v19 = vpop.f32.mrb[80].mxu1 }
 0x421   : > { %v4502_v46 = vadd.f32 %v13957_v45, %v4501_v19  ;;  %v10307_v16 = vpop.f32.mrb[81].mxu1  ;;  %v6899_v45 = vrot.slane %v14193_v9, %v12526_v38  ;;  %v8954_v51 = vcombine.low %v7220_v4, %v7221_v49  ;;  %v9116_v9 = vsel %vm9115_vm10, %v9079_v17, %v10556_v15  ;;  %v14923_v17 = vld [vmem:[#allocation3_spill] sm:$0xff] }
 0x422   : > { %v4504_v21 = vpop.f32.mrb[82].mxu1 }
 0x423   : > { %10709 = vrot.lane.b32.xlu0 %v10698_v33, %s10913_s20  ;;  %v4547_v61 = vmax.f32 %v4502_v46, 0.0  ;;  %v10308_v32 = vpop.f32.mrb[83].mxu1  ;;  %v6892_v33 = vrot.slane %v14159_v56, %v12536_v14  ;;  %v7971_v14 = vrot.slane %v7963_v58, %v12669_v29  ;;  %v10557_v56 = vunpack.i.h.bf16 %v14275_v48 }
 0x424   : > { %v8962_v46 = vrot.slane %v8954_v51, %v12669_v29  ;;  %v8246_v32 = vrot.slane %v14267_v25, 1 }
 0x425   : > { %v10570_v10 = vpop.permute.xlu0 %10569  ;;  %v5275_v0 = vrot.slane %v4547_v61, %v12669_v29  ;;  %v9117_v27 = vsel %vm9115_vm10, %v9080_v26, %v10557_v56 }
 0x426   : > { %v10571_v54 = vunpack.i.l.bf16 %v10570_v10  ;;  %v10572_v41 = vunpack.i.h.bf16 %v10570_v10 }
 0x427   : > { %v5276_v2 = vcombine.high %v5275_v0, %v5275_v0  ;;  %v7222_v6 = vmul.f32 %v6892_v33, %v5275_v0 }
 0x428   : > { %v9379_v55 = vsel %vm9378_vm11, %v9116_v9, %v10571_v54  ;;  %v9380_v48 = vsel %vm9378_vm11, %v9117_v27, %v10572_v41 }
 0x429   : > { %v7223_v63 = vmul.f32 %v6899_v45, %v5276_v2  ;;  %v7964_v38 = vcombine.low %v7221_v49, %v7222_v6  ;;  %v10575_v59 = vpop.permute.xlu0 %10574  ;;  %v10311_v33 = vpack.c.bf16 %v9380_v48, %v9379_v55 }
 0x42a   : > { %v10577_v50 = vunpack.i.h.bf16 %v10575_v59  ;;  %v10576_v21 = vunpack.i.l.bf16 %v10575_v59 }
 0x42b   : > { %v10580_v20 = vpop.permute.xlu1 %10579  ;;  %v7978_v57 = vrot.slane %v7964_v38, %v12669_v29  ;;  %v8159_v3 = vrot.slane %v7223_v63, %v12669_v29  ;;  %v8955_v52 = vcombine.low %v7222_v6, %v7223_v63 }
 0x42c   : > { %v10582_v47 = vunpack.i.h.bf16 %v10580_v20  ;;  %v10581_v62 = vunpack.i.l.bf16 %v10580_v20  ;;  %v9100_v15 = vsel %vm4243_vm9, %v13632_v24, %v10577_v50 }
 0x42d   : > { %v14363_v16 = vcombine.low %v7971_v14, %v7978_v57  ;;  %v8969_v1 = vrot.slane %v8955_v52, %v12669_v29  ;;  %v8249_v58 = vrot.slane %v8159_v3, 1  ;;  %v10590_v49 = vpop.permute.xlu0 %10589 }
 0x42e   : > { %v14358_v4 = vpack.c.bf16 %v10582_v47, %v10581_v62  ;;  %v9411_v44 = vsel %vm9115_vm10, %v10571_v54, %v10581_v62  ;;  %v9412_v22 = vsel %vm9115_vm10, %v10572_v41, %v10582_v47  ;;  %v9099_v54 = vsel %vm4243_vm9, %v14923_v17, %v10576_v21  ;;  %v14925_v21 = vld [vmem:[#allocation17_spill] sm:$0xff] }
 0x42f   : > { %v10585_v19 = vpop.permute.xlu1 %10584  ;;  %v10309_v10 = vpack.c.bf16 %v9412_v22, %v9411_v44  ;;  %v8970_v0 = vcombine.low %v8962_v46, %v8969_v1  ;;  %v8247_v45 = vrot.slane %v14363_v16, 1  ;;  %v10592_v31 = vunpack.i.h.bf16 %v10590_v49 }
 0x430   : > { %v10587_v37 = vunpack.i.h.bf16 %v10585_v19  ;;  %v10586_v61 = vunpack.i.l.bf16 %v10585_v19 }
 0x431   : > { %10310 = vmatprep.subr.bf16.mxu0 %v10309_v10  ;;  %v10723_v26 = vpack.i.bf16 %v8970_v0, %v8953_v11  ;;  %v8248_v2 = vsel %vm1059_vm0, %v8246_v32, %v8247_v45  ;;  %v8250_v6 = vsel %vm1059_vm0, %v8247_v45, %v8249_v58  ;;  %v10591_v11 = vunpack.i.l.bf16 %v10590_v49 }
 0x432   : > { %10312 = vmatpush1.bf16.xpose.msra.mxu0 %v10311_v33  ;;  %v14378_v41 = vsel %vm9115_vm10, %v9100_v15, %v10587_v37  ;;  %v14381_v14 = vsel %vm9115_vm10, %v9099_v54, %v10586_v61  ;;  %v10713_v24 = vpack.i.bf16 %v8250_v6, %v8248_v2  ;;  %v9382_v27 = vsel %vm9378_vm11, %v13694_v39, %v10592_v31  ;;  %v14926_v61 = vld [vmem:[#allocation4_spill] sm:$0xff] }
 0x433   : > { %10724 = vrot.lane.b32.xlu1 %v10723_v26, %s10911_s17  ;;  %v10733_v53 = vpack.i.bf16 %v14378_v41, %v14381_v14  ;;  %v9381_v55 = vsel %vm9378_vm11, %v13688_v60, %v10591_v11 }
 0x434   : > { %10714 = vrot.lane.b32.xlu0 %v10713_v24, %s10912_s18  ;;  %v10315_v39 = vpack.c.bf16 %v9382_v27, %v9381_v55 }
 0x437   : > { %v10595_v56 = vpop.permute.xlu0 %10594  ;;  %10734 = vrot.lane.b32.xlu1 %v10733_v53, %s10911_s17 }
 0x438   : > { %v10597_v20 = vunpack.i.h.bf16 %v10595_v56  ;;  %v10596_v63 = vunpack.i.l.bf16 %v10595_v56  ;;  %10729 = vrot.lane.b32.xlu0 %v14321_v8, %s10913_s20  ;;  %v14924_v8 = vld [vmem:[#allocation12_spill] sm:$0xff] }
 0x43a   : > { %v9102_v62 = vsel %vm4243_vm9, %v13685_v7, %v10597_v20  ;;  %v9101_v48 = vsel %vm4243_vm9, %v14924_v8, %v10596_v63 }
 0x43c   : > { %v10600_v51 = vpop.permute.xlu1 %10599  ;;  %v10610_v59 = vpop.permute.xlu0 %10609  ;;  %10739 = vrot.lane.b32.xlu0 %v10733_v53, %s10913_s20 }
 0x43d   : > { %v10602_v38 = vunpack.i.h.bf16 %v10600_v51  ;;  %v10601_v9 = vunpack.i.l.bf16 %v10600_v51  ;;  %v10612_v19 = vunpack.i.h.bf16 %v10610_v59  ;;  %v10611_v44 = vunpack.i.l.bf16 %v10610_v59 }
 0x43f   : > { %v14394_v47 = vpack.c.bf16 %v10602_v38, %v10601_v9  ;;  %v9413_v57 = vsel %vm9115_vm10, %v10591_v11, %v10601_v9  ;;  %v9414_v3 = vsel %vm9115_vm10, %v10592_v31, %v10602_v38  ;;  %v9384_v37 = vsel %vm9378_vm11, %v14925_v21, %v10612_v19  ;;  %v14927_v31 = vld [vmem:[#allocation7_spill] sm:$0xff] }
 0x440   : > { %v10605_v52 = vpop.permute.xlu1 %10604  ;;  %v10313_v50 = vpack.c.bf16 %v9414_v3, %v9413_v57  ;;  %v9383_v10 = vsel %vm9378_vm11, %v14926_v61, %v10611_v44  ;;  %v14928_v57 = vld [vmem:[#allocation2_spill] sm:$0xff] }
 0x441   : > { %v10607_v60 = vunpack.i.h.bf16 %v10605_v52  ;;  %v10606_v22 = vunpack.i.l.bf16 %v10605_v52  ;;  %v10319_v0 = vpack.c.bf16 %v9384_v37, %v9383_v10  ;;  %v14929_v52 = vld [vmem:[#allocation6_spill] sm:$0xff] }
 0x442   : > { %10314 = vmatprep.subr.bf16.mxu0 %v10313_v50 }
 0x443   : > { %v14404_v46 = vsel %vm9115_vm10, %v9101_v48, %v10606_v22  ;;  %v14407_v7 = vsel %vm9115_vm10, %v9102_v62, %v10607_v60  ;;  %10316 = vmatpush1.bf16.xpose.msra.mxu0 %v10315_v39 }
 0x444   : > { %v10620_v1 = vpop.permute.xlu1 %10619  ;;  %v10743_v32 = vpack.i.bf16 %v14407_v7, %v14404_v46 }
 0x445   : > { %v10622_v58 = vunpack.i.h.bf16 %v10620_v1  ;;  %v10621_v33 = vunpack.i.l.bf16 %v10620_v1 }
 0x446   : > { %10744 = vrot.lane.b32.xlu1 %v10743_v32, %s10911_s17  ;;  %10749 = vrot.lane.b32.xlu0 %v10743_v32, %s10913_s20 }
 0x447   : > { %v14417_v49 = vpack.c.bf16 %v10622_v58, %v10621_v33  ;;  %v9415_v45 = vsel %vm9115_vm10, %v10611_v44, %v10621_v33  ;;  %v9416_v15 = vsel %vm9115_vm10, %v10612_v19, %v10622_v58 }
 0x448   : > { %v10317_v17 = vpack.c.bf16 %v9416_v15, %v9415_v45 }
 0x449   : > { %v10625_v54 = vpop.permute.xlu1 %10624 }
 0x44a   : > { %v10615_v26 = vpop.permute.xlu0 %10614  ;;  %10318 = vmatprep.subr.bf16.mxu0 %v10317_v17  ;;  %v10627_v24 = vunpack.i.h.bf16 %v10625_v54  ;;  %v10626_v56 = vunpack.i.l.bf16 %v10625_v54  ;;  %v14930_v17 = vld [vmem:[#allocation14_spill] sm:$0xff]  ;;  %v14931_v54 = vld [vmem:[#allocation5_spill] sm:$0xff] }
 0x44b   : > { %v10617_v2 = vunpack.i.h.bf16 %v10615_v26  ;;  %v10616_v6 = vunpack.i.l.bf16 %v10615_v26  ;;  %10320 = vmatpush1.bf16.xpose.msra.mxu0 %v10319_v0 }
 0x44d   : > { %v9104_v53 = vsel %vm4243_vm9, %v13838_v40, %v10617_v2  ;;  %v9103_v11 = vsel %vm4243_vm9, %v14927_v31, %v10616_v6  ;;  %v10640_v63 = vpop.permute.xlu1 %10639 }
 0x44e   : > { %v14426_v20 = vsel %vm9115_vm10, %v9103_v11, %v10626_v56  ;;  %v14429_v51 = vsel %vm9115_vm10, %v9104_v53, %v10627_v24  ;;  %v10630_v38 = vpop.permute.xlu0 %10629  ;;  %v10642_v59 = vunpack.i.h.bf16 %v10640_v63  ;;  %v10641_v27 = vunpack.i.l.bf16 %v10640_v63 }
 0x44f   : > { %v10758_v9 = vpack.i.bf16 %v14429_v51, %v14426_v20  ;;  %v10632_v55 = vunpack.i.h.bf16 %v10630_v38  ;;  %v10631_v62 = vunpack.i.l.bf16 %v10630_v38 }
 0x450   : > { %v14435_v40 = vpack.c.bf16 %v10642_v59, %v10641_v27 }
 0x451   : > { %10759 = vrot.lane.b32.xlu0 %v10758_v9, %s10913_s20  ;;  %10754 = vrot.lane.b32.xlu1 %v10758_v9, %s10911_s17  ;;  %v9386_v3 = vsel %vm9378_vm11, %v14928_v57, %v10632_v55  ;;  %v9385_v8 = vsel %vm9378_vm11, %v14929_v52, %v10631_v62  ;;  %v9417_v48 = vsel %vm9115_vm10, %v10631_v62, %v10641_v27  ;;  %v10645_v39 = vpop.permute.xlu1 %10644 }
 0x452   : > { %v10323_v50 = vpack.c.bf16 %v9386_v3, %v9385_v8  ;;  %v9418_v19 = vsel %vm9115_vm10, %v10632_v55, %v10642_v59  ;;  %v10647_v21 = vunpack.i.h.bf16 %v10645_v39  ;;  %v10646_v37 = vunpack.i.l.bf16 %v10645_v39 }
 0x453   : > { %v10321_v44 = vpack.c.bf16 %v9418_v19, %v9417_v48  ;;  %v10635_v60 = vpop.permute.xlu0 %10634 }
 0x454   : > { %v10637_v22 = vunpack.i.h.bf16 %v10635_v60  ;;  %v10636_v1 = vunpack.i.l.bf16 %v10635_v60 }
 0x455   : > { %10322 = vmatprep.subr.bf16.mxu0 %v10321_v44 }
 0x456   : > { %10324 = vmatpush1.bf16.xpose.msra.mxu0 %v10323_v50  ;;  %v9106_v61 = vsel %vm4243_vm9, %v13940_v42, %v10637_v22  ;;  %v9105_v10 = vsel %vm4243_vm9, %v13897_v35, %v10636_v1  ;;  %v14932_v1 = vld [vmem:[#allocation8_spill] sm:$0xff] }
 0x457   : > { %v14448_v32 = vsel %vm9115_vm10, %v9105_v10, %v10646_v37  ;;  %v14451_v58 = vsel %vm9115_vm10, %v9106_v61, %v10647_v21  ;;  %v10650_v33 = vpop.permute.xlu0 %10649  ;;  %v14933_v37 = vld [vmem:[#allocation9_spill] sm:$0xff] }
 0x458   : > { %v10768_v0 = vpack.i.bf16 %v14451_v58, %v14448_v32  ;;  %v10652_v45 = vunpack.i.h.bf16 %v10650_v33  ;;  %v10651_v15 = vunpack.i.l.bf16 %v10650_v33 }
 0x45a   : > { %10769 = vrot.lane.b32.xlu0 %v10768_v0, %s10913_s20  ;;  %10764 = vrot.lane.b32.xlu1 %v10768_v0, %s10911_s17  ;;  %v9388_v35 = vsel %vm9378_vm11, %v14930_v17, %v10652_v45  ;;  %v9387_v26 = vsel %vm9378_vm11, %v14931_v54, %v10651_v15 }
 0x45b   : > { %v10327_v56 = vpack.c.bf16 %v9388_v35, %v9387_v26 }
 0x461   : > { %v10660_v42 = vpop.permute.xlu1 %10659 }
 0x462   : > { %v10662_v2 = vunpack.i.h.bf16 %v10660_v42  ;;  %v10661_v6 = vunpack.i.l.bf16 %v10660_v42 }
 0x464   : > { %v14461_v24 = vpack.c.bf16 %v10662_v2, %v10661_v6  ;;  %v9419_v53 = vsel %vm9115_vm10, %v10651_v15, %v10661_v6  ;;  %v9420_v31 = vsel %vm9115_vm10, %v10652_v45, %v10662_v2 }
 0x465   : > { %v10325_v11 = vpack.c.bf16 %v9420_v31, %v9419_v53 }
 0x467   : > { %10326 = vmatprep.subr.bf16.mxu0 %v10325_v11 }
 0x468   : > { %10328 = vmatpush1.bf16.xpose.msra.mxu0 %v10327_v56 }
 0x46d   : > { %v10665_v63 = vpop.permute.xlu1 %10664 }
 0x46e   : > { %v10667_v3 = vunpack.i.h.bf16 %v10665_v63  ;;  %v10666_v52 = vunpack.i.l.bf16 %v10665_v63 }
 0x478   : > { %v10680_v38 = vpop.permute.xlu1 %10679 }
 0x479   : > { %v10682_v9 = vunpack.i.h.bf16 %v10680_v38  ;;  %v10681_v59 = vunpack.i.l.bf16 %v10680_v38 }
 0x47b   : > { %v10655_v27 = vpop.permute.xlu0 %10654  ;;  %v14465_v55 = vpack.c.bf16 %v10682_v9, %v10681_v59 }
 0x47c   : > { %v10657_v62 = vunpack.i.h.bf16 %v10655_v27  ;;  %v10656_v57 = vunpack.i.l.bf16 %v10655_v27 }
 0x47e   : > { %v9108_v8 = vsel %vm4243_vm9, %v14053_v34, %v10657_v62  ;;  %v9107_v48 = vsel %vm4243_vm9, %v14034_v28, %v10656_v57  ;;  %v14934_v62 = vld [vmem:[#allocation10_spill] sm:$0xff]  ;;  %v14935_v57 = vld [vmem:[#allocation13_spill] sm:$0xff] }
 0x47f   : > { %v14472_v50 = vsel %vm9115_vm10, %v9107_v48, %v10666_v52  ;;  %v14475_v19 = vsel %vm9115_vm10, %v9108_v8, %v10667_v3  ;;  %v10670_v44 = vpop.permute.xlu0 %10669 }
 0x480   : > { %v10672_v39 = vunpack.i.h.bf16 %v10670_v44  ;;  %v10671_v60 = vunpack.i.l.bf16 %v10670_v44  ;;  %v10778_v22 = vpack.i.bf16 %v14475_v19, %v14472_v50 }
 0x482   : > { %v9390_v21 = vsel %vm9378_vm11, %v14932_v1, %v10672_v39  ;;  %v9389_v34 = vsel %vm9378_vm11, %v14933_v37, %v10671_v60  ;;  %10779 = vrot.lane.b32.xlu0 %v10778_v22, %s10913_s20  ;;  %10774 = vrot.lane.b32.xlu1 %v10778_v22, %s10911_s17  ;;  %v9421_v28 = vsel %vm9115_vm10, %v10671_v60, %v10681_v59 }
 0x483   : > { %v10331_v61 = vpack.c.bf16 %v9390_v21, %v9389_v34  ;;  %v9422_v10 = vsel %vm9115_vm10, %v10672_v39, %v10682_v9 }
 0x484   : > { %v10329_v33 = vpack.c.bf16 %v9422_v10, %v9421_v28 }
 0x486   : > { %v10685_v0 = vpop.permute.xlu1 %10684  ;;  %10330 = vmatprep.subr.bf16.mxu0 %v10329_v33 }
 0x487   : > { %10332 = vmatpush1.bf16.xpose.msra.mxu0 %v10331_v61  ;;  %v10687_v35 = vunpack.i.h.bf16 %v10685_v0  ;;  %v10686_v54 = vunpack.i.l.bf16 %v10685_v0 }
 0x489   : > { %v10675_v45 = vpop.permute.xlu0 %10674 }
 0x48a   : > { %v10677_v15 = vunpack.i.h.bf16 %v10675_v45  ;;  %v10676_v42 = vunpack.i.l.bf16 %v10675_v45  ;;  %v10700_v17 = vpop.permute.xlu1 %10699 }
 0x48b   : > { %v10702_v26 = vunpack.i.h.bf16 %v10700_v17  ;;  %v10701_v2 = vunpack.i.l.bf16 %v10700_v17 }
 0x48c   : > { %v9110_v6 = vsel %vm4243_vm9, %v14147_v43, %v10677_v15  ;;  %v9109_v56 = vsel %vm4243_vm9, %v14114_v13, %v10676_v42 }
 0x48d   : > { %v14492_v53 = vsel %vm9115_vm10, %v9109_v56, %v10686_v54  ;;  %v14495_v31 = vsel %vm9115_vm10, %v9110_v6, %v10687_v35  ;;  %v10690_v11 = vpop.permute.xlu0 %10689  ;;  %v14497_v63 = vpack.c.bf16 %v10702_v26, %v10701_v2  ;;  %v14936_v35 = vld [vmem:[#allocation11_spill] sm:$0xff] }
 0x48e   : > { %v10692_v38 = vunpack.i.h.bf16 %v10690_v11  ;;  %v10691_v9 = vunpack.i.l.bf16 %v10690_v11  ;;  %v10788_v59 = vpack.i.bf16 %v14495_v31, %v14492_v53  ;;  %v10705_v27 = vpop.permute.xlu1 %10704 }
 0x48f   : > { %v10707_v48 = vunpack.i.h.bf16 %v10705_v27  ;;  %v10706_v21 = vunpack.i.l.bf16 %v10705_v27 }
 0x490   : > { %v9392_v43 = vsel %vm9378_vm11, %v14934_v62, %v10692_v38  ;;  %v9391_v13 = vsel %vm9378_vm11, %v14935_v57, %v10691_v9  ;;  %10789 = vrot.lane.b32.xlu0 %v10788_v59, %s10913_s20  ;;  %10784 = vrot.lane.b32.xlu1 %v10788_v59, %s10911_s17  ;;  %v9423_v3 = vsel %vm9115_vm10, %v10691_v9, %v10701_v2  ;;  %v14528_v9 = vld [vmem:[%s14675_s7] sm:$0xff] }
 0x491   : > { %v10695_v52 = vpop.permute.xlu0 %10694  ;;  %v9424_v8 = vsel %vm9115_vm10, %v10692_v38, %v10702_v26  ;;  %v10335_v1 = vpack.c.bf16 %v9392_v43, %v9391_v13  ;;  %v14937_v26 = vld [vmem:[#allocation18_spill] sm:$0xff]  ;;  %v9453_v62 = vcombine.high %v14528_v9, %v14528_v9 }
 0x492   : > { %v10697_v44 = vunpack.i.h.bf16 %v10695_v52  ;;  %v10696_v39 = vunpack.i.l.bf16 %v10695_v52  ;;  %v10333_v60 = vpack.c.bf16 %v9424_v8, %v9423_v3  ;;  %v10720_v22 = vpop.permute.xlu1 %10719 }
 0x493   : > { %v10722_v37 = vunpack.i.h.bf16 %v10720_v22  ;;  %v10721_v34 = vunpack.i.l.bf16 %v10720_v22  ;;  %9585 = vmatprep.mubr.f32.mxu0 %v9453_v62 }
 0x494   : > { %v9112_v28 = vsel %vm4243_vm9, %v14257_v12, %v10697_v44  ;;  %v9111_v61 = vsel %vm4243_vm9, %v14249_v18, %v10696_v39  ;;  %10334 = vmatprep.subr.bf16.mxu0 %v10333_v60 }
 0x495   : > { %10336 = vmatpush1.bf16.xpose.msra.mxu0 %v10335_v1  ;;  %v10710_v10 = vpop.permute.xlu0 %10709  ;;  %v9148_v33 = vsel %vm9115_vm10, %v9111_v61, %v10706_v21  ;;  %v9149_v0 = vsel %vm9115_vm10, %v9112_v28, %v10707_v48  ;;  %v14515_v45 = vpack.c.bf16 %v10722_v37, %v10721_v34 }
 0x496   : > { %v10712_v15 = vunpack.i.h.bf16 %v10710_v10  ;;  %v10711_v42 = vunpack.i.l.bf16 %v10710_v10  ;;  %v10798_v17 = vpack.i.bf16 %v9149_v0, %v9148_v33  ;;  %v14554_v10 = vld [vmem:[%s14675_s7 + $0x8] sm:$0xf]  ;;  %v9445_v33 = vld [vmem:[%s14676_s8] sm:$0xf] }
 0x497   : > { %10127 = vmatprep.mubr.msk.f32.mxu1 %vm4243_vm9, %v14554_v10 }
 0x498   : > { %v9394_v54 = vsel %vm9378_vm11, %v14936_v35, %v10712_v15  ;;  %v9393_v12 = vsel %vm9378_vm11, %v14937_v26, %v10711_v42  ;;  %10799 = vrot.lane.b32.xlu0 %v10798_v17, %s10913_s20  ;;  %10794 = vrot.lane.b32.xlu1 %v10798_v17, %s10911_s17  ;;  %v9425_v18 = vsel %vm9115_vm10, %v10711_v42, %v10721_v34 }
 0x499   : > { %v9426_v2 = vsel %vm9115_vm10, %v10712_v15, %v10722_v37  ;;  %v10339_v56 = vpack.c.bf16 %v9394_v54, %v9393_v12 }
 0x49a   : > { %v10337_v6 = vpack.c.bf16 %v9426_v2, %v9425_v18 }
 0x49c   : > { %10338 = vmatprep.subr.bf16.mxu0 %v10337_v6 }
 0x49d   : > { %10340 = vmatpush1.bf16.xpose.msra.mxu0 %v10339_v56 }
 0x4a5   : > { %v10725_v11 = vpop.permute.xlu1 %10724 }
 0x4a6   : > { %v10715_v38 = vpop.permute.xlu0 %10714  ;;  %v10727_v43 = vunpack.i.h.bf16 %v10725_v11  ;;  %v10726_v57 = vunpack.i.l.bf16 %v10725_v11 }
 0x4a7   : > { %v10717_v59 = vunpack.i.h.bf16 %v10715_v38  ;;  %v10716_v27 = vunpack.i.l.bf16 %v10715_v38 }
 0x4a9   : > { %v9114_v13 = vsel %vm4243_vm9, %v14363_v16, %v10717_v59  ;;  %v9113_v3 = vsel %vm4243_vm9, %v14267_v25, %v10716_v27  ;;  %v10735_v52 = vpop.permute.xlu1 %10734 }
 0x4aa   : > { %v10737_v8 = vunpack.i.h.bf16 %v10735_v52  ;;  %v10736_v48 = vunpack.i.l.bf16 %v10735_v52  ;;  %v10730_v44 = vpop.permute.xlu0 %10729  ;;  %v9150_v39 = vsel %vm9115_vm10, %v9113_v3, %v10726_v57  ;;  %v9151_v60 = vsel %vm9115_vm10, %v9114_v13, %v10727_v43 }
 0x4ab   : > { %v10732_v22 = vunpack.i.h.bf16 %v10730_v44  ;;  %v10731_v1 = vunpack.i.l.bf16 %v10730_v44  ;;  %v10803_v21 = vpack.i.bf16 %v9151_v60, %v9150_v39 }
 0x4ac   : > { %v10373_v16 = vpack.c.bf16 %v10737_v8, %v10736_v48 }
 0x4ad   : > { %v9396_v25 = vsel %vm9378_vm11, %v14270_v5, %v10732_v22  ;;  %v9395_v34 = vsel %vm9378_vm11, %v14273_v23, %v10731_v1  ;;  %10804 = vrot.lane.b32.xlu1 %v10803_v21, %s10911_s17  ;;  %v9427_v28 = vsel %vm9115_vm10, %v10731_v1, %v10736_v48  ;;  %v9428_v61 = vsel %vm9115_vm10, %v10732_v22, %v10737_v8 }
 0x4ae   : > { %v10343_v0 = vpack.c.bf16 %v9396_v25, %v9395_v34  ;;  %10375 = vmatprep.subr.msk.bf16.mxu1 %vm14540_vm12, %v10373_v16  ;;  %v10341_v5 = vpack.c.bf16 %v9428_v61, %v9427_v28  ;;  %v10914_v23 = vmov 0   ;;  %v10740_v15 = vpop.permute.xlu0 %10739 }
 0x4af   : > { %10378 = vmatpush3.bf16.xpose.msk.msra.mxu1 %vm14540_vm12, %v14358_v4  ;;  %10808 = vset.pattern.permute.xlu0 %v10914_v23  ;;  %v10742_v42 = vunpack.i.h.bf16 %v10740_v15  ;;  %v10741_v17 = vunpack.i.l.bf16 %v10740_v15 }
 0x4b0   : > { %10342 = vmatprep.subr.bf16.mxu0 %v10341_v5  ;;  %9448 = vperm.xlu0 %10808, %v9445_v33  }
 0x4b1   : > { %10344 = vmatpush1.bf16.xpose.msra.mxu0 %v10343_v0  ;;  %v9398_v12 = vsel %vm9378_vm11, %v14308_v30, %v10742_v42  ;;  %v9397_v18 = vsel %vm9378_vm11, %v14311_v36, %v10741_v17 }
 0x4b2   : > { %v10347_v11 = vpack.c.bf16 %v9398_v12, %v9397_v18 }
 0x4b8   : > { %v10745_v35 = vpop.permute.xlu1 %10744  ;;  %v10750_v38 = vpop.permute.xlu0 %10749 }
 0x4b9   : > { %v10747_v54 = vunpack.i.h.bf16 %v10745_v35  ;;  %v10746_v26 = vunpack.i.l.bf16 %v10745_v35  ;;  %v10752_v30 = vunpack.i.h.bf16 %v10750_v38  ;;  %v10751_v59 = vunpack.i.l.bf16 %v10750_v38 }
 0x4bb   : > { %v10379_v2 = vpack.c.bf16 %v10747_v54, %v10746_v26  ;;  %v9429_v4 = vsel %vm9115_vm10, %v10741_v17, %v10746_v26  ;;  %v9430_v6 = vsel %vm9115_vm10, %v10742_v42, %v10747_v54  ;;  %v9400_v43 = vsel %vm9378_vm11, %v14378_v41, %v10752_v30 }
 0x4bc   : > { %v10345_v56 = vpack.c.bf16 %v9430_v6, %v9429_v4  ;;  %v9399_v57 = vsel %vm9378_vm11, %v14381_v14, %v10751_v59 }
 0x4bd   : > { %10381 = vmatprep.subr.msk.bf16.mxu1 %vm14540_vm12, %v10379_v2  ;;  %v10351_v8 = vpack.c.bf16 %v9400_v43, %v9399_v57 }
 0x4be   : > { %10384 = vmatpush3.bf16.xpose.msk.msra.mxu1 %vm14540_vm12, %v14394_v47  ;;  %10346 = vmatprep.subr.bf16.mxu0 %v10345_v56 }
 0x4bf   : > { %10348 = vmatpush1.bf16.xpose.msra.mxu0 %v10347_v11 }
 0x4c3   : > { %v10755_v36 = vpop.permute.xlu1 %10754  ;;  %v10760_v48 = vpop.permute.xlu0 %10759 }
 0x4c4   : > { %v10757_v27 = vunpack.i.h.bf16 %v10755_v36  ;;  %v10756_v62 = vunpack.i.l.bf16 %v10755_v36  ;;  %v10762_v41 = vunpack.i.h.bf16 %v10760_v48  ;;  %v10761_v44 = vunpack.i.l.bf16 %v10760_v48 }
 0x4c6   : > { %v10385_v13 = vpack.c.bf16 %v10757_v27, %v10756_v62  ;;  %v9431_v3 = vsel %vm9115_vm10, %v10751_v59, %v10756_v62  ;;  %v9432_v52 = vsel %vm9115_vm10, %v10752_v30, %v10757_v27  ;;  %v9402_v22 = vsel %vm9378_vm11, %v14407_v7, %v10762_v41 }
 0x4c7   : > { %v10349_v47 = vpack.c.bf16 %v9432_v52, %v9431_v3  ;;  %v9401_v1 = vsel %vm9378_vm11, %v14404_v46, %v10761_v44 }
 0x4c8   : > { %10387 = vmatprep.subr.msk.bf16.mxu1 %vm14540_vm12, %v10385_v13  ;;  %v10355_v34 = vpack.c.bf16 %v9402_v22, %v9401_v1 }
 0x4c9   : > { %10390 = vmatpush3.bf16.xpose.msk.msra.mxu1 %vm14540_vm12, %v14417_v49  ;;  %10350 = vmatprep.subr.bf16.mxu0 %v10349_v47 }
 0x4ca   : > { %10352 = vmatpush1.bf16.xpose.msra.mxu0 %v10351_v8 }
 0x4cc   : > { %v10765_v14 = vpop.permute.xlu1 %10764  ;;  %v10770_v7 = vpop.permute.xlu0 %10769 }
 0x4cd   : > { %v10767_v39 = vunpack.i.h.bf16 %v10765_v14  ;;  %v10766_v60 = vunpack.i.l.bf16 %v10765_v14  ;;  %v10772_v28 = vunpack.i.h.bf16 %v10770_v7  ;;  %v10771_v61 = vunpack.i.l.bf16 %v10770_v7 }
 0x4cf   : > { %v10391_v21 = vpack.c.bf16 %v10767_v39, %v10766_v60  ;;  %v9433_v16 = vsel %vm9115_vm10, %v10761_v44, %v10766_v60  ;;  %v9434_v25 = vsel %vm9115_vm10, %v10762_v41, %v10767_v39  ;;  %v9404_v5 = vsel %vm9378_vm11, %v14429_v51, %v10772_v28 }
 0x4d0   : > { %v10353_v49 = vpack.c.bf16 %v9434_v25, %v9433_v16  ;;  %v9403_v23 = vsel %vm9378_vm11, %v14426_v20, %v10771_v61 }
 0x4d1   : > { %10393 = vmatprep.subr.msk.bf16.mxu1 %vm14540_vm12, %v10391_v21  ;;  %v10359_v35 = vpack.c.bf16 %v9404_v5, %v9403_v23 }
 0x4d2   : > { %10396 = vmatpush3.bf16.xpose.msk.msra.mxu1 %vm14540_vm12, %v14435_v40  ;;  %10354 = vmatprep.subr.bf16.mxu0 %v10353_v49 }
 0x4d3   : > { %10356 = vmatpush1.bf16.xpose.msra.mxu0 %v10355_v34 }
 0x4f4   : > { %v10775_v46 = vpop.permute.xlu1 %10774  ;;  %v10780_v51 = vpop.permute.xlu0 %10779 }
 0x4f5   : > { %v10777_v33 = vunpack.i.h.bf16 %v10775_v46  ;;  %v10776_v0 = vunpack.i.l.bf16 %v10775_v46  ;;  %v10782_v54 = vunpack.i.h.bf16 %v10780_v51  ;;  %v10781_v26 = vunpack.i.l.bf16 %v10780_v51  ;;  %v9679_v51 = vld [vmem:[%s432_s19] sm:$0xf] }
 0x4f7   : > { %v10397_v15 = vpack.c.bf16 %v10777_v33, %v10776_v0  ;;  %v9435_v42 = vsel %vm9115_vm10, %v10771_v61, %v10776_v0  ;;  %v9436_v17 = vsel %vm9115_vm10, %v10772_v28, %v10777_v33  ;;  %v9406_v2 = vsel %vm9378_vm11, %v14451_v58, %v10782_v54 }
 0x4f8   : > { %v10357_v40 = vpack.c.bf16 %v9436_v17, %v9435_v42  ;;  %v9405_v4 = vsel %vm9378_vm11, %v14448_v32, %v10781_v26 }
 0x4f9   : > { %10399 = vmatprep.subr.msk.bf16.mxu1 %vm14540_vm12, %v10397_v15  ;;  %v10363_v30 = vpack.c.bf16 %v9406_v2, %v9405_v4 }
 0x4fa   : > { %10402 = vmatpush3.bf16.xpose.msk.msra.mxu1 %vm14540_vm12, %v14461_v24  ;;  %10358 = vmatprep.subr.bf16.mxu0 %v10357_v40 }
 0x4fb   : > { %10360 = vmatpush1.bf16.xpose.msra.mxu0 %v10359_v35 }
 0x502   : > { %v10785_v20 = vpop.permute.xlu1 %10784  ;;  %v10790_v11 = vpop.permute.xlu0 %10789 }
 0x503   : > { %v10787_v12 = vunpack.i.h.bf16 %v10785_v20  ;;  %v10786_v18 = vunpack.i.l.bf16 %v10785_v20  ;;  %v10792_v59 = vunpack.i.h.bf16 %v10790_v11  ;;  %v10791_v58 = vunpack.i.l.bf16 %v10790_v11 }
 0x505   : > { %v10403_v6 = vpack.c.bf16 %v10787_v12, %v10786_v18  ;;  %v9437_v56 = vsel %vm9115_vm10, %v10781_v26, %v10786_v18  ;;  %v9438_v24 = vsel %vm9115_vm10, %v10782_v54, %v10787_v12  ;;  %v9408_v62 = vsel %vm9378_vm11, %v14475_v19, %v10792_v59 }
 0x506   : > { %v10361_v38 = vpack.c.bf16 %v9438_v24, %v9437_v56  ;;  %v9407_v43 = vsel %vm9378_vm11, %v14472_v50, %v10791_v58 }
 0x507   : > { %10405 = vmatprep.subr.msk.bf16.mxu1 %vm14540_vm12, %v10403_v6  ;;  %v10367_v52 = vpack.c.bf16 %v9408_v62, %v9407_v43 }
 0x508   : > { %10408 = vmatpush3.bf16.xpose.msk.msra.mxu1 %vm14540_vm12, %v14465_v55  ;;  %10362 = vmatprep.subr.bf16.mxu0 %v10361_v38 }
 0x509   : > { %10364 = vmatpush1.bf16.xpose.msra.mxu0 %v10363_v30 }
 0x50a   : > { %v10795_v32 = vpop.permute.xlu1 %10794  ;;  %v10800_v19 = vpop.permute.xlu0 %10799 }
 0x50b   : > { %v10797_v36 = vunpack.i.h.bf16 %v10795_v32  ;;  %v10796_v27 = vunpack.i.l.bf16 %v10795_v32  ;;  %v10802_v47 = vunpack.i.h.bf16 %v10800_v19  ;;  %v10801_v8 = vunpack.i.l.bf16 %v10800_v19 }
 0x50d   : > { %v10409_v57 = vpack.c.bf16 %v10797_v36, %v10796_v27  ;;  %v9439_v13 = vsel %vm9115_vm10, %v10791_v58, %v10796_v27  ;;  %v9440_v3 = vsel %vm9115_vm10, %v10792_v59, %v10797_v36  ;;  %v9410_v44 = vsel %vm9378_vm11, %v14495_v31, %v10802_v47 }
 0x50e   : > { %v10365_v55 = vpack.c.bf16 %v9440_v3, %v9439_v13  ;;  %v9409_v14 = vsel %vm9378_vm11, %v14492_v53, %v10801_v8 }
 0x50f   : > { %10411 = vmatprep.subr.msk.bf16.mxu1 %vm14540_vm12, %v10409_v57  ;;  %v10371_v1 = vpack.c.bf16 %v9410_v44, %v9409_v14 }
 0x510   : > { %10414 = vmatpush3.bf16.xpose.msk.msra.mxu1 %vm14540_vm12, %v14497_v63  ;;  %10366 = vmatprep.subr.bf16.mxu0 %v10365_v55 }
 0x511   : > { %10368 = vmatpush1.bf16.xpose.msra.mxu0 %v10367_v52 }
 0x51f   : > { %v10805_v50 = vpop.permute.xlu1 %10804 }
 0x520   : > { %v10807_v48 = vunpack.i.h.bf16 %v10805_v50  ;;  %v10806_v41 = vunpack.i.l.bf16 %v10805_v50 }
 0x522   : > { %v10415_v39 = vpack.c.bf16 %v10807_v48, %v10806_v41  ;;  %v9441_v60 = vsel %vm9115_vm10, %v10801_v8, %v10806_v41  ;;  %v9442_v22 = vsel %vm9115_vm10, %v10802_v47, %v10807_v48 }
 0x523   : > { %v10369_v63 = vpack.c.bf16 %v9442_v22, %v9441_v60 }
 0x524   : > { %10417 = vmatprep.subr.msk.bf16.mxu1 %vm14540_vm12, %v10415_v39 }
 0x525   : > { %10370 = vmatprep.subr.bf16.mxu0 %v10369_v63  ;;  %10420 = vmatpush3.bf16.xpose.msk.msra.mxu1 %vm14540_vm12, %v14515_v45 }
 0x526   : > { %10372 = vmatpush1.bf16.xpose.msra.mxu0 %v10371_v1 }
 0x52c   : > { %10128 = vmatmul.mubr.msk.f32.vlgmr.msra.gmra.mrb[84].mxu1 %vm4243_vm9, %v14554_v10 }
 0x52d   : > { %9586 = vmatmul.mubr.f32.vlgmr.msra.gmra.mrb[84].mxu0 %v14528_v9 }
 0x52f   : > { %v9449_v53 = vpop.permute.xlu0 %9448 }
 0x5ff   : > { %v9658_v31 = vpop.f32.mrb[84].mxu1 }
 0x600   : > { %v9587_v21 = vpop.f32.mrb[84].mxu0  ;;  %v9660_v16 = vpop.f32.mrb[85].mxu1 }
 0x601   : > { %v9588_v25 = vadd.f32 %v9587_v21, %v9449_v53  ;;  %v9589_v49 = vpop.f32.mrb[85].mxu0 }
 0x602   : > { %v9590_v34 = vadd.f32 %v9589_v49, %v9449_v53 }
 0x603   : > { %v9659_v7 = vadd.f32 %v9658_v31, %v9588_v25 }
 0x604   : > { %v9661_v28 = vadd.f32 %v9660_v16, %v9590_v34 }
 0x605   : > { %v9663_v61 = vadd.f32 2.0, %v9659_v7 }
 0x606   : > { %v9664_v46 = vadd.f32 2.0, %v9661_v28  ;;  %v9682_v37 = vcombine.low %v9659_v7, %v9661_v28 }
 0x607   : > { %v10041_v45 = vmul.f32 -1.442695, %v9663_v61 }
 0x608   : > { %v10042_v33 = vmul.f32 -1.442695, %v9664_v46  ;;  %v9689_v40 = vrot.slane %v9682_v37, %v12669_v29 }
 0x609   : > { %10856 = vpow2.f32 %v10041_v45 }
 0x60a   : > { %10858 = vpow2.f32 %v10042_v33  ;;  %v9691_v26 = vadd.f32 %v9689_v40, %v9679_v51 }
 0x613   : > { %v10857_v10 = vpop.eup %10856 }
 0x614   : > { %v10859_v0 = vpop.eup %10858  ;;  %v9671_v9 = vadd.f32 1.0, %v10857_v10 }
 0x615   : > { %v9672_v5 = vadd.f32 1.0, %v10859_v0 }
 0x616   : > { %10860 = vrcp.f32 %v9671_v9 }
 0x617   : > { %10862 = vrcp.f32 %v9672_v5 }
 0x620   : > { %v10861_v23 = vpop.eup %10860 }
 0x621   : > { %v10863_v15 = vpop.eup %10862  ;;  %v9677_v42 = vadd.f32 0.0001, %v10861_v23 }
 0x622   : > { %v9678_v17 = vadd.f32 0.0001, %v10863_v15 }
 0x623   : > { %10864 = vlog2.f32 %v9677_v42 }
 0x624   : > { %v9694_v35 = vcombine.low %v9677_v42, %v9678_v17  ;;  %10866 = vlog2.f32 %v9678_v17 }
 0x626   : > { %v9701_v54 = vrot.slane %v9694_v35, %v12669_v29 }
 0x628   : > { %v9702_v20 = vcombine.high %v9701_v54, %v9701_v54 }
 0x62a   : > { %v9704_v12 = vmul.f32 %v9702_v20, %v9691_v26 }
 0x62c   : > { %9705 = vst [vmem:[%s446_s23] sm:$0xf] %v9704_v12 }
 0x62d   : > { %v10865_v18 = vpop.eup %10864 }
 0x62e   : > { %v10867_v2 = vpop.eup %10866  ;;  %v9707_v4 = vmul.f32 0.6931472, %v10865_v18 }
 0x62f   : > { %v9709_v6 = vmul.f32 0.6931472, %v10867_v2 }
 0x630   : > { %v9712_v56 = vrot.slane %v9707_v4, 2 }
 0x631   : > { %v9713_v11 = vrot.slane %v9709_v6, 2 }
 0x632   : > { %v9717_v24 = vsel %vm9716_vm13, %v9712_v56, 0.0 }
 0x633   : > { %v9718_v38 = vsel %vm9716_vm13, %v9713_v11, 0.0 }
 0x634   : > { %v9719_v30 = vadd.f32 %v9718_v38, %v9717_v24 }
 0x636   : > { %9720 = vadd.xlane.f32.xlu1 %v9719_v30 }
 0x6c3   : > { %v9721_v29 = vpop.xlane.xlu1 %9720 }
 0x6c4   : > { %v9722_v59 = vrot.slane %v9721_v29, 4 }
 0x6c6   : > { %v9723_v58 = vadd.f32 %v9722_v59, %v9721_v29 }
 0x6c8   : > { %v9724_v32 = vrot.slane %v9723_v58, 2 }
 0x6ca   : > { %v9725_v36 = vadd.f32 %v9724_v32, %v9723_v58 }
 0x6cc   : > { %v9726_v27 = vrot.slane %v9725_v36, 1 }
 0x6ce   : > { %v9727_v62 = vadd.f32 %v9726_v27, %v9725_v36 }
 0x6d0   : > { %10426 = vpush %v9727_v62 }
 0x701   : > { %s10427_s26 = spop %10426 }
 0x702   : > { %v9729_v43 = vstv %s10427_s26 }
 0x703   : > { %9731 = vst.msk [vmem:[%s452_s25] sm:$0x1] %vm9730_vm14, %v9729_v43 }
 0x704 PF: > { %s21_s15 = sadd.s32 1, %s10897_s15   ;;  %s14940_s13 = smov %s10893_s14 }
 0x705   : > { %p18_p5 = scmp.ge.s32.totalorder %s21_s15, 4   ;;  %s14941_s14 = smov %s14943_s16 }
 0x707   :  { %20 = sbr.rel (!%p18_p5) target bundleno = 2 (0x2), region = 105 }

</bundles_post_ra>
